<compile_context>
chip_gen: v6e
topology: v6e:2x2x1
jax: 0.10.0
libtpu: 0.0.40
codegen_flags: <defaults>
</compile_context>

<pallas_src>
import functools

import jax
import jax.numpy as jnp
from jax.experimental import pallas as pl
from jax.experimental.pallas import tpu as pltpu


# ----------------------------------------------------------------------------
# Fused kernel: all LSTM layers (both directions) + FC head in one invocation.
# ----------------------------------------------------------------------------
def _fused_kernel(*refs, hidden, num_layers, seq_len, batch):
    H, T, B = hidden, seq_len, batch
    x_ref = refs[0]
    lstm_refs = refs[1:1 + 6 * num_layers]
    (w1_ref, b1_ref, g1_ref, be1_ref,
     w2_ref, b2_ref, g2_ref, be2_ref,
     w3r_ref, b3_ref) = refs[1 + 6 * num_layers:1 + 6 * num_layers + 10]
    o_ref = refs[1 + 6 * num_layers + 10]

    def run_direction(inp2d, w_ih_ref, w_hh_ref, b_ref, reverse):
        # Hoisted, time-independent input projection: one (T*B, D_in) @ (D_in, 4H) matmul.
        xw = jnp.dot(inp2d, w_ih_ref[...], preferred_element_type=jnp.float32) + b_ref[...]
        w_hh = w_hh_ref[...]                      # read once, stays resident
        h = jnp.zeros((B, H), jnp.float32)
        c = jnp.zeros((B, H), jnp.float32)
        out = [None] * T
        steps = range(T - 1, -1, -1) if reverse else range(T)
        for t in steps:                           # static unroll: only h @ W_hh is serial
            gates = xw[t * B:(t + 1) * B, :] + jnp.dot(
                h, w_hh, preferred_element_type=jnp.float32)     # (B, 4H), gate order i,f,g,o
            sig = jax.nn.sigmoid(gates)           # one full-width EUP pass covers i/f/o gates
            i_g = sig[:, 0:H]
            f_g = sig[:, H:2 * H]
            o_g = sig[:, 3 * H:4 * H]
            g_g = jnp.tanh(gates[:, 2 * H:3 * H])
            c = f_g * c + i_g * g_g
            h = o_g * jnp.tanh(c)
            out[t] = h                            # indexed by forward-time output position
        return out

    inp2d = x_ref[...]                            # (T*B, D_in), time-major rows [t*B + b]
    last = None
    for layer in range(num_layers):
        base = 6 * layer
        hs_f = run_direction(inp2d, lstm_refs[base + 0], lstm_refs[base + 1],
                             lstm_refs[base + 2], reverse=False)
        hs_b = run_direction(inp2d, lstm_refs[base + 3], lstm_refs[base + 4],
                             lstm_refs[base + 5], reverse=True)
        rows = [jnp.concatenate([hs_f[t], hs_b[t]], axis=-1) for t in range(T)]  # (B, 2H)
        last = rows[T - 1]                        # == output[:, -1, :] (batch-first terms)
        if layer + 1 < num_layers:
            inp2d = jnp.concatenate(rows, axis=0)                                # (T*B, 2H)

    # FC head: Linear -> LN -> SiLU -> Linear -> LN -> SiLU -> Linear(., 1).  Dropout = identity.
    def layer_norm(y, g, b):
        mu = jnp.mean(y, axis=-1, keepdims=True)
        var = jnp.mean((y - mu) ** 2, axis=-1, keepdims=True)
        return (y - mu) * jax.lax.rsqrt(var + 1e-5) * g + b

    def silu(y):
        return y * jax.nn.sigmoid(y)

    h = jnp.dot(last, w1_ref[...], preferred_element_type=jnp.float32) + b1_ref[...]
    h = silu(layer_norm(h, g1_ref[...], be1_ref[...]))
    h = jnp.dot(h, w2_ref[...], preferred_element_type=jnp.float32) + b2_ref[...]
    h = silu(layer_norm(h, g2_ref[...], be2_ref[...]))
    # Final (H -> 1) projection: elementwise multiply + lane reduction (no 1-wide MXU output).
    out = jnp.sum(h * w3r_ref[...], axis=-1, keepdims=True) + b3_ref[...]
    o_ref[...] = out.astype(o_ref.dtype)


# ----------------------------------------------------------------------------
# Full forward (mirrors FineTunedLSTM.forward): one pallas_call per forward.
# ----------------------------------------------------------------------------
def finetuned_lstm_forward(x, params, hidden):
    if x.ndim == 2:
        x = x[:, None, :]                         # unsqueeze(1)
    B, T, D = x.shape
    # time-major, flattened to (T*B, D): row t*B + b  ==  x[b, t]
    x2d = jnp.transpose(x, (1, 0, 2)).reshape(T * B, D)

    flat = [x2d]
    for layer_p in params["lstm"]:
        for direction in ("fwd", "bwd"):
            flat.extend(layer_p[direction])       # w_ih_t, w_hh_t, bias
    fc = params["fc"]
    flat.extend([fc["w1"], fc["b1"], fc["g1"], fc["be1"],
                 fc["w2"], fc["b2"], fc["g2"], fc["be2"],
                 jnp.transpose(fc["w3"]), fc["b3"]])

    num_layers = len(params["lstm"])
    in_specs = [pl.BlockSpec(a.shape, lambda i, n=a.ndim: (0,) * n) for a in flat]

    # TODO(synk): on v7x the two directions could additionally be split across the 2 TensorCores
    # (size-2 "parallel" grid axis); skipped here to keep the fully-fused single-call structure.
    return pl.pallas_call(
        functools.partial(_fused_kernel, hidden=hidden, num_layers=num_layers,
                          seq_len=T, batch=B),
        out_shape=jax.ShapeDtypeStruct((B, 1), jnp.float32),
        grid_spec=pltpu.PrefetchScalarGridSpec(
            num_scalar_prefetch=0,
            grid=(1,),
            in_specs=in_specs,
            out_specs=pl.BlockSpec((B, 1), lambda i: (0, 0)),
        ),
        compiler_params=pltpu.CompilerParams(dimension_semantics=("arbitrary",)),
    )(*flat)


# ----------------------------------------------------------------------------
# Parameters (deterministic, PyTorch-style uniform init)
# ----------------------------------------------------------------------------
def _uniform(key, shape, scale):
    return jax.random.uniform(key, shape, jnp.float32, -scale, scale)


def init_params(key, input_size, hidden, num_layers):
    params = {"lstm": [], "fc": {}}
    k_lstm = 1.0 / float(hidden) ** 0.5
    for layer in range(num_layers):
        d_in = input_size if layer == 0 else 2 * hidden
        layer_p = {}
        for direction in ("fwd", "bwd"):
            key, k1, k2, k3, k4 = jax.random.split(key, 5)
            w_ih = _uniform(k1, (4 * hidden, d_in), k_lstm)     # PyTorch layout (4H, D_in)
            w_hh = _uniform(k2, (4 * hidden, hidden), k_lstm)   # (4H, H)
            b_ih = _uniform(k3, (4 * hidden,), k_lstm)
            b_hh = _uniform(k4, (4 * hidden,), k_lstm)
            layer_p[direction] = (w_ih.T, w_hh.T, (b_ih + b_hh)[None, :])
        params["lstm"].append(layer_p)

    H2 = 2 * hidden
    key, k1, k2, k3, k4, k5, k6 = jax.random.split(key, 7)
    s1, s2, s3 = 1.0 / H2 ** 0.5, 1.0 / H2 ** 0.5, 1.0 / float(hidden) ** 0.5
    params["fc"] = {
        "w1": _uniform(k1, (H2, H2), s1), "b1": _uniform(k2, (1, H2), s1),
        "g1": jnp.ones((1, H2), jnp.float32), "be1": jnp.zeros((1, H2), jnp.float32),
        "w2": _uniform(k3, (H2, hidden), s2), "b2": _uniform(k4, (1, hidden), s2),
        "g2": jnp.ones((1, hidden), jnp.float32), "be2": jnp.zeros((1, hidden), jnp.float32),
        "w3": _uniform(k5, (hidden, 1), s3), "b3": _uniform(k6, (1, 1), s3),
    }
    return params


# ----------------------------------------------------------------------------
# Pure-JAX reference for validation
# ----------------------------------------------------------------------------
def _ref_lstm_dir(xs, w_ih_t, w_hh_t, bias, hidden, reverse):
    T, B, _ = xs.shape
    seq = xs[::-1] if reverse else xs

    def step(carry, x_t):
        h, c = carry
        gates = x_t @ w_ih_t + h @ w_hh_t + bias
        i = jax.nn.sigmoid(gates[:, :hidden])
        f = jax.nn.sigmoid(gates[:, hidden:2 * hidden])
        g = jnp.tanh(gates[:, 2 * hidden:3 * hidden])
        o = jax.nn.sigmoid(gates[:, 3 * hidden:])
        c = f * c + i * g
        h = o * jnp.tanh(c)
        return (h, c), h

    init = (jnp.zeros((B, hidden), jnp.float32), jnp.zeros((B, hidden), jnp.float32))
    _, hs = jax.lax.scan(step, init, seq)
    return hs[::-1] if reverse else hs


def reference_forward(x, params, hidden):
    if x.ndim == 2:
        x = x[:, None, :]
    inp = jnp.transpose(x, (1, 0, 2))
    for layer_p in params["lstm"]:
        fwd = _ref_lstm_dir(inp, *layer_p["fwd"], hidden, reverse=False)
        bwd = _ref_lstm_dir(inp, *layer_p["bwd"], hidden, reverse=True)
        inp = jnp.concatenate([fwd, bwd], axis=-1)
    h = inp[-1]
    fc = params["fc"]

    def ln(y, g, b):
        mu = jnp.mean(y, -1, keepdims=True)
        var = jnp.mean((y - mu) ** 2, -1, keepdims=True)
        return (y - mu) * jax.lax.rsqrt(var + 1e-5) * g + b

    silu = lambda y: y * jax.nn.sigmoid(y)
    h = silu(ln(h @ fc["w1"] + fc["b1"], fc["g1"], fc["be1"]))
    h = silu(ln(h @ fc["w2"] + fc["b2"], fc["g2"], fc["be2"]))
    return h @ fc["w3"] + fc["b3"]


if __name__ == "__main__":
    B, T, INPUT, HIDDEN, LAYERS = 2, 8, 4, 32, 2
    key = jax.random.PRNGKey(0)
    kx, kp = jax.random.split(key)
    x = jax.random.normal(kx, (B, T, INPUT), jnp.float32)
    params = init_params(kp, INPUT, HIDDEN, LAYERS)

    out = finetuned_lstm_forward(x, params, HIDDEN)
    out = jax.block_until_ready(out)
    assert out.shape == (B, 1), out.shape

    ref = jax.block_until_ready(reference_forward(x, params, HIDDEN))
    assert jnp.all(jnp.isfinite(out))
    assert jnp.allclose(out, ref, atol=1e-2, rtol=1e-2), (out, ref)

    print("KERNEL_OK")
</pallas_src>

<mosaic_0001>
module attributes {stable_mosaic.version = 11 : i64} {
  func.func @_fused_kernel(%arg0: i32, %arg1: memref<16x4xf32, #tpu.memory_space<vmem>>, %arg2: memref<4x128xf32, #tpu.memory_space<vmem>>, %arg3: memref<32x128xf32, #tpu.memory_space<vmem>>, %arg4: memref<1x128xf32, #tpu.memory_space<vmem>>, %arg5: memref<4x128xf32, #tpu.memory_space<vmem>>, %arg6: memref<32x128xf32, #tpu.memory_space<vmem>>, %arg7: memref<1x128xf32, #tpu.memory_space<vmem>>, %arg8: memref<64x128xf32, #tpu.memory_space<vmem>>, %arg9: memref<32x128xf32, #tpu.memory_space<vmem>>, %arg10: memref<1x128xf32, #tpu.memory_space<vmem>>, %arg11: memref<64x128xf32, #tpu.memory_space<vmem>>, %arg12: memref<32x128xf32, #tpu.memory_space<vmem>>, %arg13: memref<1x128xf32, #tpu.memory_space<vmem>>, %arg14: memref<64x64xf32, #tpu.memory_space<vmem>>, %arg15: memref<1x64xf32, #tpu.memory_space<vmem>>, %arg16: memref<1x64xf32, #tpu.memory_space<vmem>>, %arg17: memref<1x64xf32, #tpu.memory_space<vmem>>, %arg18: memref<64x32xf32, #tpu.memory_space<vmem>>, %arg19: memref<1x32xf32, #tpu.memory_space<vmem>>, %arg20: memref<1x32xf32, #tpu.memory_space<vmem>>, %arg21: memref<1x32xf32, #tpu.memory_space<vmem>>, %arg22: memref<1x32xf32, #tpu.memory_space<vmem>>, %arg23: memref<1x1xf32, #tpu.memory_space<vmem>>, %arg24: memref<2x1xf32, #tpu.memory_space<vmem>>) attributes {dimension_semantics = [#tpu.dimension_semantics<arbitrary>], iteration_bounds = array<i64: 1>, scalar_prefetch = 0 : i64, scratch_operands = 0 : i64, tpu.core_type = #tpu.core_type<tc>, window_params = [{pipeline_mode = #tpu.pipeline_mode<synchronous>, transform_indices = @transform_0, window_bounds = array<i64: 16, 4>}, {pipeline_mode = #tpu.pipeline_mode<synchronous>, transform_indices = @transform_1, window_bounds = array<i64: 4, 128>}, {pipeline_mode = #tpu.pipeline_mode<synchronous>, transform_indices = @transform_2, window_bounds = array<i64: 32, 128>}, {pipeline_mode = #tpu.pipeline_mode<synchronous>, transform_indices = @transform_3, window_bounds = array<i64: 1, 128>}, {pipeline_mode = #tpu.pipeline_mode<synchronous>, transform_indices = @transform_4, window_bounds = array<i64: 4, 128>}, {pipeline_mode = #tpu.pipeline_mode<synchronous>, transform_indices = @transform_5, window_bounds = array<i64: 32, 128>}, {pipeline_mode = #tpu.pipeline_mode<synchronous>, transform_indices = @transform_6, window_bounds = array<i64: 1, 128>}, {pipeline_mode = #tpu.pipeline_mode<synchronous>, transform_indices = @transform_7, window_bounds = array<i64: 64, 128>}, {pipeline_mode = #tpu.pipeline_mode<synchronous>, transform_indices = @transform_8, window_bounds = array<i64: 32, 128>}, {pipeline_mode = #tpu.pipeline_mode<synchronous>, transform_indices = @transform_9, window_bounds = array<i64: 1, 128>}, {pipeline_mode = #tpu.pipeline_mode<synchronous>, transform_indices = @transform_10, window_bounds = array<i64: 64, 128>}, {pipeline_mode = #tpu.pipeline_mode<synchronous>, transform_indices = @transform_11, window_bounds = array<i64: 32, 128>}, {pipeline_mode = #tpu.pipeline_mode<synchronous>, transform_indices = @transform_12, window_bounds = array<i64: 1, 128>}, {pipeline_mode = #tpu.pipeline_mode<synchronous>, transform_indices = @transform_13, window_bounds = array<i64: 64, 64>}, {pipeline_mode = #tpu.pipeline_mode<synchronous>, transform_indices = @transform_14, window_bounds = array<i64: 1, 64>}, {pipeline_mode = #tpu.pipeline_mode<synchronous>, transform_indices = @transform_15, window_bounds = array<i64: 1, 64>}, {pipeline_mode = #tpu.pipeline_mode<synchronous>, transform_indices = @transform_16, window_bounds = array<i64: 1, 64>}, {pipeline_mode = #tpu.pipeline_mode<synchronous>, transform_indices = @transform_17, window_bounds = array<i64: 64, 32>}, {pipeline_mode = #tpu.pipeline_mode<synchronous>, transform_indices = @transform_18, window_bounds = array<i64: 1, 32>}, {pipeline_mode = #tpu.pipeline_mode<synchronous>, transform_indices = @transform_19, window_bounds = array<i64: 1, 32>}, {pipeline_mode = #tpu.pipeline_mode<synchronous>, transform_indices = @transform_20, window_bounds = array<i64: 1, 32>}, {pipeline_mode = #tpu.pipeline_mode<synchronous>, transform_indices = @transform_21, window_bounds = array<i64: 1, 32>}, {pipeline_mode = #tpu.pipeline_mode<synchronous>, transform_indices = @transform_22, window_bounds = array<i64: 1, 1>}, {pipeline_mode = #tpu.pipeline_mode<synchronous>, transform_indices = @transform_23, window_bounds = array<i64: 2, 1>}]} {
    %c0 = arith.constant 0 : index
    %c0_0 = arith.constant 0 : index
    %0 = vector.load %arg1[%c0, %c0_0] : memref<16x4xf32, #tpu.memory_space<vmem>>, vector<16x4xf32>
    %c0_1 = arith.constant 0 : index
    %c0_2 = arith.constant 0 : index
    %1 = vector.load %arg2[%c0_1, %c0_2] : memref<4x128xf32, #tpu.memory_space<vmem>>, vector<4x128xf32>
    %cst = arith.constant dense<0.000000e+00> : vector<16x128xf32>
    %2 = tpu.matmul %0, %1, %cst {dimension_numbers = #tpu.dot_dimension_numbers<[1], [0], [0], [1], [0, 0, 1, 1], [], []>} : vector<16x4xf32>, vector<4x128xf32>, vector<16x128xf32> -> vector<16x128xf32>
    %c0_3 = arith.constant 0 : index
    %c0_4 = arith.constant 0 : index
    %3 = vector.load %arg4[%c0_3, %c0_4] : memref<1x128xf32, #tpu.memory_space<vmem>>, vector<1x128xf32>
    %4 = vector.broadcast %3 : vector<1x128xf32> to vector<16x128xf32>
    %5 = arith.addf %2, %4 : vector<16x128xf32>
    %c0_5 = arith.constant 0 : index
    %c0_6 = arith.constant 0 : index
    %6 = vector.load %arg3[%c0_5, %c0_6] : memref<32x128xf32, #tpu.memory_space<vmem>>, vector<32x128xf32>
    %cst_7 = arith.constant 0.000000e+00 : f32
    %7 = vector.broadcast %cst_7 : f32 to vector<2x32xf32>
    %cst_8 = arith.constant 0.000000e+00 : f32
    %8 = vector.broadcast %cst_8 : f32 to vector<2x32xf32>
    %9 = vector.extract_strided_slice %5 {offsets = [0, 0], sizes = [2, 128], strides = [1, 1]} : vector<16x128xf32> to vector<2x128xf32>
    %cst_9 = arith.constant dense<0.000000e+00> : vector<2x128xf32>
    %10 = tpu.matmul %7, %6, %cst_9 {dimension_numbers = #tpu.dot_dimension_numbers<[1], [0], [0], [1], [0, 0, 1, 1], [], []>} : vector<2x32xf32>, vector<32x128xf32>, vector<2x128xf32> -> vector<2x128xf32>
    %11 = arith.addf %9, %10 : vector<2x128xf32>
    %12 = arith.negf %11 : vector<2x128xf32>
    %13 = math.exp %12 : vector<2x128xf32>
    %cst_10 = arith.constant 1.000000e+00 : f32
    %14 = vector.broadcast %cst_10 : f32 to vector<2x128xf32>
    %15 = arith.addf %14, %13 : vector<2x128xf32>
    %16 = arith.divf %14, %15 : vector<2x128xf32>
    %17 = vector.extract_strided_slice %16 {offsets = [0, 0], sizes = [2, 32], strides = [1, 1]} : vector<2x128xf32> to vector<2x32xf32>
    %18 = vector.extract_strided_slice %16 {offsets = [0, 32], sizes = [2, 32], strides = [1, 1]} : vector<2x128xf32> to vector<2x32xf32>
    %19 = vector.extract_strided_slice %16 {offsets = [0, 96], sizes = [2, 32], strides = [1, 1]} : vector<2x128xf32> to vector<2x32xf32>
    %20 = vector.extract_strided_slice %11 {offsets = [0, 64], sizes = [2, 32], strides = [1, 1]} : vector<2x128xf32> to vector<2x32xf32>
    %21 = math.tanh %20 : vector<2x32xf32>
    %22 = arith.mulf %18, %8 : vector<2x32xf32>
    %23 = arith.mulf %17, %21 : vector<2x32xf32>
    %24 = arith.addf %22, %23 : vector<2x32xf32>
    %25 = math.tanh %24 : vector<2x32xf32>
    %26 = arith.mulf %19, %25 : vector<2x32xf32>
    %27 = vector.extract_strided_slice %5 {offsets = [2, 0], sizes = [2, 128], strides = [1, 1]} : vector<16x128xf32> to vector<2x128xf32>
    %cst_11 = arith.constant dense<0.000000e+00> : vector<2x128xf32>
    %28 = tpu.matmul %26, %6, %cst_11 {dimension_numbers = #tpu.dot_dimension_numbers<[1], [0], [0], [1], [0, 0, 1, 1], [], []>} : vector<2x32xf32>, vector<32x128xf32>, vector<2x128xf32> -> vector<2x128xf32>
    %29 = arith.addf %27, %28 : vector<2x128xf32>
    %30 = arith.negf %29 : vector<2x128xf32>
    %31 = math.exp %30 : vector<2x128xf32>
    %cst_12 = arith.constant 1.000000e+00 : f32
    %32 = vector.broadcast %cst_12 : f32 to vector<2x128xf32>
    %33 = arith.addf %32, %31 : vector<2x128xf32>
    %34 = arith.divf %32, %33 : vector<2x128xf32>
    %35 = vector.extract_strided_slice %34 {offsets = [0, 0], sizes = [2, 32], strides = [1, 1]} : vector<2x128xf32> to vector<2x32xf32>
    %36 = vector.extract_strided_slice %34 {offsets = [0, 32], sizes = [2, 32], strides = [1, 1]} : vector<2x128xf32> to vector<2x32xf32>
    %37 = vector.extract_strided_slice %34 {offsets = [0, 96], sizes = [2, 32], strides = [1, 1]} : vector<2x128xf32> to vector<2x32xf32>
    %38 = vector.extract_strided_slice %29 {offsets = [0, 64], sizes = [2, 32], strides = [1, 1]} : vector<2x128xf32> to vector<2x32xf32>
    %39 = math.tanh %38 : vector<2x32xf32>
    %40 = arith.mulf %36, %24 : vector<2x32xf32>
    %41 = arith.mulf %35, %39 : vector<2x32xf32>
    %42 = arith.addf %40, %41 : vector<2x32xf32>
    %43 = math.tanh %42 : vector<2x32xf32>
    %44 = arith.mulf %37, %43 : vector<2x32xf32>
    %45 = vector.extract_strided_slice %5 {offsets = [4, 0], sizes = [2, 128], strides = [1, 1]} : vector<16x128xf32> to vector<2x128xf32>
    %cst_13 = arith.constant dense<0.000000e+00> : vector<2x128xf32>
    %46 = tpu.matmul %44, %6, %cst_13 {dimension_numbers = #tpu.dot_dimension_numbers<[1], [0], [0], [1], [0, 0, 1, 1], [], []>} : vector<2x32xf32>, vector<32x128xf32>, vector<2x128xf32> -> vector<2x128xf32>
    %47 = arith.addf %45, %46 : vector<2x128xf32>
    %48 = arith.negf %47 : vector<2x128xf32>
    %49 = math.exp %48 : vector<2x128xf32>
    %cst_14 = arith.constant 1.000000e+00 : f32
    %50 = vector.broadcast %cst_14 : f32 to vector<2x128xf32>
    %51 = arith.addf %50, %49 : vector<2x128xf32>
    %52 = arith.divf %50, %51 : vector<2x128xf32>
    %53 = vector.extract_strided_slice %52 {offsets = [0, 0], sizes = [2, 32], strides = [1, 1]} : vector<2x128xf32> to vector<2x32xf32>
    %54 = vector.extract_strided_slice %52 {offsets = [0, 32], sizes = [2, 32], strides = [1, 1]} : vector<2x128xf32> to vector<2x32xf32>
    %55 = vector.extract_strided_slice %52 {offsets = [0, 96], sizes = [2, 32], strides = [1, 1]} : vector<2x128xf32> to vector<2x32xf32>
    %56 = vector.extract_strided_slice %47 {offsets = [0, 64], sizes = [2, 32], strides = [1, 1]} : vector<2x128xf32> to vector<2x32xf32>
    %57 = math.tanh %56 : vector<2x32xf32>
    %58 = arith.mulf %54, %42 : vector<2x32xf32>
    %59 = arith.mulf %53, %57 : vector<2x32xf32>
    %60 = arith.addf %58, %59 : vector<2x32xf32>
    %61 = math.tanh %60 : vector<2x32xf32>
    %62 = arith.mulf %55, %61 : vector<2x32xf32>
    %63 = vector.extract_strided_slice %5 {offsets = [6, 0], sizes = [2, 128], strides = [1, 1]} : vector<16x128xf32> to vector<2x128xf32>
    %cst_15 = arith.constant dense<0.000000e+00> : vector<2x128xf32>
    %64 = tpu.matmul %62, %6, %cst_15 {dimension_numbers = #tpu.dot_dimension_numbers<[1], [0], [0], [1], [0, 0, 1, 1], [], []>} : vector<2x32xf32>, vector<32x128xf32>, vector<2x128xf32> -> vector<2x128xf32>
    %65 = arith.addf %63, %64 : vector<2x128xf32>
    %66 = arith.negf %65 : vector<2x128xf32>
    %67 = math.exp %66 : vector<2x128xf32>
    %cst_16 = arith.constant 1.000000e+00 : f32
    %68 = vector.broadcast %cst_16 : f32 to vector<2x128xf32>
    %69 = arith.addf %68, %67 : vector<2x128xf32>
    %70 = arith.divf %68, %69 : vector<2x128xf32>
    %71 = vector.extract_strided_slice %70 {offsets = [0, 0], sizes = [2, 32], strides = [1, 1]} : vector<2x128xf32> to vector<2x32xf32>
    %72 = vector.extract_strided_slice %70 {offsets = [0, 32], sizes = [2, 32], strides = [1, 1]} : vector<2x128xf32> to vector<2x32xf32>
    %73 = vector.extract_strided_slice %70 {offsets = [0, 96], sizes = [2, 32], strides = [1, 1]} : vector<2x128xf32> to vector<2x32xf32>
    %74 = vector.extract_strided_slice %65 {offsets = [0, 64], sizes = [2, 32], strides = [1, 1]} : vector<2x128xf32> to vector<2x32xf32>
    %75 = math.tanh %74 : vector<2x32xf32>
    %76 = arith.mulf %72, %60 : vector<2x32xf32>
    %77 = arith.mulf %71, %75 : vector<2x32xf32>
    %78 = arith.addf %76, %77 : vector<2x32xf32>
    %79 = math.tanh %78 : vector<2x32xf32>
    %80 = arith.mulf %73, %79 : vector<2x32xf32>
    %81 = vector.extract_strided_slice %5 {offsets = [8, 0], sizes = [2, 128], strides = [1, 1]} : vector<16x128xf32> to vector<2x128xf32>
    %cst_17 = arith.constant dense<0.000000e+00> : vector<2x128xf32>
    %82 = tpu.matmul %80, %6, %cst_17 {dimension_numbers = #tpu.dot_dimension_numbers<[1], [0], [0], [1], [0, 0, 1, 1], [], []>} : vector<2x32xf32>, vector<32x128xf32>, vector<2x128xf32> -> vector<2x128xf32>
    %83 = arith.addf %81, %82 : vector<2x128xf32>
    %84 = arith.negf %83 : vector<2x128xf32>
    %85 = math.exp %84 : vector<2x128xf32>
    %cst_18 = arith.constant 1.000000e+00 : f32
    %86 = vector.broadcast %cst_18 : f32 to vector<2x128xf32>
    %87 = arith.addf %86, %85 : vector<2x128xf32>
    %88 = arith.divf %86, %87 : vector<2x128xf32>
    %89 = vector.extract_strided_slice %88 {offsets = [0, 0], sizes = [2, 32], strides = [1, 1]} : vector<2x128xf32> to vector<2x32xf32>
    %90 = vector.extract_strided_slice %88 {offsets = [0, 32], sizes = [2, 32], strides = [1, 1]} : vector<2x128xf32> to vector<2x32xf32>
    %91 = vector.extract_strided_slice %88 {offsets = [0, 96], sizes = [2, 32], strides = [1, 1]} : vector<2x128xf32> to vector<2x32xf32>
    %92 = vector.extract_strided_slice %83 {offsets = [0, 64], sizes = [2, 32], strides = [1, 1]} : vector<2x128xf32> to vector<2x32xf32>
    %93 = math.tanh %92 : vector<2x32xf32>
    %94 = arith.mulf %90, %78 : vector<2x32xf32>
    %95 = arith.mulf %89, %93 : vector<2x32xf32>
    %96 = arith.addf %94, %95 : vector<2x32xf32>
    %97 = math.tanh %96 : vector<2x32xf32>
    %98 = arith.mulf %91, %97 : vector<2x32xf32>
    %99 = vector.extract_strided_slice %5 {offsets = [10, 0], sizes = [2, 128], strides = [1, 1]} : vector<16x128xf32> to vector<2x128xf32>
    %cst_19 = arith.constant dense<0.000000e+00> : vector<2x128xf32>
    %100 = tpu.matmul %98, %6, %cst_19 {dimension_numbers = #tpu.dot_dimension_numbers<[1], [0], [0], [1], [0, 0, 1, 1], [], []>} : vector<2x32xf32>, vector<32x128xf32>, vector<2x128xf32> -> vector<2x128xf32>
    %101 = arith.addf %99, %100 : vector<2x128xf32>
    %102 = arith.negf %101 : vector<2x128xf32>
    %103 = math.exp %102 : vector<2x128xf32>
    %cst_20 = arith.constant 1.000000e+00 : f32
    %104 = vector.broadcast %cst_20 : f32 to vector<2x128xf32>
    %105 = arith.addf %104, %103 : vector<2x128xf32>
    %106 = arith.divf %104, %105 : vector<2x128xf32>
    %107 = vector.extract_strided_slice %106 {offsets = [0, 0], sizes = [2, 32], strides = [1, 1]} : vector<2x128xf32> to vector<2x32xf32>
    %108 = vector.extract_strided_slice %106 {offsets = [0, 32], sizes = [2, 32], strides = [1, 1]} : vector<2x128xf32> to vector<2x32xf32>
    %109 = vector.extract_strided_slice %106 {offsets = [0, 96], sizes = [2, 32], strides = [1, 1]} : vector<2x128xf32> to vector<2x32xf32>
    %110 = vector.extract_strided_slice %101 {offsets = [0, 64], sizes = [2, 32], strides = [1, 1]} : vector<2x128xf32> to vector<2x32xf32>
    %111 = math.tanh %110 : vector<2x32xf32>
    %112 = arith.mulf %108, %96 : vector<2x32xf32>
    %113 = arith.mulf %107, %111 : vector<2x32xf32>
    %114 = arith.addf %112, %113 : vector<2x32xf32>
    %115 = math.tanh %114 : vector<2x32xf32>
    %116 = arith.mulf %109, %115 : vector<2x32xf32>
    %117 = vector.extract_strided_slice %5 {offsets = [12, 0], sizes = [2, 128], strides = [1, 1]} : vector<16x128xf32> to vector<2x128xf32>
    %cst_21 = arith.constant dense<0.000000e+00> : vector<2x128xf32>
    %118 = tpu.matmul %116, %6, %cst_21 {dimension_numbers = #tpu.dot_dimension_numbers<[1], [0], [0], [1], [0, 0, 1, 1], [], []>} : vector<2x32xf32>, vector<32x128xf32>, vector<2x128xf32> -> vector<2x128xf32>
    %119 = arith.addf %117, %118 : vector<2x128xf32>
    %120 = arith.negf %119 : vector<2x128xf32>
    %121 = math.exp %120 : vector<2x128xf32>
    %cst_22 = arith.constant 1.000000e+00 : f32
    %122 = vector.broadcast %cst_22 : f32 to vector<2x128xf32>
    %123 = arith.addf %122, %121 : vector<2x128xf32>
    %124 = arith.divf %122, %123 : vector<2x128xf32>
    %125 = vector.extract_strided_slice %124 {offsets = [0, 0], sizes = [2, 32], strides = [1, 1]} : vector<2x128xf32> to vector<2x32xf32>
    %126 = vector.extract_strided_slice %124 {offsets = [0, 32], sizes = [2, 32], strides = [1, 1]} : vector<2x128xf32> to vector<2x32xf32>
    %127 = vector.extract_strided_slice %124 {offsets = [0, 96], sizes = [2, 32], strides = [1, 1]} : vector<2x128xf32> to vector<2x32xf32>
    %128 = vector.extract_strided_slice %119 {offsets = [0, 64], sizes = [2, 32], strides = [1, 1]} : vector<2x128xf32> to vector<2x32xf32>
    %129 = math.tanh %128 : vector<2x32xf32>
    %130 = arith.mulf %126, %114 : vector<2x32xf32>
    %131 = arith.mulf %125, %129 : vector<2x32xf32>
    %132 = arith.addf %130, %131 : vector<2x32xf32>
    %133 = math.tanh %132 : vector<2x32xf32>
    %134 = arith.mulf %127, %133 : vector<2x32xf32>
    %135 = vector.extract_strided_slice %5 {offsets = [14, 0], sizes = [2, 128], strides = [1, 1]} : vector<16x128xf32> to vector<2x128xf32>
    %cst_23 = arith.constant dense<0.000000e+00> : vector<2x128xf32>
    %136 = tpu.matmul %134, %6, %cst_23 {dimension_numbers = #tpu.dot_dimension_numbers<[1], [0], [0], [1], [0, 0, 1, 1], [], []>} : vector<2x32xf32>, vector<32x128xf32>, vector<2x128xf32> -> vector<2x128xf32>
    %137 = arith.addf %135, %136 : vector<2x128xf32>
    %138 = arith.negf %137 : vector<2x128xf32>
    %139 = math.exp %138 : vector<2x128xf32>
    %cst_24 = arith.constant 1.000000e+00 : f32
    %140 = vector.broadcast %cst_24 : f32 to vector<2x128xf32>
    %141 = arith.addf %140, %139 : vector<2x128xf32>
    %142 = arith.divf %140, %141 : vector<2x128xf32>
    %143 = vector.extract_strided_slice %142 {offsets = [0, 0], sizes = [2, 32], strides = [1, 1]} : vector<2x128xf32> to vector<2x32xf32>
    %144 = vector.extract_strided_slice %142 {offsets = [0, 32], sizes = [2, 32], strides = [1, 1]} : vector<2x128xf32> to vector<2x32xf32>
    %145 = vector.extract_strided_slice %142 {offsets = [0, 96], sizes = [2, 32], strides = [1, 1]} : vector<2x128xf32> to vector<2x32xf32>
    %146 = vector.extract_strided_slice %137 {offsets = [0, 64], sizes = [2, 32], strides = [1, 1]} : vector<2x128xf32> to vector<2x32xf32>
    %147 = math.tanh %146 : vector<2x32xf32>
    %148 = arith.mulf %144, %132 : vector<2x32xf32>
    %149 = arith.mulf %143, %147 : vector<2x32xf32>
    %150 = arith.addf %148, %149 : vector<2x32xf32>
    %151 = math.tanh %150 : vector<2x32xf32>
    %152 = arith.mulf %145, %151 : vector<2x32xf32>
    %c0_25 = arith.constant 0 : index
    %c0_26 = arith.constant 0 : index
    %153 = vector.load %arg5[%c0_25, %c0_26] : memref<4x128xf32, #tpu.memory_space<vmem>>, vector<4x128xf32>
    %cst_27 = arith.constant dense<0.000000e+00> : vector<16x128xf32>
    %154 = tpu.matmul %0, %153, %cst_27 {dimension_numbers = #tpu.dot_dimension_numbers<[1], [0], [0], [1], [0, 0, 1, 1], [], []>} : vector<16x4xf32>, vector<4x128xf32>, vector<16x128xf32> -> vector<16x128xf32>
    %c0_28 = arith.constant 0 : index
    %c0_29 = arith.constant 0 : index
    %155 = vector.load %arg7[%c0_28, %c0_29] : memref<1x128xf32, #tpu.memory_space<vmem>>, vector<1x128xf32>
    %156 = vector.broadcast %155 : vector<1x128xf32> to vector<16x128xf32>
    %157 = arith.addf %154, %156 : vector<16x128xf32>
    %c0_30 = arith.constant 0 : index
    %c0_31 = arith.constant 0 : index
    %158 = vector.load %arg6[%c0_30, %c0_31] : memref<32x128xf32, #tpu.memory_space<vmem>>, vector<32x128xf32>
    %cst_32 = arith.constant 0.000000e+00 : f32
    %159 = vector.broadcast %cst_32 : f32 to vector<2x32xf32>
    %cst_33 = arith.constant 0.000000e+00 : f32
    %160 = vector.broadcast %cst_33 : f32 to vector<2x32xf32>
    %161 = vector.extract_strided_slice %157 {offsets = [14, 0], sizes = [2, 128], strides = [1, 1]} : vector<16x128xf32> to vector<2x128xf32>
    %cst_34 = arith.constant dense<0.000000e+00> : vector<2x128xf32>
    %162 = tpu.matmul %159, %158, %cst_34 {dimension_numbers = #tpu.dot_dimension_numbers<[1], [0], [0], [1], [0, 0, 1, 1], [], []>} : vector<2x32xf32>, vector<32x128xf32>, vector<2x128xf32> -> vector<2x128xf32>
    %163 = arith.addf %161, %162 : vector<2x128xf32>
    %164 = arith.negf %163 : vector<2x128xf32>
    %165 = math.exp %164 : vector<2x128xf32>
    %cst_35 = arith.constant 1.000000e+00 : f32
    %166 = vector.broadcast %cst_35 : f32 to vector<2x128xf32>
    %167 = arith.addf %166, %165 : vector<2x128xf32>
    %168 = arith.divf %166, %167 : vector<2x128xf32>
    %169 = vector.extract_strided_slice %168 {offsets = [0, 0], sizes = [2, 32], strides = [1, 1]} : vector<2x128xf32> to vector<2x32xf32>
    %170 = vector.extract_strided_slice %168 {offsets = [0, 32], sizes = [2, 32], strides = [1, 1]} : vector<2x128xf32> to vector<2x32xf32>
    %171 = vector.extract_strided_slice %168 {offsets = [0, 96], sizes = [2, 32], strides = [1, 1]} : vector<2x128xf32> to vector<2x32xf32>
    %172 = vector.extract_strided_slice %163 {offsets = [0, 64], sizes = [2, 32], strides = [1, 1]} : vector<2x128xf32> to vector<2x32xf32>
    %173 = math.tanh %172 : vector<2x32xf32>
    %174 = arith.mulf %170, %160 : vector<2x32xf32>
    %175 = arith.mulf %169, %173 : vector<2x32xf32>
    %176 = arith.addf %174, %175 : vector<2x32xf32>
    %177 = math.tanh %176 : vector<2x32xf32>
    %178 = arith.mulf %171, %177 : vector<2x32xf32>
    %179 = vector.extract_strided_slice %157 {offsets = [12, 0], sizes = [2, 128], strides = [1, 1]} : vector<16x128xf32> to vector<2x128xf32>
    %cst_36 = arith.constant dense<0.000000e+00> : vector<2x128xf32>
    %180 = tpu.matmul %178, %158, %cst_36 {dimension_numbers = #tpu.dot_dimension_numbers<[1], [0], [0], [1], [0, 0, 1, 1], [], []>} : vector<2x32xf32>, vector<32x128xf32>, vector<2x128xf32> -> vector<2x128xf32>
    %181 = arith.addf %179, %180 : vector<2x128xf32>
    %182 = arith.negf %181 : vector<2x128xf32>
    %183 = math.exp %182 : vector<2x128xf32>
    %cst_37 = arith.constant 1.000000e+00 : f32
    %184 = vector.broadcast %cst_37 : f32 to vector<2x128xf32>
    %185 = arith.addf %184, %183 : vector<2x128xf32>
    %186 = arith.divf %184, %185 : vector<2x128xf32>
    %187 = vector.extract_strided_slice %186 {offsets = [0, 0], sizes = [2, 32], strides = [1, 1]} : vector<2x128xf32> to vector<2x32xf32>
    %188 = vector.extract_strided_slice %186 {offsets = [0, 32], sizes = [2, 32], strides = [1, 1]} : vector<2x128xf32> to vector<2x32xf32>
    %189 = vector.extract_strided_slice %186 {offsets = [0, 96], sizes = [2, 32], strides = [1, 1]} : vector<2x128xf32> to vector<2x32xf32>
    %190 = vector.extract_strided_slice %181 {offsets = [0, 64], sizes = [2, 32], strides = [1, 1]} : vector<2x128xf32> to vector<2x32xf32>
    %191 = math.tanh %190 : vector<2x32xf32>
    %192 = arith.mulf %188, %176 : vector<2x32xf32>
    %193 = arith.mulf %187, %191 : vector<2x32xf32>
    %194 = arith.addf %192, %193 : vector<2x32xf32>
    %195 = math.tanh %194 : vector<2x32xf32>
    %196 = arith.mulf %189, %195 : vector<2x32xf32>
    %197 = vector.extract_strided_slice %157 {offsets = [10, 0], sizes = [2, 128], strides = [1, 1]} : vector<16x128xf32> to vector<2x128xf32>
    %cst_38 = arith.constant dense<0.000000e+00> : vector<2x128xf32>
    %198 = tpu.matmul %196, %158, %cst_38 {dimension_numbers = #tpu.dot_dimension_numbers<[1], [0], [0], [1], [0, 0, 1, 1], [], []>} : vector<2x32xf32>, vector<32x128xf32>, vector<2x128xf32> -> vector<2x128xf32>
    %199 = arith.addf %197, %198 : vector<2x128xf32>
    %200 = arith.negf %199 : vector<2x128xf32>
    %201 = math.exp %200 : vector<2x128xf32>
    %cst_39 = arith.constant 1.000000e+00 : f32
    %202 = vector.broadcast %cst_39 : f32 to vector<2x128xf32>
    %203 = arith.addf %202, %201 : vector<2x128xf32>
    %204 = arith.divf %202, %203 : vector<2x128xf32>
    %205 = vector.extract_strided_slice %204 {offsets = [0, 0], sizes = [2, 32], strides = [1, 1]} : vector<2x128xf32> to vector<2x32xf32>
    %206 = vector.extract_strided_slice %204 {offsets = [0, 32], sizes = [2, 32], strides = [1, 1]} : vector<2x128xf32> to vector<2x32xf32>
    %207 = vector.extract_strided_slice %204 {offsets = [0, 96], sizes = [2, 32], strides = [1, 1]} : vector<2x128xf32> to vector<2x32xf32>
    %208 = vector.extract_strided_slice %199 {offsets = [0, 64], sizes = [2, 32], strides = [1, 1]} : vector<2x128xf32> to vector<2x32xf32>
    %209 = math.tanh %208 : vector<2x32xf32>
    %210 = arith.mulf %206, %194 : vector<2x32xf32>
    %211 = arith.mulf %205, %209 : vector<2x32xf32>
    %212 = arith.addf %210, %211 : vector<2x32xf32>
    %213 = math.tanh %212 : vector<2x32xf32>
    %214 = arith.mulf %207, %213 : vector<2x32xf32>
    %215 = vector.extract_strided_slice %157 {offsets = [8, 0], sizes = [2, 128], strides = [1, 1]} : vector<16x128xf32> to vector<2x128xf32>
    %cst_40 = arith.constant dense<0.000000e+00> : vector<2x128xf32>
    %216 = tpu.matmul %214, %158, %cst_40 {dimension_numbers = #tpu.dot_dimension_numbers<[1], [0], [0], [1], [0, 0, 1, 1], [], []>} : vector<2x32xf32>, vector<32x128xf32>, vector<2x128xf32> -> vector<2x128xf32>
    %217 = arith.addf %215, %216 : vector<2x128xf32>
    %218 = arith.negf %217 : vector<2x128xf32>
    %219 = math.exp %218 : vector<2x128xf32>
    %cst_41 = arith.constant 1.000000e+00 : f32
    %220 = vector.broadcast %cst_41 : f32 to vector<2x128xf32>
    %221 = arith.addf %220, %219 : vector<2x128xf32>
    %222 = arith.divf %220, %221 : vector<2x128xf32>
    %223 = vector.extract_strided_slice %222 {offsets = [0, 0], sizes = [2, 32], strides = [1, 1]} : vector<2x128xf32> to vector<2x32xf32>
    %224 = vector.extract_strided_slice %222 {offsets = [0, 32], sizes = [2, 32], strides = [1, 1]} : vector<2x128xf32> to vector<2x32xf32>
    %225 = vector.extract_strided_slice %222 {offsets = [0, 96], sizes = [2, 32], strides = [1, 1]} : vector<2x128xf32> to vector<2x32xf32>
    %226 = vector.extract_strided_slice %217 {offsets = [0, 64], sizes = [2, 32], strides = [1, 1]} : vector<2x128xf32> to vector<2x32xf32>
    %227 = math.tanh %226 : vector<2x32xf32>
    %228 = arith.mulf %224, %212 : vector<2x32xf32>
    %229 = arith.mulf %223, %227 : vector<2x32xf32>
    %230 = arith.addf %228, %229 : vector<2x32xf32>
    %231 = math.tanh %230 : vector<2x32xf32>
    %232 = arith.mulf %225, %231 : vector<2x32xf32>
    %233 = vector.extract_strided_slice %157 {offsets = [6, 0], sizes = [2, 128], strides = [1, 1]} : vector<16x128xf32> to vector<2x128xf32>
    %cst_42 = arith.constant dense<0.000000e+00> : vector<2x128xf32>
    %234 = tpu.matmul %232, %158, %cst_42 {dimension_numbers = #tpu.dot_dimension_numbers<[1], [0], [0], [1], [0, 0, 1, 1], [], []>} : vector<2x32xf32>, vector<32x128xf32>, vector<2x128xf32> -> vector<2x128xf32>
    %235 = arith.addf %233, %234 : vector<2x128xf32>
    %236 = arith.negf %235 : vector<2x128xf32>
    %237 = math.exp %236 : vector<2x128xf32>
    %cst_43 = arith.constant 1.000000e+00 : f32
    %238 = vector.broadcast %cst_43 : f32 to vector<2x128xf32>
    %239 = arith.addf %238, %237 : vector<2x128xf32>
    %240 = arith.divf %238, %239 : vector<2x128xf32>
    %241 = vector.extract_strided_slice %240 {offsets = [0, 0], sizes = [2, 32], strides = [1, 1]} : vector<2x128xf32> to vector<2x32xf32>
    %242 = vector.extract_strided_slice %240 {offsets = [0, 32], sizes = [2, 32], strides = [1, 1]} : vector<2x128xf32> to vector<2x32xf32>
    %243 = vector.extract_strided_slice %240 {offsets = [0, 96], sizes = [2, 32], strides = [1, 1]} : vector<2x128xf32> to vector<2x32xf32>
    %244 = vector.extract_strided_slice %235 {offsets = [0, 64], sizes = [2, 32], strides = [1, 1]} : vector<2x128xf32> to vector<2x32xf32>
    %245 = math.tanh %244 : vector<2x32xf32>
    %246 = arith.mulf %242, %230 : vector<2x32xf32>
    %247 = arith.mulf %241, %245 : vector<2x32xf32>
    %248 = arith.addf %246, %247 : vector<2x32xf32>
    %249 = math.tanh %248 : vector<2x32xf32>
    %250 = arith.mulf %243, %249 : vector<2x32xf32>
    %251 = vector.extract_strided_slice %157 {offsets = [4, 0], sizes = [2, 128], strides = [1, 1]} : vector<16x128xf32> to vector<2x128xf32>
    %cst_44 = arith.constant dense<0.000000e+00> : vector<2x128xf32>
    %252 = tpu.matmul %250, %158, %cst_44 {dimension_numbers = #tpu.dot_dimension_numbers<[1], [0], [0], [1], [0, 0, 1, 1], [], []>} : vector<2x32xf32>, vector<32x128xf32>, vector<2x128xf32> -> vector<2x128xf32>
    %253 = arith.addf %251, %252 : vector<2x128xf32>
    %254 = arith.negf %253 : vector<2x128xf32>
    %255 = math.exp %254 : vector<2x128xf32>
    %cst_45 = arith.constant 1.000000e+00 : f32
    %256 = vector.broadcast %cst_45 : f32 to vector<2x128xf32>
    %257 = arith.addf %256, %255 : vector<2x128xf32>
    %258 = arith.divf %256, %257 : vector<2x128xf32>
    %259 = vector.extract_strided_slice %258 {offsets = [0, 0], sizes = [2, 32], strides = [1, 1]} : vector<2x128xf32> to vector<2x32xf32>
    %260 = vector.extract_strided_slice %258 {offsets = [0, 32], sizes = [2, 32], strides = [1, 1]} : vector<2x128xf32> to vector<2x32xf32>
    %261 = vector.extract_strided_slice %258 {offsets = [0, 96], sizes = [2, 32], strides = [1, 1]} : vector<2x128xf32> to vector<2x32xf32>
    %262 = vector.extract_strided_slice %253 {offsets = [0, 64], sizes = [2, 32], strides = [1, 1]} : vector<2x128xf32> to vector<2x32xf32>
    %263 = math.tanh %262 : vector<2x32xf32>
    %264 = arith.mulf %260, %248 : vector<2x32xf32>
    %265 = arith.mulf %259, %263 : vector<2x32xf32>
    %266 = arith.addf %264, %265 : vector<2x32xf32>
    %267 = math.tanh %266 : vector<2x32xf32>
    %268 = arith.mulf %261, %267 : vector<2x32xf32>
    %269 = vector.extract_strided_slice %157 {offsets = [2, 0], sizes = [2, 128], strides = [1, 1]} : vector<16x128xf32> to vector<2x128xf32>
    %cst_46 = arith.constant dense<0.000000e+00> : vector<2x128xf32>
    %270 = tpu.matmul %268, %158, %cst_46 {dimension_numbers = #tpu.dot_dimension_numbers<[1], [0], [0], [1], [0, 0, 1, 1], [], []>} : vector<2x32xf32>, vector<32x128xf32>, vector<2x128xf32> -> vector<2x128xf32>
    %271 = arith.addf %269, %270 : vector<2x128xf32>
    %272 = arith.negf %271 : vector<2x128xf32>
    %273 = math.exp %272 : vector<2x128xf32>
    %cst_47 = arith.constant 1.000000e+00 : f32
    %274 = vector.broadcast %cst_47 : f32 to vector<2x128xf32>
    %275 = arith.addf %274, %273 : vector<2x128xf32>
    %276 = arith.divf %274, %275 : vector<2x128xf32>
    %277 = vector.extract_strided_slice %276 {offsets = [0, 0], sizes = [2, 32], strides = [1, 1]} : vector<2x128xf32> to vector<2x32xf32>
    %278 = vector.extract_strided_slice %276 {offsets = [0, 32], sizes = [2, 32], strides = [1, 1]} : vector<2x128xf32> to vector<2x32xf32>
    %279 = vector.extract_strided_slice %276 {offsets = [0, 96], sizes = [2, 32], strides = [1, 1]} : vector<2x128xf32> to vector<2x32xf32>
    %280 = vector.extract_strided_slice %271 {offsets = [0, 64], sizes = [2, 32], strides = [1, 1]} : vector<2x128xf32> to vector<2x32xf32>
    %281 = math.tanh %280 : vector<2x32xf32>
    %282 = arith.mulf %278, %266 : vector<2x32xf32>
    %283 = arith.mulf %277, %281 : vector<2x32xf32>
    %284 = arith.addf %282, %283 : vector<2x32xf32>
    %285 = math.tanh %284 : vector<2x32xf32>
    %286 = arith.mulf %279, %285 : vector<2x32xf32>
    %287 = vector.extract_strided_slice %157 {offsets = [0, 0], sizes = [2, 128], strides = [1, 1]} : vector<16x128xf32> to vector<2x128xf32>
    %cst_48 = arith.constant dense<0.000000e+00> : vector<2x128xf32>
    %288 = tpu.matmul %286, %158, %cst_48 {dimension_numbers = #tpu.dot_dimension_numbers<[1], [0], [0], [1], [0, 0, 1, 1], [], []>} : vector<2x32xf32>, vector<32x128xf32>, vector<2x128xf32> -> vector<2x128xf32>
    %289 = arith.addf %287, %288 : vector<2x128xf32>
    %290 = arith.negf %289 : vector<2x128xf32>
    %291 = math.exp %290 : vector<2x128xf32>
    %cst_49 = arith.constant 1.000000e+00 : f32
    %292 = vector.broadcast %cst_49 : f32 to vector<2x128xf32>
    %293 = arith.addf %292, %291 : vector<2x128xf32>
    %294 = arith.divf %292, %293 : vector<2x128xf32>
    %295 = vector.extract_strided_slice %294 {offsets = [0, 0], sizes = [2, 32], strides = [1, 1]} : vector<2x128xf32> to vector<2x32xf32>
    %296 = vector.extract_strided_slice %294 {offsets = [0, 32], sizes = [2, 32], strides = [1, 1]} : vector<2x128xf32> to vector<2x32xf32>
    %297 = vector.extract_strided_slice %294 {offsets = [0, 96], sizes = [2, 32], strides = [1, 1]} : vector<2x128xf32> to vector<2x32xf32>
    %298 = vector.extract_strided_slice %289 {offsets = [0, 64], sizes = [2, 32], strides = [1, 1]} : vector<2x128xf32> to vector<2x32xf32>
    %299 = math.tanh %298 : vector<2x32xf32>
    %300 = arith.mulf %296, %284 : vector<2x32xf32>
    %301 = arith.mulf %295, %299 : vector<2x32xf32>
    %302 = arith.addf %300, %301 : vector<2x32xf32>
    %303 = math.tanh %302 : vector<2x32xf32>
    %304 = arith.mulf %297, %303 : vector<2x32xf32>
    %305 = tpu.concatenate %26, %304 in 1 : vector<2x32xf32>, vector<2x32xf32> -> vector<2x64xf32>
    %306 = tpu.concatenate %44, %286 in 1 : vector<2x32xf32>, vector<2x32xf32> -> vector<2x64xf32>
    %307 = tpu.concatenate %62, %268 in 1 : vector<2x32xf32>, vector<2x32xf32> -> vector<2x64xf32>
    %308 = tpu.concatenate %80, %250 in 1 : vector<2x32xf32>, vector<2x32xf32> -> vector<2x64xf32>
    %309 = tpu.concatenate %98, %232 in 1 : vector<2x32xf32>, vector<2x32xf32> -> vector<2x64xf32>
    %310 = tpu.concatenate %116, %214 in 1 : vector<2x32xf32>, vector<2x32xf32> -> vector<2x64xf32>
    %311 = tpu.concatenate %134, %196 in 1 : vector<2x32xf32>, vector<2x32xf32> -> vector<2x64xf32>
    %312 = tpu.concatenate %152, %178 in 1 : vector<2x32xf32>, vector<2x32xf32> -> vector<2x64xf32>
    %313 = tpu.concatenate %305, %306, %307, %308, %309, %310, %311, %312 in 0 : vector<2x64xf32>, vector<2x64xf32>, vector<2x64xf32>, vector<2x64xf32>, vector<2x64xf32>, vector<2x64xf32>, vector<2x64xf32>, vector<2x64xf32> -> vector<16x64xf32>
    %c0_50 = arith.constant 0 : index
    %c0_51 = arith.constant 0 : index
    %314 = vector.load %arg8[%c0_50, %c0_51] : memref<64x128xf32, #tpu.memory_space<vmem>>, vector<64x128xf32>
    %cst_52 = arith.constant dense<0.000000e+00> : vector<16x128xf32>
    %315 = tpu.matmul %313, %314, %cst_52 {dimension_numbers = #tpu.dot_dimension_numbers<[1], [0], [0], [1], [0, 0, 1, 1], [], []>} : vector<16x64xf32>, vector<64x128xf32>, vector<16x128xf32> -> vector<16x128xf32>
    %c0_53 = arith.constant 0 : index
    %c0_54 = arith.constant 0 : index
    %316 = vector.load %arg10[%c0_53, %c0_54] : memref<1x128xf32, #tpu.memory_space<vmem>>, vector<1x128xf32>
    %317 = vector.broadcast %316 : vector<1x128xf32> to vector<16x128xf32>
    %318 = arith.addf %315, %317 : vector<16x128xf32>
    %c0_55 = arith.constant 0 : index
    %c0_56 = arith.constant 0 : index
    %319 = vector.load %arg9[%c0_55, %c0_56] : memref<32x128xf32, #tpu.memory_space<vmem>>, vector<32x128xf32>
    %cst_57 = arith.constant 0.000000e+00 : f32
    %320 = vector.broadcast %cst_57 : f32 to vector<2x32xf32>
    %cst_58 = arith.constant 0.000000e+00 : f32
    %321 = vector.broadcast %cst_58 : f32 to vector<2x32xf32>
    %322 = vector.extract_strided_slice %318 {offsets = [0, 0], sizes = [2, 128], strides = [1, 1]} : vector<16x128xf32> to vector<2x128xf32>
    %cst_59 = arith.constant dense<0.000000e+00> : vector<2x128xf32>
    %323 = tpu.matmul %320, %319, %cst_59 {dimension_numbers = #tpu.dot_dimension_numbers<[1], [0], [0], [1], [0, 0, 1, 1], [], []>} : vector<2x32xf32>, vector<32x128xf32>, vector<2x128xf32> -> vector<2x128xf32>
    %324 = arith.addf %322, %323 : vector<2x128xf32>
    %325 = arith.negf %324 : vector<2x128xf32>
    %326 = math.exp %325 : vector<2x128xf32>
    %cst_60 = arith.constant 1.000000e+00 : f32
    %327 = vector.broadcast %cst_60 : f32 to vector<2x128xf32>
    %328 = arith.addf %327, %326 : vector<2x128xf32>
    %329 = arith.divf %327, %328 : vector<2x128xf32>
    %330 = vector.extract_strided_slice %329 {offsets = [0, 0], sizes = [2, 32], strides = [1, 1]} : vector<2x128xf32> to vector<2x32xf32>
    %331 = vector.extract_strided_slice %329 {offsets = [0, 32], sizes = [2, 32], strides = [1, 1]} : vector<2x128xf32> to vector<2x32xf32>
    %332 = vector.extract_strided_slice %329 {offsets = [0, 96], sizes = [2, 32], strides = [1, 1]} : vector<2x128xf32> to vector<2x32xf32>
    %333 = vector.extract_strided_slice %324 {offsets = [0, 64], sizes = [2, 32], strides = [1, 1]} : vector<2x128xf32> to vector<2x32xf32>
    %334 = math.tanh %333 : vector<2x32xf32>
    %335 = arith.mulf %331, %321 : vector<2x32xf32>
    %336 = arith.mulf %330, %334 : vector<2x32xf32>
    %337 = arith.addf %335, %336 : vector<2x32xf32>
    %338 = math.tanh %337 : vector<2x32xf32>
    %339 = arith.mulf %332, %338 : vector<2x32xf32>
    %340 = vector.extract_strided_slice %318 {offsets = [2, 0], sizes = [2, 128], strides = [1, 1]} : vector<16x128xf32> to vector<2x128xf32>
    %cst_61 = arith.constant dense<0.000000e+00> : vector<2x128xf32>
    %341 = tpu.matmul %339, %319, %cst_61 {dimension_numbers = #tpu.dot_dimension_numbers<[1], [0], [0], [1], [0, 0, 1, 1], [], []>} : vector<2x32xf32>, vector<32x128xf32>, vector<2x128xf32> -> vector<2x128xf32>
    %342 = arith.addf %340, %341 : vector<2x128xf32>
    %343 = arith.negf %342 : vector<2x128xf32>
    %344 = math.exp %343 : vector<2x128xf32>
    %cst_62 = arith.constant 1.000000e+00 : f32
    %345 = vector.broadcast %cst_62 : f32 to vector<2x128xf32>
    %346 = arith.addf %345, %344 : vector<2x128xf32>
    %347 = arith.divf %345, %346 : vector<2x128xf32>
    %348 = vector.extract_strided_slice %347 {offsets = [0, 0], sizes = [2, 32], strides = [1, 1]} : vector<2x128xf32> to vector<2x32xf32>
    %349 = vector.extract_strided_slice %347 {offsets = [0, 32], sizes = [2, 32], strides = [1, 1]} : vector<2x128xf32> to vector<2x32xf32>
    %350 = vector.extract_strided_slice %347 {offsets = [0, 96], sizes = [2, 32], strides = [1, 1]} : vector<2x128xf32> to vector<2x32xf32>
    %351 = vector.extract_strided_slice %342 {offsets = [0, 64], sizes = [2, 32], strides = [1, 1]} : vector<2x128xf32> to vector<2x32xf32>
    %352 = math.tanh %351 : vector<2x32xf32>
    %353 = arith.mulf %349, %337 : vector<2x32xf32>
    %354 = arith.mulf %348, %352 : vector<2x32xf32>
    %355 = arith.addf %353, %354 : vector<2x32xf32>
    %356 = math.tanh %355 : vector<2x32xf32>
    %357 = arith.mulf %350, %356 : vector<2x32xf32>
    %358 = vector.extract_strided_slice %318 {offsets = [4, 0], sizes = [2, 128], strides = [1, 1]} : vector<16x128xf32> to vector<2x128xf32>
    %cst_63 = arith.constant dense<0.000000e+00> : vector<2x128xf32>
    %359 = tpu.matmul %357, %319, %cst_63 {dimension_numbers = #tpu.dot_dimension_numbers<[1], [0], [0], [1], [0, 0, 1, 1], [], []>} : vector<2x32xf32>, vector<32x128xf32>, vector<2x128xf32> -> vector<2x128xf32>
    %360 = arith.addf %358, %359 : vector<2x128xf32>
    %361 = arith.negf %360 : vector<2x128xf32>
    %362 = math.exp %361 : vector<2x128xf32>
    %cst_64 = arith.constant 1.000000e+00 : f32
    %363 = vector.broadcast %cst_64 : f32 to vector<2x128xf32>
    %364 = arith.addf %363, %362 : vector<2x128xf32>
    %365 = arith.divf %363, %364 : vector<2x128xf32>
    %366 = vector.extract_strided_slice %365 {offsets = [0, 0], sizes = [2, 32], strides = [1, 1]} : vector<2x128xf32> to vector<2x32xf32>
    %367 = vector.extract_strided_slice %365 {offsets = [0, 32], sizes = [2, 32], strides = [1, 1]} : vector<2x128xf32> to vector<2x32xf32>
    %368 = vector.extract_strided_slice %365 {offsets = [0, 96], sizes = [2, 32], strides = [1, 1]} : vector<2x128xf32> to vector<2x32xf32>
    %369 = vector.extract_strided_slice %360 {offsets = [0, 64], sizes = [2, 32], strides = [1, 1]} : vector<2x128xf32> to vector<2x32xf32>
    %370 = math.tanh %369 : vector<2x32xf32>
    %371 = arith.mulf %367, %355 : vector<2x32xf32>
    %372 = arith.mulf %366, %370 : vector<2x32xf32>
    %373 = arith.addf %371, %372 : vector<2x32xf32>
    %374 = math.tanh %373 : vector<2x32xf32>
    %375 = arith.mulf %368, %374 : vector<2x32xf32>
    %376 = vector.extract_strided_slice %318 {offsets = [6, 0], sizes = [2, 128], strides = [1, 1]} : vector<16x128xf32> to vector<2x128xf32>
    %cst_65 = arith.constant dense<0.000000e+00> : vector<2x128xf32>
    %377 = tpu.matmul %375, %319, %cst_65 {dimension_numbers = #tpu.dot_dimension_numbers<[1], [0], [0], [1], [0, 0, 1, 1], [], []>} : vector<2x32xf32>, vector<32x128xf32>, vector<2x128xf32> -> vector<2x128xf32>
    %378 = arith.addf %376, %377 : vector<2x128xf32>
    %379 = arith.negf %378 : vector<2x128xf32>
    %380 = math.exp %379 : vector<2x128xf32>
    %cst_66 = arith.constant 1.000000e+00 : f32
    %381 = vector.broadcast %cst_66 : f32 to vector<2x128xf32>
    %382 = arith.addf %381, %380 : vector<2x128xf32>
    %383 = arith.divf %381, %382 : vector<2x128xf32>
    %384 = vector.extract_strided_slice %383 {offsets = [0, 0], sizes = [2, 32], strides = [1, 1]} : vector<2x128xf32> to vector<2x32xf32>
    %385 = vector.extract_strided_slice %383 {offsets = [0, 32], sizes = [2, 32], strides = [1, 1]} : vector<2x128xf32> to vector<2x32xf32>
    %386 = vector.extract_strided_slice %383 {offsets = [0, 96], sizes = [2, 32], strides = [1, 1]} : vector<2x128xf32> to vector<2x32xf32>
    %387 = vector.extract_strided_slice %378 {offsets = [0, 64], sizes = [2, 32], strides = [1, 1]} : vector<2x128xf32> to vector<2x32xf32>
    %388 = math.tanh %387 : vector<2x32xf32>
    %389 = arith.mulf %385, %373 : vector<2x32xf32>
    %390 = arith.mulf %384, %388 : vector<2x32xf32>
    %391 = arith.addf %389, %390 : vector<2x32xf32>
    %392 = math.tanh %391 : vector<2x32xf32>
    %393 = arith.mulf %386, %392 : vector<2x32xf32>
    %394 = vector.extract_strided_slice %318 {offsets = [8, 0], sizes = [2, 128], strides = [1, 1]} : vector<16x128xf32> to vector<2x128xf32>
    %cst_67 = arith.constant dense<0.000000e+00> : vector<2x128xf32>
    %395 = tpu.matmul %393, %319, %cst_67 {dimension_numbers = #tpu.dot_dimension_numbers<[1], [0], [0], [1], [0, 0, 1, 1], [], []>} : vector<2x32xf32>, vector<32x128xf32>, vector<2x128xf32> -> vector<2x128xf32>
    %396 = arith.addf %394, %395 : vector<2x128xf32>
    %397 = arith.negf %396 : vector<2x128xf32>
    %398 = math.exp %397 : vector<2x128xf32>
    %cst_68 = arith.constant 1.000000e+00 : f32
    %399 = vector.broadcast %cst_68 : f32 to vector<2x128xf32>
    %400 = arith.addf %399, %398 : vector<2x128xf32>
    %401 = arith.divf %399, %400 : vector<2x128xf32>
    %402 = vector.extract_strided_slice %401 {offsets = [0, 0], sizes = [2, 32], strides = [1, 1]} : vector<2x128xf32> to vector<2x32xf32>
    %403 = vector.extract_strided_slice %401 {offsets = [0, 32], sizes = [2, 32], strides = [1, 1]} : vector<2x128xf32> to vector<2x32xf32>
    %404 = vector.extract_strided_slice %401 {offsets = [0, 96], sizes = [2, 32], strides = [1, 1]} : vector<2x128xf32> to vector<2x32xf32>
    %405 = vector.extract_strided_slice %396 {offsets = [0, 64], sizes = [2, 32], strides = [1, 1]} : vector<2x128xf32> to vector<2x32xf32>
    %406 = math.tanh %405 : vector<2x32xf32>
    %407 = arith.mulf %403, %391 : vector<2x32xf32>
    %408 = arith.mulf %402, %406 : vector<2x32xf32>
    %409 = arith.addf %407, %408 : vector<2x32xf32>
    %410 = math.tanh %409 : vector<2x32xf32>
    %411 = arith.mulf %404, %410 : vector<2x32xf32>
    %412 = vector.extract_strided_slice %318 {offsets = [10, 0], sizes = [2, 128], strides = [1, 1]} : vector<16x128xf32> to vector<2x128xf32>
    %cst_69 = arith.constant dense<0.000000e+00> : vector<2x128xf32>
    %413 = tpu.matmul %411, %319, %cst_69 {dimension_numbers = #tpu.dot_dimension_numbers<[1], [0], [0], [1], [0, 0, 1, 1], [], []>} : vector<2x32xf32>, vector<32x128xf32>, vector<2x128xf32> -> vector<2x128xf32>
    %414 = arith.addf %412, %413 : vector<2x128xf32>
    %415 = arith.negf %414 : vector<2x128xf32>
    %416 = math.exp %415 : vector<2x128xf32>
    %cst_70 = arith.constant 1.000000e+00 : f32
    %417 = vector.broadcast %cst_70 : f32 to vector<2x128xf32>
    %418 = arith.addf %417, %416 : vector<2x128xf32>
    %419 = arith.divf %417, %418 : vector<2x128xf32>
    %420 = vector.extract_strided_slice %419 {offsets = [0, 0], sizes = [2, 32], strides = [1, 1]} : vector<2x128xf32> to vector<2x32xf32>
    %421 = vector.extract_strided_slice %419 {offsets = [0, 32], sizes = [2, 32], strides = [1, 1]} : vector<2x128xf32> to vector<2x32xf32>
    %422 = vector.extract_strided_slice %419 {offsets = [0, 96], sizes = [2, 32], strides = [1, 1]} : vector<2x128xf32> to vector<2x32xf32>
    %423 = vector.extract_strided_slice %414 {offsets = [0, 64], sizes = [2, 32], strides = [1, 1]} : vector<2x128xf32> to vector<2x32xf32>
    %424 = math.tanh %423 : vector<2x32xf32>
    %425 = arith.mulf %421, %409 : vector<2x32xf32>
    %426 = arith.mulf %420, %424 : vector<2x32xf32>
    %427 = arith.addf %425, %426 : vector<2x32xf32>
    %428 = math.tanh %427 : vector<2x32xf32>
    %429 = arith.mulf %422, %428 : vector<2x32xf32>
    %430 = vector.extract_strided_slice %318 {offsets = [12, 0], sizes = [2, 128], strides = [1, 1]} : vector<16x128xf32> to vector<2x128xf32>
    %cst_71 = arith.constant dense<0.000000e+00> : vector<2x128xf32>
    %431 = tpu.matmul %429, %319, %cst_71 {dimension_numbers = #tpu.dot_dimension_numbers<[1], [0], [0], [1], [0, 0, 1, 1], [], []>} : vector<2x32xf32>, vector<32x128xf32>, vector<2x128xf32> -> vector<2x128xf32>
    %432 = arith.addf %430, %431 : vector<2x128xf32>
    %433 = arith.negf %432 : vector<2x128xf32>
    %434 = math.exp %433 : vector<2x128xf32>
    %cst_72 = arith.constant 1.000000e+00 : f32
    %435 = vector.broadcast %cst_72 : f32 to vector<2x128xf32>
    %436 = arith.addf %435, %434 : vector<2x128xf32>
    %437 = arith.divf %435, %436 : vector<2x128xf32>
    %438 = vector.extract_strided_slice %437 {offsets = [0, 0], sizes = [2, 32], strides = [1, 1]} : vector<2x128xf32> to vector<2x32xf32>
    %439 = vector.extract_strided_slice %437 {offsets = [0, 32], sizes = [2, 32], strides = [1, 1]} : vector<2x128xf32> to vector<2x32xf32>
    %440 = vector.extract_strided_slice %437 {offsets = [0, 96], sizes = [2, 32], strides = [1, 1]} : vector<2x128xf32> to vector<2x32xf32>
    %441 = vector.extract_strided_slice %432 {offsets = [0, 64], sizes = [2, 32], strides = [1, 1]} : vector<2x128xf32> to vector<2x32xf32>
    %442 = math.tanh %441 : vector<2x32xf32>
    %443 = arith.mulf %439, %427 : vector<2x32xf32>
    %444 = arith.mulf %438, %442 : vector<2x32xf32>
    %445 = arith.addf %443, %444 : vector<2x32xf32>
    %446 = math.tanh %445 : vector<2x32xf32>
    %447 = arith.mulf %440, %446 : vector<2x32xf32>
    %448 = vector.extract_strided_slice %318 {offsets = [14, 0], sizes = [2, 128], strides = [1, 1]} : vector<16x128xf32> to vector<2x128xf32>
    %cst_73 = arith.constant dense<0.000000e+00> : vector<2x128xf32>
    %449 = tpu.matmul %447, %319, %cst_73 {dimension_numbers = #tpu.dot_dimension_numbers<[1], [0], [0], [1], [0, 0, 1, 1], [], []>} : vector<2x32xf32>, vector<32x128xf32>, vector<2x128xf32> -> vector<2x128xf32>
    %450 = arith.addf %448, %449 : vector<2x128xf32>
    %451 = arith.negf %450 : vector<2x128xf32>
    %452 = math.exp %451 : vector<2x128xf32>
    %cst_74 = arith.constant 1.000000e+00 : f32
    %453 = vector.broadcast %cst_74 : f32 to vector<2x128xf32>
    %454 = arith.addf %453, %452 : vector<2x128xf32>
    %455 = arith.divf %453, %454 : vector<2x128xf32>
    %456 = vector.extract_strided_slice %455 {offsets = [0, 0], sizes = [2, 32], strides = [1, 1]} : vector<2x128xf32> to vector<2x32xf32>
    %457 = vector.extract_strided_slice %455 {offsets = [0, 32], sizes = [2, 32], strides = [1, 1]} : vector<2x128xf32> to vector<2x32xf32>
    %458 = vector.extract_strided_slice %455 {offsets = [0, 96], sizes = [2, 32], strides = [1, 1]} : vector<2x128xf32> to vector<2x32xf32>
    %459 = vector.extract_strided_slice %450 {offsets = [0, 64], sizes = [2, 32], strides = [1, 1]} : vector<2x128xf32> to vector<2x32xf32>
    %460 = math.tanh %459 : vector<2x32xf32>
    %461 = arith.mulf %457, %445 : vector<2x32xf32>
    %462 = arith.mulf %456, %460 : vector<2x32xf32>
    %463 = arith.addf %461, %462 : vector<2x32xf32>
    %464 = math.tanh %463 : vector<2x32xf32>
    %465 = arith.mulf %458, %464 : vector<2x32xf32>
    %c0_75 = arith.constant 0 : index
    %c0_76 = arith.constant 0 : index
    %466 = vector.load %arg11[%c0_75, %c0_76] : memref<64x128xf32, #tpu.memory_space<vmem>>, vector<64x128xf32>
    %cst_77 = arith.constant dense<0.000000e+00> : vector<16x128xf32>
    %467 = tpu.matmul %313, %466, %cst_77 {dimension_numbers = #tpu.dot_dimension_numbers<[1], [0], [0], [1], [0, 0, 1, 1], [], []>} : vector<16x64xf32>, vector<64x128xf32>, vector<16x128xf32> -> vector<16x128xf32>
    %c0_78 = arith.constant 0 : index
    %c0_79 = arith.constant 0 : index
    %468 = vector.load %arg13[%c0_78, %c0_79] : memref<1x128xf32, #tpu.memory_space<vmem>>, vector<1x128xf32>
    %469 = vector.broadcast %468 : vector<1x128xf32> to vector<16x128xf32>
    %470 = arith.addf %467, %469 : vector<16x128xf32>
    %c0_80 = arith.constant 0 : index
    %c0_81 = arith.constant 0 : index
    %471 = vector.load %arg12[%c0_80, %c0_81] : memref<32x128xf32, #tpu.memory_space<vmem>>, vector<32x128xf32>
    %cst_82 = arith.constant 0.000000e+00 : f32
    %472 = vector.broadcast %cst_82 : f32 to vector<2x32xf32>
    %cst_83 = arith.constant 0.000000e+00 : f32
    %473 = vector.broadcast %cst_83 : f32 to vector<2x32xf32>
    %474 = vector.extract_strided_slice %470 {offsets = [14, 0], sizes = [2, 128], strides = [1, 1]} : vector<16x128xf32> to vector<2x128xf32>
    %cst_84 = arith.constant dense<0.000000e+00> : vector<2x128xf32>
    %475 = tpu.matmul %472, %471, %cst_84 {dimension_numbers = #tpu.dot_dimension_numbers<[1], [0], [0], [1], [0, 0, 1, 1], [], []>} : vector<2x32xf32>, vector<32x128xf32>, vector<2x128xf32> -> vector<2x128xf32>
    %476 = arith.addf %474, %475 : vector<2x128xf32>
    %477 = arith.negf %476 : vector<2x128xf32>
    %478 = math.exp %477 : vector<2x128xf32>
    %cst_85 = arith.constant 1.000000e+00 : f32
    %479 = vector.broadcast %cst_85 : f32 to vector<2x128xf32>
    %480 = arith.addf %479, %478 : vector<2x128xf32>
    %481 = arith.divf %479, %480 : vector<2x128xf32>
    %482 = vector.extract_strided_slice %481 {offsets = [0, 0], sizes = [2, 32], strides = [1, 1]} : vector<2x128xf32> to vector<2x32xf32>
    %483 = vector.extract_strided_slice %481 {offsets = [0, 32], sizes = [2, 32], strides = [1, 1]} : vector<2x128xf32> to vector<2x32xf32>
    %484 = vector.extract_strided_slice %481 {offsets = [0, 96], sizes = [2, 32], strides = [1, 1]} : vector<2x128xf32> to vector<2x32xf32>
    %485 = vector.extract_strided_slice %476 {offsets = [0, 64], sizes = [2, 32], strides = [1, 1]} : vector<2x128xf32> to vector<2x32xf32>
    %486 = math.tanh %485 : vector<2x32xf32>
    %487 = arith.mulf %483, %473 : vector<2x32xf32>
    %488 = arith.mulf %482, %486 : vector<2x32xf32>
    %489 = arith.addf %487, %488 : vector<2x32xf32>
    %490 = math.tanh %489 : vector<2x32xf32>
    %491 = arith.mulf %484, %490 : vector<2x32xf32>
    %492 = tpu.concatenate %465, %491 in 1 : vector<2x32xf32>, vector<2x32xf32> -> vector<2x64xf32>
    %c0_86 = arith.constant 0 : index
    %c0_87 = arith.constant 0 : index
    %493 = vector.load %arg14[%c0_86, %c0_87] : memref<64x64xf32, #tpu.memory_space<vmem>>, vector<64x64xf32>
    %cst_88 = arith.constant dense<0.000000e+00> : vector<2x64xf32>
    %494 = tpu.matmul %492, %493, %cst_88 {dimension_numbers = #tpu.dot_dimension_numbers<[1], [0], [0], [1], [0, 0, 1, 1], [], []>} : vector<2x64xf32>, vector<64x64xf32>, vector<2x64xf32> -> vector<2x64xf32>
    %c0_89 = arith.constant 0 : index
    %c0_90 = arith.constant 0 : index
    %495 = vector.load %arg15[%c0_89, %c0_90] : memref<1x64xf32, #tpu.memory_space<vmem>>, vector<1x64xf32>
    %496 = vector.broadcast %495 : vector<1x64xf32> to vector<2x64xf32>
    %497 = arith.addf %494, %496 : vector<2x64xf32>
    %c0_91 = arith.constant 0 : index
    %c0_92 = arith.constant 0 : index
    %498 = vector.load %arg16[%c0_91, %c0_92] : memref<1x64xf32, #tpu.memory_space<vmem>>, vector<1x64xf32>
    %c0_93 = arith.constant 0 : index
    %c0_94 = arith.constant 0 : index
    %499 = vector.load %arg17[%c0_93, %c0_94] : memref<1x64xf32, #tpu.memory_space<vmem>>, vector<1x64xf32>
    %cst_95 = arith.constant dense<0.000000e+00> : vector<2xf32>
    %500 = vector.multi_reduction <add>, %497, %cst_95 [1] : vector<2x64xf32> to vector<2xf32>
    %501 = vector.shape_cast %500 : vector<2xf32> to vector<2x1xf32>
    %cst_96 = arith.constant 6.400000e+01 : f32
    %502 = vector.broadcast %cst_96 : f32 to vector<2x1xf32>
    %503 = arith.divf %501, %502 : vector<2x1xf32>
    %504 = vector.broadcast %503 : vector<2x1xf32> to vector<2x64xf32>
    %505 = arith.subf %497, %504 : vector<2x64xf32>
    %506 = arith.mulf %505, %505 : vector<2x64xf32>
    %cst_97 = arith.constant dense<0.000000e+00> : vector<2xf32>
    %507 = vector.multi_reduction <add>, %506, %cst_97 [1] : vector<2x64xf32> to vector<2xf32>
    %508 = vector.shape_cast %507 : vector<2xf32> to vector<2x1xf32>
    %cst_98 = arith.constant 6.400000e+01 : f32
    %509 = vector.broadcast %cst_98 : f32 to vector<2x1xf32>
    %510 = arith.divf %508, %509 : vector<2x1xf32>
    %511 = vector.broadcast %503 : vector<2x1xf32> to vector<2x64xf32>
    %512 = arith.subf %497, %511 : vector<2x64xf32>
    %cst_99 = arith.constant 9.99999974E-6 : f32
    %513 = vector.broadcast %cst_99 : f32 to vector<2x1xf32>
    %514 = arith.addf %510, %513 : vector<2x1xf32>
    %515 = math.rsqrt %514 : vector<2x1xf32>
    %516 = vector.broadcast %515 : vector<2x1xf32> to vector<2x64xf32>
    %517 = arith.mulf %512, %516 : vector<2x64xf32>
    %518 = vector.broadcast %498 : vector<1x64xf32> to vector<2x64xf32>
    %519 = arith.mulf %517, %518 : vector<2x64xf32>
    %520 = vector.broadcast %499 : vector<1x64xf32> to vector<2x64xf32>
    %521 = arith.addf %519, %520 : vector<2x64xf32>
    %522 = arith.negf %521 : vector<2x64xf32>
    %523 = math.exp %522 : vector<2x64xf32>
    %cst_100 = arith.constant 1.000000e+00 : f32
    %524 = vector.broadcast %cst_100 : f32 to vector<2x64xf32>
    %525 = arith.addf %524, %523 : vector<2x64xf32>
    %526 = arith.divf %524, %525 : vector<2x64xf32>
    %527 = arith.mulf %521, %526 : vector<2x64xf32>
    %c0_101 = arith.constant 0 : index
    %c0_102 = arith.constant 0 : index
    %528 = vector.load %arg18[%c0_101, %c0_102] : memref<64x32xf32, #tpu.memory_space<vmem>>, vector<64x32xf32>
    %cst_103 = arith.constant dense<0.000000e+00> : vector<2x32xf32>
    %529 = tpu.matmul %527, %528, %cst_103 {dimension_numbers = #tpu.dot_dimension_numbers<[1], [0], [0], [1], [0, 0, 1, 1], [], []>} : vector<2x64xf32>, vector<64x32xf32>, vector<2x32xf32> -> vector<2x32xf32>
    %c0_104 = arith.constant 0 : index
    %c0_105 = arith.constant 0 : index
    %530 = vector.load %arg19[%c0_104, %c0_105] : memref<1x32xf32, #tpu.memory_space<vmem>>, vector<1x32xf32>
    %531 = vector.broadcast %530 : vector<1x32xf32> to vector<2x32xf32>
    %532 = arith.addf %529, %531 : vector<2x32xf32>
    %c0_106 = arith.constant 0 : index
    %c0_107 = arith.constant 0 : index
    %533 = vector.load %arg20[%c0_106, %c0_107] : memref<1x32xf32, #tpu.memory_space<vmem>>, vector<1x32xf32>
    %c0_108 = arith.constant 0 : index
    %c0_109 = arith.constant 0 : index
    %534 = vector.load %arg21[%c0_108, %c0_109] : memref<1x32xf32, #tpu.memory_space<vmem>>, vector<1x32xf32>
    %cst_110 = arith.constant dense<0.000000e+00> : vector<2xf32>
    %535 = vector.multi_reduction <add>, %532, %cst_110 [1] : vector<2x32xf32> to vector<2xf32>
    %536 = vector.shape_cast %535 : vector<2xf32> to vector<2x1xf32>
    %cst_111 = arith.constant 3.200000e+01 : f32
    %537 = vector.broadcast %cst_111 : f32 to vector<2x1xf32>
    %538 = arith.divf %536, %537 : vector<2x1xf32>
    %539 = vector.broadcast %538 : vector<2x1xf32> to vector<2x32xf32>
    %540 = arith.subf %532, %539 : vector<2x32xf32>
    %541 = arith.mulf %540, %540 : vector<2x32xf32>
    %cst_112 = arith.constant dense<0.000000e+00> : vector<2xf32>
    %542 = vector.multi_reduction <add>, %541, %cst_112 [1] : vector<2x32xf32> to vector<2xf32>
    %543 = vector.shape_cast %542 : vector<2xf32> to vector<2x1xf32>
    %cst_113 = arith.constant 3.200000e+01 : f32
    %544 = vector.broadcast %cst_113 : f32 to vector<2x1xf32>
    %545 = arith.divf %543, %544 : vector<2x1xf32>
    %546 = vector.broadcast %538 : vector<2x1xf32> to vector<2x32xf32>
    %547 = arith.subf %532, %546 : vector<2x32xf32>
    %cst_114 = arith.constant 9.99999974E-6 : f32
    %548 = vector.broadcast %cst_114 : f32 to vector<2x1xf32>
    %549 = arith.addf %545, %548 : vector<2x1xf32>
    %550 = math.rsqrt %549 : vector<2x1xf32>
    %551 = vector.broadcast %550 : vector<2x1xf32> to vector<2x32xf32>
    %552 = arith.mulf %547, %551 : vector<2x32xf32>
    %553 = vector.broadcast %533 : vector<1x32xf32> to vector<2x32xf32>
    %554 = arith.mulf %552, %553 : vector<2x32xf32>
    %555 = vector.broadcast %534 : vector<1x32xf32> to vector<2x32xf32>
    %556 = arith.addf %554, %555 : vector<2x32xf32>
    %557 = arith.negf %556 : vector<2x32xf32>
    %558 = math.exp %557 : vector<2x32xf32>
    %cst_115 = arith.constant 1.000000e+00 : f32
    %559 = vector.broadcast %cst_115 : f32 to vector<2x32xf32>
    %560 = arith.addf %559, %558 : vector<2x32xf32>
    %561 = arith.divf %559, %560 : vector<2x32xf32>
    %562 = arith.mulf %556, %561 : vector<2x32xf32>
    %c0_116 = arith.constant 0 : index
    %c0_117 = arith.constant 0 : index
    %563 = vector.load %arg22[%c0_116, %c0_117] : memref<1x32xf32, #tpu.memory_space<vmem>>, vector<1x32xf32>
    %564 = vector.broadcast %563 : vector<1x32xf32> to vector<2x32xf32>
    %565 = arith.mulf %562, %564 : vector<2x32xf32>
    %cst_118 = arith.constant dense<0.000000e+00> : vector<2xf32>
    %566 = vector.multi_reduction <add>, %565, %cst_118 [1] : vector<2x32xf32> to vector<2xf32>
    %567 = vector.shape_cast %566 : vector<2xf32> to vector<2x1xf32>
    %c0_119 = arith.constant 0 : index
    %c0_120 = arith.constant 0 : index
    %568 = vector.load %arg23[%c0_119, %c0_120] : memref<1x1xf32, #tpu.memory_space<vmem>>, vector<1x1xf32>
    %569 = vector.broadcast %568 : vector<1x1xf32> to vector<2x1xf32>
    %570 = arith.addf %567, %569 : vector<2x1xf32>
    %c0_121 = arith.constant 0 : index
    %c0_122 = arith.constant 0 : index
    %571 = vector.load %arg24[%c0_121, %c0_122] : memref<2x1xf32, #tpu.memory_space<vmem>>, vector<2x1xf32>
    tpu.vector_store %arg24[%c0_121, %c0_122], %570 {strides = array<i32>} : memref<2x1xf32, #tpu.memory_space<vmem>>, vector<2x1xf32>,
    return
  }
  func.func @transform_0(%arg0: i32) -> (i32, i32) {
    %c0_i32 = arith.constant 0 : i32
    %c0_i32_0 = arith.constant 0 : i32
    %c0_i32_1 = arith.constant 0 : i32
    return %c0_i32, %c0_i32_0 : i32, i32
  }
  func.func @transform_1(%arg0: i32) -> (i32, i32) {
    %c0_i32 = arith.constant 0 : i32
    %c0_i32_0 = arith.constant 0 : i32
    %c0_i32_1 = arith.constant 0 : i32
    return %c0_i32, %c0_i32_0 : i32, i32
  }
  func.func @transform_2(%arg0: i32) -> (i32, i32) {
    %c0_i32 = arith.constant 0 : i32
    %c0_i32_0 = arith.constant 0 : i32
    %c0_i32_1 = arith.constant 0 : i32
    return %c0_i32, %c0_i32_0 : i32, i32
  }
  func.func @transform_3(%arg0: i32) -> (i32, i32) {
    %c0_i32 = arith.constant 0 : i32
    %c0_i32_0 = arith.constant 0 : i32
    %c0_i32_1 = arith.constant 0 : i32
    return %c0_i32, %c0_i32_0 : i32, i32
  }
  func.func @transform_4(%arg0: i32) -> (i32, i32) {
    %c0_i32 = arith.constant 0 : i32
    %c0_i32_0 = arith.constant 0 : i32
    %c0_i32_1 = arith.constant 0 : i32
    return %c0_i32, %c0_i32_0 : i32, i32
  }
  func.func @transform_5(%arg0: i32) -> (i32, i32) {
    %c0_i32 = arith.constant 0 : i32
    %c0_i32_0 = arith.constant 0 : i32
    %c0_i32_1 = arith.constant 0 : i32
    return %c0_i32, %c0_i32_0 : i32, i32
  }
  func.func @transform_6(%arg0: i32) -> (i32, i32) {
    %c0_i32 = arith.constant 0 : i32
    %c0_i32_0 = arith.constant 0 : i32
    %c0_i32_1 = arith.constant 0 : i32
    return %c0_i32, %c0_i32_0 : i32, i32
  }
  func.func @transform_7(%arg0: i32) -> (i32, i32) {
    %c0_i32 = arith.constant 0 : i32
    %c0_i32_0 = arith.constant 0 : i32
    %c0_i32_1 = arith.constant 0 : i32
    return %c0_i32, %c0_i32_0 : i32, i32
  }
  func.func @transform_8(%arg0: i32) -> (i32, i32) {
    %c0_i32 = arith.constant 0 : i32
    %c0_i32_0 = arith.constant 0 : i32
    %c0_i32_1 = arith.constant 0 : i32
    return %c0_i32, %c0_i32_0 : i32, i32
  }
  func.func @transform_9(%arg0: i32) -> (i32, i32) {
    %c0_i32 = arith.constant 0 : i32
    %c0_i32_0 = arith.constant 0 : i32
    %c0_i32_1 = arith.constant 0 : i32
    return %c0_i32, %c0_i32_0 : i32, i32
  }
  func.func @transform_10(%arg0: i32) -> (i32, i32) {
    %c0_i32 = arith.constant 0 : i32
    %c0_i32_0 = arith.constant 0 : i32
    %c0_i32_1 = arith.constant 0 : i32
    return %c0_i32, %c0_i32_0 : i32, i32
  }
  func.func @transform_11(%arg0: i32) -> (i32, i32) {
    %c0_i32 = arith.constant 0 : i32
    %c0_i32_0 = arith.constant 0 : i32
    %c0_i32_1 = arith.constant 0 : i32
    return %c0_i32, %c0_i32_0 : i32, i32
  }
  func.func @transform_12(%arg0: i32) -> (i32, i32) {
    %c0_i32 = arith.constant 0 : i32
    %c0_i32_0 = arith.constant 0 : i32
    %c0_i32_1 = arith.constant 0 : i32
    return %c0_i32, %c0_i32_0 : i32, i32
  }
  func.func @transform_13(%arg0: i32) -> (i32, i32) {
    %c0_i32 = arith.constant 0 : i32
    %c0_i32_0 = arith.constant 0 : i32
    %c0_i32_1 = arith.constant 0 : i32
    return %c0_i32, %c0_i32_0 : i32, i32
  }
  func.func @transform_14(%arg0: i32) -> (i32, i32) {
    %c0_i32 = arith.constant 0 : i32
    %c0_i32_0 = arith.constant 0 : i32
    %c0_i32_1 = arith.constant 0 : i32
    return %c0_i32, %c0_i32_0 : i32, i32
  }
  func.func @transform_15(%arg0: i32) -> (i32, i32) {
    %c0_i32 = arith.constant 0 : i32
    %c0_i32_0 = arith.constant 0 : i32
    %c0_i32_1 = arith.constant 0 : i32
    return %c0_i32, %c0_i32_0 : i32, i32
  }
  func.func @transform_16(%arg0: i32) -> (i32, i32) {
    %c0_i32 = arith.constant 0 : i32
    %c0_i32_0 = arith.constant 0 : i32
    %c0_i32_1 = arith.constant 0 : i32
    return %c0_i32, %c0_i32_0 : i32, i32
  }
  func.func @transform_17(%arg0: i32) -> (i32, i32) {
    %c0_i32 = arith.constant 0 : i32
    %c0_i32_0 = arith.constant 0 : i32
    %c0_i32_1 = arith.constant 0 : i32
    return %c0_i32, %c0_i32_0 : i32, i32
  }
  func.func @transform_18(%arg0: i32) -> (i32, i32) {
    %c0_i32 = arith.constant 0 : i32
    %c0_i32_0 = arith.constant 0 : i32
    %c0_i32_1 = arith.constant 0 : i32
    return %c0_i32, %c0_i32_0 : i32, i32
  }
  func.func @transform_19(%arg0: i32) -> (i32, i32) {
    %c0_i32 = arith.constant 0 : i32
    %c0_i32_0 = arith.constant 0 : i32
    %c0_i32_1 = arith.constant 0 : i32
    return %c0_i32, %c0_i32_0 : i32, i32
  }
  func.func @transform_20(%arg0: i32) -> (i32, i32) {
    %c0_i32 = arith.constant 0 : i32
    %c0_i32_0 = arith.constant 0 : i32
    %c0_i32_1 = arith.constant 0 : i32
    return %c0_i32, %c0_i32_0 : i32, i32
  }
  func.func @transform_21(%arg0: i32) -> (i32, i32) {
    %c0_i32 = arith.constant 0 : i32
    %c0_i32_0 = arith.constant 0 : i32
    %c0_i32_1 = arith.constant 0 : i32
    return %c0_i32, %c0_i32_0 : i32, i32
  }
  func.func @transform_22(%arg0: i32) -> (i32, i32) {
    %c0_i32 = arith.constant 0 : i32
    %c0_i32_0 = arith.constant 0 : i32
    %c0_i32_1 = arith.constant 0 : i32
    return %c0_i32, %c0_i32_0 : i32, i32
  }
  func.func @transform_23(%arg0: i32) -> (i32, i32) {
    %c0_i32 = arith.constant 0 : i32
    %c0_i32_0 = arith.constant 0 : i32
    %c0_i32_1 = arith.constant 0 : i32
    return %c0_i32, %c0_i32_0 : i32, i32
  }
}

</mosaic_0001>

<bundles_post_ra>
// kernel: tpu_custom_call.1
= control target key start
LH: loop header
LB: loop body
LE: loop exit
PB: predicated region body
PF: predicated region fallthrough
CT: control target
= control target key end

     0   :  { %s5433_s0 = inlined_call_operand.vmem [shape: f32[16,4], index: 0, kind: input, shape index: {}]   ;;  %s5434_s1 = inlined_call_operand.hbm [shape: f32[4,128], index: 1, kind: input, shape index: {}]   ;;  %s5435_s2 = inlined_call_operand.hbm [shape: f32[32,128], index: 2, kind: input, shape index: {}]   ;;  %s5436_s3 = inlined_call_operand.hbm [shape: f32[1,128], index: 3, kind: input, shape index: {}]   ;;  %s5437_s4 = inlined_call_operand.hbm [shape: f32[4,128], index: 4, kind: input, shape index: {}]   ;;  %s5438_s5 = inlined_call_operand.hbm [shape: f32[32,128], index: 5, kind: input, shape index: {}]   ;;  %s5439_s6 = inlined_call_operand.hbm [shape: f32[1,128], index: 6, kind: input, shape index: {}]   ;;  %s5440_s7 = inlined_call_operand.vmem [shape: f32[64,128], index: 7, kind: input, shape index: {}]   ;;  %s5441_s8 = inlined_call_operand.hbm [shape: f32[32,128], index: 8, kind: input, shape index: {}]   ;;  %s5442_s9 = inlined_call_operand.vmem [shape: f32[1,128], index: 9, kind: input, shape index: {}]   ;;  %s5443_s10 = inlined_call_operand.vmem [shape: f32[64,128], index: 10, kind: input, shape index: {}]   ;;  %s5444_s11 = inlined_call_operand.hbm [shape: f32[32,128], index: 11, kind: input, shape index: {}]   ;;  %s5445_s12 = inlined_call_operand.vmem [shape: f32[1,128], index: 12, kind: input, shape index: {}]   ;;  %s5446_s13 = inlined_call_operand.hbm [shape: f32[64,64], index: 13, kind: input, shape index: {}]   ;;  %s5447_s14 = inlined_call_operand.vmem [shape: f32[1,64], index: 14, kind: input, shape index: {}]   ;;  %s5448_s15 = inlined_call_operand.vmem [shape: f32[1,64], index: 15, kind: input, shape index: {}]   ;;  %s5449_s16 = inlined_call_operand.vmem [shape: f32[1,64], index: 16, kind: input, shape index: {}]   ;;  %s5450_s17 = inlined_call_operand.vmem [shape: f32[64,32], index: 17, kind: input, shape index: {}]   ;;  %s5451_s18 = inlined_call_operand.vmem [shape: f32[1,32], index: 18, kind: input, shape index: {}]   ;;  %s5452_s19 = inlined_call_operand.vmem [shape: f32[1,32], index: 19, kind: input, shape index: {}]   ;;  %s5453_s20 = inlined_call_operand.vmem [shape: f32[1,32], index: 20, kind: input, shape index: {}]   ;;  %s5454_s21 = inlined_call_operand.vmem [shape: f32[1,32], index: 21, kind: input, shape index: {}]   ;;  %s5455_s22 = inlined_call_operand.<no memory space> [shape: f32[1,1], index: 22, kind: input, shape index: {}]   ;;  %s5456_s23 = inlined_call_operand.vmem [shape: f32[2,1], index: 23, kind: output, shape index: {}]  }
   0x1   :  { %5459 = sst [smem:[#allocation22_spill]] %s5433_s0  ;;  %v28_v0 = vstv %s5455_s22 }
   0x2   :  { %5460 = sst [smem:[#allocation23_spill]] %s5434_s1  ;;  %29 = vst [vmem:[#allocation2] sm:$0x1] %v28_v0 }
   0x3   :  { %5461 = sst [smem:[#allocation24_spill]] %s5435_s2 }
   0x4   :  { %5462 = sst [smem:[#allocation25_spill]] %s5436_s3 }
   0x5   :  { %5463 = sst [smem:[#allocation26_spill]] %s5437_s4 }
   0x6   :  { %5464 = sst [smem:[#allocation27_spill]] %s5438_s5 }
   0x7   :  { %5465 = sst [smem:[#allocation28_spill]] %s5439_s6 }
   0x8   :  { %5466 = sst [smem:[#allocation29_spill]] %s5440_s7 }
   0x9   :  { %30 = vsyncpa [#allocation4], 0 }
   0xa   :  { %31 = vsyncpa [#allocation6], 0 }
   0xb   :  { %32 = vsyncpa [#allocation9], 0 }
   0xc   :  { %33 = vsyncpa [#allocation12], 0 }
   0xd   :  { %34 = vsyncpa [#allocation15], 0  ;;  %s4567_s24 = smov [#allocation5]  }
   0xe   :  { %s52_s25 = sshll.u32 %s4567_s24, 4  ;;  %s53_s25 = int_to_ptr.vmem [resolvable:$true] %s52_s25 }
   0xf   :  { %s4385_s5 = scalar_lea.vmem %s53_s25, 512  ;;  %p4390_p1 = scmp.lt.s32.totalorder %s53_s25, %s53_s25 }
  0x10   :  { %p4386_p0 = scmp.ne.s32.totalorder %s53_s25, %s4385_s5  ;;  %p4391_p2 = scmp.lt.s32.totalorder %s4385_s5, %s4385_s5 }
  0x12   :  { %p4392_p3 = por %p4391_p2, %p4390_p1 }
  0x14   :  { %p4393_p4 = pnand %p4392_p3, %p4386_p0 }
  0x16   :  { %4396 = shalt.err (!%p4393_p4)
}
  0x17   :  { %s4568_s1 = smov 128   ;;  %s4569_s26 = smov 8  }
  0x18   :  { %s5467_s6 = sld [smem:[#allocation24_spill]]  ;;  %s4570_s27 = smov [#allocation8]  }
  0x19   :  { %s75_s7 = sshll.u32 %s4570_s27, 4  ;;  %s4571_s28 = smov [#allocation11]   ;;  %s76_s7 = int_to_ptr.vmem [resolvable:$true] %s75_s7 }
  0x1a   :  { %s97_s29 = sshll.u32 %s4571_s28, 4  ;;  %s4405_s3 = scalar_lea.vmem %s76_s7, 64  ;;  %s98_s29 = int_to_ptr.vmem [resolvable:$true] %s97_s29 }
  0x1b   :  { %p4406_p5 = scmp.ne.s32.totalorder %s76_s7, %s4405_s3  ;;  %p4410_p6 = scmp.lt.s32.totalorder %s76_s7, %s76_s7 }
  0x1c   :  { %p4411_p7 = scmp.lt.s32.totalorder %s4405_s3, %s4405_s3 }
  0x1e   :  { %58 = dma.hbm_to_vmem [thread:$0]  %s5467_s6, 512, %s53_s25, [#allocation6], %s4568_s1, %s4568_s1, %s4569_s26  }
  0x1f   :  { %p4412_p8 = por %p4411_p7, %p4410_p6 }
  0x21   :  { %p4413_p9 = pnand %p4412_p8, %p4406_p5 }
  0x23   :  { %4416 = shalt.err (!%p4413_p9)
}
  0x24   :  { %s5468_s30 = sld [smem:[#allocation26_spill]]  ;;  %s4425_s24 = scalar_lea.vmem %s98_s29, 16 }
  0x25   :  { %p4426_p10 = scmp.ne.s32.totalorder %s98_s29, %s4425_s24  ;;  %s4429_s25 = scalar_lea.vmem %s98_s29, 32 }
  0x26   :  { %p4430_p11 = scmp.lt.s32.totalorder %s98_s29, %s98_s29  ;;  %p4431_p12 = scmp.lt.s32.totalorder %s4429_s25, %s4425_s24 }
  0x28   :  { %p4432_p13 = por %p4431_p12, %p4430_p11 }
  0x2a   :  { %78 = dma.hbm_to_vmem [thread:$0]  %s5468_s30, 64, %s76_s7, [#allocation9]  }
  0x2b   :  { %p4433_p0 = pnand %p4432_p13, %p4426_p10 }
  0x2d   :  { %4436 = shalt.err (!%p4433_p0)
}
  0x2e   :  { %s5469_s2 = sld [smem:[#allocation28_spill]]  ;;  %s4572_s6 = smov [#allocation14]  }
  0x2f   :  { %s124_s27 = sshll.u32 %s4572_s6, 4  ;;  %s4573_s28 = smov [#allocation3]   ;;  %s125_s27 = int_to_ptr.vmem [resolvable:$true] %s124_s27 }
  0x30   :  { %s43_s3 = sshll.u32 %s4573_s28, 4  ;;  %s4445_s0 = scalar_lea.vmem %s125_s27, 512  ;;  %s44_s3 = int_to_ptr.vmem [resolvable:$true] %s43_s3 }
  0x31   :  { %p4446_p1 = scmp.ne.s32.totalorder %s125_s27, %s4445_s0  ;;  %p4450_p2 = scmp.lt.s32.totalorder %s125_s27, %s125_s27 }
  0x32   :  { %p4451_p3 = scmp.lt.s32.totalorder %s4445_s0, %s4445_s0 }
  0x34   :  { %100 = dma.hbm_to_vmem [thread:$0]  %s5469_s2, 16, %s98_s29, [#allocation12]  }
  0x35   :  { %p4452_p4 = por %p4451_p3, %p4450_p2 }
  0x37   :  { %p4453_p5 = pnand %p4452_p4, %p4446_p1 }
  0x39   :  { %4456 = shalt.err (!%p4453_p5)
}
  0x3a   :  { %130 = dma.hbm_to_vmem [thread:$0]  %s5444_s11, 512, %s125_s27, [#allocation15], %s4568_s1, %s4568_s1, %s4569_s26  }
  0x3b   :  { %s4465_s29 = scalar_lea.vmem %s44_s3, 64  ;;  %p4470_p7 = scmp.lt.s32.totalorder %s44_s3, %s44_s3 }
  0x3c   :  { %p4466_p6 = scmp.ne.s32.totalorder %s44_s3, %s4465_s29  ;;  %p4471_p8 = scmp.lt.s32.totalorder %s4465_s29, %s4465_s29 }
  0x3e   :  { %p4472_p9 = por %p4471_p8, %p4470_p7 }
  0x40   :  { %p4473_p10 = pnand %p4472_p9, %p4466_p6 }
  0x42   :  { %4476 = shalt.err (!%p4473_p10)
}
  0x43   :  { %s5470_s25 = sld [smem:[#allocation23_spill]]  ;;  %s4574_s5 = smov [#allocation7]  }
  0x44   :  { %s65_s22 = sshll.u32 %s4574_s5, 4  ;;  %s4575_s2 = smov [#allocation10]   ;;  %s66_s22 = int_to_ptr.vmem [resolvable:$true] %s65_s22 }
  0x45   :  { %s84_s6 = sshll.u32 %s4575_s2, 4  ;;  %s4485_s28 = scalar_lea.vmem %s66_s22, 16  ;;  %s85_s6 = int_to_ptr.vmem [resolvable:$true] %s84_s6 }
  0x46   :  { %p4486_p11 = scmp.ne.s32.totalorder %s66_s22, %s4485_s28  ;;  %s4489_s11 = scalar_lea.vmem %s66_s22, 32 }
  0x47   :  { %p4490_p12 = scmp.lt.s32.totalorder %s66_s22, %s66_s22  ;;  %p4491_p13 = scmp.lt.s32.totalorder %s4489_s11, %s4485_s28 }
  0x49   :  { %46 = dma.hbm_to_vmem [thread:$0]  %s5470_s25, 64, %s44_s3, [#allocation4]  }
  0x4a   :  { %p4492_p0 = por %p4491_p13, %p4490_p12 }
  0x4c   :  { %p4493_p1 = pnand %p4492_p0, %p4486_p11 }
  0x4e   :  { %4496 = shalt.err (!%p4493_p1)
}
  0x4f   :  { %s5471_s7 = sld [smem:[#allocation25_spill]]  ;;  %s4505_s4 = scalar_lea.vmem %s85_s6, 512 }
  0x50   :  { %p4506_p2 = scmp.ne.s32.totalorder %s85_s6, %s4505_s4  ;;  %p4510_p3 = scmp.lt.s32.totalorder %s85_s6, %s85_s6 }
  0x51   :  { %p4511_p4 = scmp.lt.s32.totalorder %s4505_s4, %s4505_s4 }
  0x53   :  { %p4512_p5 = por %p4511_p4, %p4510_p3 }
  0x55   :  { %68 = dma.hbm_to_vmem [thread:$0]  %s5471_s7, 16, %s66_s22, [#allocation6]  }
  0x56   :  { %p4513_p6 = pnand %p4512_p5, %p4506_p2 }
  0x58   :  { %4516 = shalt.err (!%p4513_p6)
}
  0x59   :  { %s5472_s30 = sld [smem:[#allocation27_spill]]  ;;  %s4576_s24 = smov [#allocation13]  }
  0x5a   :  { %s108_s25 = sshll.u32 %s4576_s24, 4  ;;  %s4577_s5 = smov [#allocation16]   ;;  %s109_s25 = int_to_ptr.vmem [resolvable:$true] %s108_s25 }
  0x5b   :  { %s138_s22 = sshll.u32 %s4577_s5, 4  ;;  %s4525_s2 = scalar_lea.vmem %s109_s25, 512  ;;  %s139_s22 = int_to_ptr.vmem [resolvable:$true] %s138_s22 }
  0x5c   :  { %p4526_p7 = scmp.ne.s32.totalorder %s109_s25, %s4525_s2  ;;  %p4530_p8 = scmp.lt.s32.totalorder %s109_s25, %s109_s25 }
  0x5d   :  { %p4531_p9 = scmp.lt.s32.totalorder %s4525_s2, %s4525_s2 }
  0x5f   :  { %90 = dma.hbm_to_vmem [thread:$0]  %s5472_s30, 512, %s85_s6, [#allocation9], %s4568_s1, %s4568_s1, %s4569_s26  }
  0x60   :  { %p4532_p10 = por %p4531_p9, %p4530_p8 }
  0x62   :  { %p4533_p11 = pnand %p4532_p10, %p4526_p7 }
  0x64   :  { %4536 = shalt.err (!%p4533_p11)
}
  0x65   :  { %114 = dma.hbm_to_vmem [thread:$0]  %s5441_s8, 512, %s109_s25, [#allocation12], %s4568_s1, %s4568_s1, %s4569_s26  }
  0x66   :  { %s4545_s6 = scalar_lea.vmem %s139_s22, 1024  ;;  %p4550_p13 = scmp.lt.s32.totalorder %s139_s22, %s139_s22 }
  0x67   :  { %p4546_p12 = scmp.ne.s32.totalorder %s139_s22, %s4545_s6  ;;  %p4551_p0 = scmp.lt.s32.totalorder %s4545_s6, %s4545_s6 }
  0x69   :  { %p4552_p1 = por %p4551_p0, %p4550_p13 }
  0x6b   :  { %p4553_p2 = pnand %p4552_p1, %p4546_p12 }
  0x6d   :  { %4556 = shalt.err (!%p4553_p2)
}
  0x6e   :  { %144 = dma.hbm_to_vmem [thread:$0]  %s5446_s13, 1024, %s139_s22, [#allocation15], %s4568_s1, %s4568_s1, %s4569_s26  }
  0x6f   :  { %4557 = dma.done.wait [#allocation4], 64  }
  0x70   :  { %4558 = vsyncadd [#allocation4], 4294967232 }
  0x71   :  { %4559 = dma.done.wait [#allocation6], 528  }
  0x72   :  { %4560 = vsyncadd [#allocation6], 4294966768 }
  0x73   :  { %4561 = dma.done.wait [#allocation9], 576  }
  0x74   :  { %4562 = vsyncadd [#allocation9], 4294966720 }
  0x75   :  { %4563 = dma.done.wait [#allocation12], 528  }
  0x76   :  { %4564 = vsyncadd [#allocation12], 4294966768 }
  0x77   :  { %4565 = dma.done.wait [#allocation15], 1536  }
  0x78   :  { %4566 = vsyncadd [#allocation15], 4294965760  ;;  %v4578_v1 = vmov 0.0   ;;  %vm4579_vm0 = vmmov 0   ;;  %vm207_vm1 = vcmask 1043456   ;;  %vm200_vm2 = vcmask 31744  }
  0x79   :  { %3805 = vmatprep.subr.mxu0 %v4578_v1  ;;  %3813 = vmatprep.mubr.msk.f32.mxu0 %vm4579_vm0, %v4578_v1  ;;  %v192_v2 = vld [vmem:[#allocation3] sm:$0xf]  ;;  %s5473_s1 = sld [smem:[#allocation22_spill]]  ;;  %v4770_v6 = vld [vmem:[#allocation5 + $0x10] sm:$0xff]  ;;  %v4776_v7 = vld [vmem:[#allocation5 + $0x8] sm:$0xff]  ;;  %s4580_s4 = smov 64  }
  0x7a   :  { %3789 = vmatprep.subr.msk.mxu1 %vm207_vm1, %v192_v2  ;;  %v4763_v5 = vld [vmem:[#allocation5 + $0x18] sm:$0xff]  ;;  %v4782_v8 = vld [vmem:[#allocation5] sm:$0xff]  ;;  %s4581_s3 = smov 32   ;;  %vm290_vm3 = vcmask 261120   ;;  %s5474_s24 = sld [smem:[#allocation29_spill]]  ;;  %vm2117_vm4 = vcmask 1041408  }
  0x7b   :  { %3790 = vmatpush3.msk.msra.mxu1 %vm207_vm1, %v192_v2  ;;  %3806 = vmatpush3.msra.mxu0 %v4763_v5  ;;  %v3548_v9 = vld [vmem:[#allocation7] ss:$0 sm:$0xff]  ;;  %vm2120_vm5 = vcmask 1045504   ;;  %vm2140_vm6 = vcmask 523264   ;;  %vm3356_vm7 = vcmask 517120   ;;  %vm3482_vm8 = vcmask 254976  }
  0x7c   :  { %3794 = vmatprep.subr.mxu1 %v4578_v1  ;;  %3807 = vmatprep.subr.mxu0 %v4578_v1  ;;  %vm3537_vm9 = vcmask 1024  }
  0x7d   :  { %3808 = vmatpush3.msra.mxu0 %v4770_v6 }
  0x7e   :  { %3809 = vmatprep.subr.mxu0 %v4578_v1 }
  0x7f   :  { %v4753_v3 = vld [vmem:[%s5473_s1] sm:$0xff]  ;;  %v4758_v4 = vld [vmem:[%s5473_s1 + $0x8] sm:$0xff]  ;;  %3810 = vmatpush3.msra.mxu0 %v4776_v7 }
  0x80   :  { %3791 = vmatprep.mubr.msk.f32.mxu1 %vm200_vm2, %v4753_v3  ;;  %3811 = vmatprep.subr.mxu0 %v4578_v1 }
  0x81   :  { %3792 = vmatmul.mubr.msk.f32.vlgmr.msra.gmra.mxu1 %vm200_vm2, %v4758_v4  ;;  %3812 = vmatpush3.msra.mxu0 %v4782_v8 }
  0x82   :  { %3795 = vmatpush3.msra.mxu1 %v4763_v5  ;;  %3802 = vmatprep.mubr.msk.f32.mxu1 %vm4579_vm0, %v4578_v1 }
  0x83   :  { %3796 = vmatprep.subr.mxu1 %v4578_v1  ;;  %3827 = vmatprep.subr.mxu0 %v4578_v1 }
  0x84   :  { %3797 = vmatpush3.msra.mxu1 %v4770_v6 }
  0x85   :  { %3798 = vmatprep.subr.mxu1 %v4578_v1 }
  0x86   :  { %3799 = vmatpush3.msra.mxu1 %v4776_v7 }
  0x87   :  { %3800 = vmatprep.subr.mxu1 %v4578_v1 }
  0x88   :  { %3801 = vmatpush3.msra.mxu1 %v4782_v8 }
  0x89   :  { %3803 = vmatmul.mubr.f32.vlgmr.msra.gmra.mxu1 %v4578_v1  ;;  %3816 = vmatprep.subr.mxu1 %v4578_v1 }
  0x8a   :  { %3817 = vmatpush3.msra.mxu1 %v4763_v5  ;;  %3824 = vmatprep.mubr.msk.f32.mxu1 %vm4579_vm0, %v4578_v1 }
  0x8b   :  { %3818 = vmatprep.subr.mxu1 %v4578_v1 }
  0x8c   :  { %3819 = vmatpush3.msra.mxu1 %v4770_v6 }
  0x8d   :  { %3820 = vmatprep.subr.mxu1 %v4578_v1 }
  0x8e   :  { %3821 = vmatpush3.msra.mxu1 %v4776_v7 }
  0x8f   :  { %3822 = vmatprep.subr.mxu1 %v4578_v1 }
  0x90   :  { %3823 = vmatpush3.msra.mxu1 %v4782_v8 }
  0x91   :  { %3838 = vmatprep.subr.mxu1 %v4578_v1 }
 0x141   :  { %v3793_v10 = vpop.f32.mrf.mxu1 }
 0x142   :  { %v4804_v11 = vadd.f32 %v3793_v10, %v3548_v9 }
 0x143   :  { %v277_v12 = vpop.f32.mrf.mxu1 }
 0x144   :  { %v4806_v13 = vadd.f32 %v3548_v9, %v277_v12 }
 0x149   :  { %v360_v14 = vpop.f32.mrf.mxu1 }
 0x14a   :  { %v364_v15 = vadd.f32 %v360_v14, %v4806_v13 }
 0x14b   :  { %v3804_v16 = vpop.f32.mrf.mxu1 }
 0x14c   :  { %4165 = vtanh.f32 %v364_v15  ;;  %v3552_v18 = vmul.f32 -1.442695, %v364_v15 }
 0x14e   :  { %4167 = vpow2.f32 %v3552_v18 }
 0x159   :  { %v4166_v17 = vpop.eup %4165 }
 0x15a   :  { %374 = vrot.lane.b32.xlu0 %v4166_v17, %s4580_s4 }
 0x15b   :  { %v4168_v19 = vpop.eup %4167 }
 0x15c   :  { %v368_v20 = vadd.f32 1.0, %v4168_v19 }
 0x15e   :  { %4169 = vrcp.f32 %v368_v20 }
 0x16b   :  { %v4170_v21 = vpop.eup %4169 }
 0x16c   :  { %v372_v24 = vmul.f32 0.0, %v4170_v21 }
 0x1cc   :  { %v375_v22 = vpop.permute.xlu0 %374 }
 0x1cd   :  { %v377_v23 = vmul.f32 %v4170_v21, %v375_v22 }
 0x1cf   :  { %379 = vrot.lane.b32.xlu0 %v377_v23, %s4581_s3 }
 0x241   :  { %v380_v25 = vpop.permute.xlu0 %379 }
 0x242   :  { %v382_v26 = vadd.f32 %v380_v25, %v372_v24 }
 0x244   :  { %4171 = vtanh.f32 %v382_v26  ;;  %v476_v42 = vrot.slane %v382_v26, 6 }
 0x251   :  { %v4172_v27 = vpop.eup %4171 }
 0x252   :  { %385 = vrot.lane.b32.xlu1 %v4172_v27, %s4580_s4 }
 0x2c4   :  { %v386_v28 = vpop.permute.xlu1 %385 }
 0x2c5   :  { %v388_v29 = vmul.f32 %v4170_v21, %v386_v28 }
 0x2c7   :  { %390 = vrot.lane.b32.xlu1 %v388_v29, %s4581_s3 }
 0x339   :  { %v4813_v30 = vpop.permute.xlu1 %390 }
 0x33a   :  { %3814 = vmatmul.mubr.msk.f32.vlgmr.msra.gmra.mxu0 %vm290_vm3, %v4813_v30 }
 0x33b   :  { %3828 = vmatpush3.msra.mxu0 %v4763_v5  ;;  %3835 = vmatprep.mubr.msk.f32.mxu0 %vm4579_vm0, %v4578_v1 }
 0x33c   :  { %3829 = vmatprep.subr.mxu0 %v4578_v1 }
 0x33d   :  { %3830 = vmatpush3.msra.mxu0 %v4770_v6 }
 0x33e   :  { %3831 = vmatprep.subr.mxu0 %v4578_v1 }
 0x33f   :  { %3832 = vmatpush3.msra.mxu0 %v4776_v7 }
 0x340   :  { %3833 = vmatprep.subr.mxu0 %v4578_v1 }
 0x341   :  { %3834 = vmatpush3.msra.mxu0 %v4782_v8 }
 0x342   :  { %3849 = vmatprep.subr.mxu0 %v4578_v1 }
 0x3fa   :  { %v460_v31 = vpop.f32.mrf.mxu0 }
 0x3fb   :  { %v465_v32 = vrot.slane %v460_v31, 6 }
 0x3fc   :  { %v3815_v33 = vpop.f32.mrf.mxu0 }
 0x3fd   :  { %v467_v34 = vadd.f32 %v465_v32, %v4806_v13 }
 0x3ff   :  { %4173 = vtanh.f32 %v467_v34  ;;  %v3554_v36 = vmul.f32 -1.442695, %v467_v34 }
 0x401   :  { %4175 = vpow2.f32 %v3554_v36 }
 0x40c   :  { %v4174_v35 = vpop.eup %4173 }
 0x40d   :  { %480 = vrot.lane.b32.xlu0 %v4174_v35, %s4580_s4 }
 0x40e   :  { %v4176_v37 = vpop.eup %4175 }
 0x40f   :  { %v471_v38 = vadd.f32 1.0, %v4176_v37 }
 0x411   :  { %4177 = vrcp.f32 %v471_v38 }
 0x41e   :  { %v4178_v39 = vpop.eup %4177 }
 0x41f   :  { %v478_v43 = vmul.f32 %v4178_v39, %v476_v42 }
 0x47f   :  { %v481_v40 = vpop.permute.xlu0 %480 }
 0x480   :  { %v483_v41 = vmul.f32 %v4178_v39, %v481_v40 }
 0x482   :  { %485 = vrot.lane.b32.xlu1 %v483_v41, %s4581_s3 }
 0x4f4   :  { %v486_v44 = vpop.permute.xlu1 %485 }
 0x4f5   :  { %v488_v45 = vadd.f32 %v486_v44, %v478_v43 }
 0x4f7   :  { %4179 = vtanh.f32 %v488_v45  ;;  %v583_v62 = vrot.slane %v488_v45, 6 }
 0x504   :  { %v4180_v46 = vpop.eup %4179 }
 0x505   :  { %491 = vrot.lane.b32.xlu0 %v4180_v46, %s4580_s4 }
 0x577   :  { %v492_v47 = vpop.permute.xlu0 %491 }
 0x578   :  { %v4831_v48 = vmul.f32 %v4178_v39, %v492_v47 }
 0x57a   :  { %v496_v49 = vrot.slane %v4831_v48, 2 }
 0x57c   :  { %497 = vrot.lane.b32.xlu1 %v496_v49, %s4581_s3 }
 0x5ee   :  { %v498_v50 = vpop.permute.xlu1 %497 }
 0x5ef   :  { %3825 = vmatmul.mubr.msk.f32.vlgmr.msra.gmra.mxu1 %vm290_vm3, %v498_v50 }
 0x5f0   :  { %3839 = vmatpush3.msra.mxu1 %v4763_v5  ;;  %3846 = vmatprep.mubr.msk.f32.mxu1 %vm4579_vm0, %v4578_v1 }
 0x5f1   :  { %3840 = vmatprep.subr.mxu1 %v4578_v1 }
 0x5f2   :  { %3841 = vmatpush3.msra.mxu1 %v4770_v6 }
 0x5f3   :  { %3842 = vmatprep.subr.mxu1 %v4578_v1 }
 0x5f4   :  { %3843 = vmatpush3.msra.mxu1 %v4776_v7 }
 0x5f5   :  { %3844 = vmatprep.subr.mxu1 %v4578_v1 }
 0x5f6   :  { %3845 = vmatpush3.msra.mxu1 %v4782_v8 }
 0x5f7   :  { %3860 = vmatprep.subr.mxu1 %v4578_v1 }
 0x6af   :  { %v567_v51 = vpop.f32.mrf.mxu1 }
 0x6b0   :  { %v572_v52 = vrot.slane %v567_v51, 4 }
 0x6b1   :  { %v3826_v53 = vpop.f32.mrf.mxu1 }
 0x6b2   :  { %v574_v54 = vadd.f32 %v572_v52, %v4806_v13 }
 0x6b4   :  { %4181 = vtanh.f32 %v574_v54  ;;  %v3556_v56 = vmul.f32 -1.442695, %v574_v54 }
 0x6b6   :  { %4183 = vpow2.f32 %v3556_v56 }
 0x6c1   :  { %v4182_v55 = vpop.eup %4181 }
 0x6c2   :  { %587 = vrot.lane.b32.xlu0 %v4182_v55, %s4580_s4 }
 0x6c3   :  { %v4184_v57 = vpop.eup %4183 }
 0x6c4   :  { %v578_v58 = vadd.f32 1.0, %v4184_v57 }
 0x6c6   :  { %4185 = vrcp.f32 %v578_v58 }
 0x6d3   :  { %v4186_v59 = vpop.eup %4185 }
 0x6d4   :  { %v585_v63 = vmul.f32 %v4186_v59, %v583_v62 }
 0x734   :  { %v588_v60 = vpop.permute.xlu0 %587 }
 0x735   :  { %v590_v61 = vmul.f32 %v4186_v59, %v588_v60 }
 0x737   :  { %592 = vrot.lane.b32.xlu1 %v590_v61, %s4581_s3 }
 0x7a9   :  { %v593_v0 = vpop.permute.xlu1 %592 }
 0x7aa   :  { %v595_v2 = vadd.f32 %v593_v0, %v585_v63 }
 0x7ac   :  { %4187 = vtanh.f32 %v595_v2  ;;  %v690_v27 = vrot.slane %v595_v2, 6 }
 0x7b9   :  { %v4188_v9 = vpop.eup %4187 }
 0x7ba   :  { %598 = vrot.lane.b32.xlu0 %v4188_v9, %s4580_s4 }
 0x82c   :  { %v599_v10 = vpop.permute.xlu0 %598 }
 0x82d   :  { %v4850_v12 = vmul.f32 %v4186_v59, %v599_v10 }
 0x82f   :  { %v603_v14 = vrot.slane %v4850_v12, 4 }
 0x831   :  { %604 = vrot.lane.b32.xlu1 %v603_v14, %s4581_s3 }
 0x8a3   :  { %v605_v15 = vpop.permute.xlu1 %604 }
 0x8a4   :  { %3836 = vmatmul.mubr.msk.f32.vlgmr.msra.gmra.mxu0 %vm290_vm3, %v605_v15 }
 0x8a5   :  { %3850 = vmatpush3.msra.mxu0 %v4763_v5  ;;  %3857 = vmatprep.mubr.msk.f32.mxu0 %vm4579_vm0, %v4578_v1 }
 0x8a6   :  { %3851 = vmatprep.subr.mxu0 %v4578_v1 }
 0x8a7   :  { %3852 = vmatpush3.msra.mxu0 %v4770_v6 }
 0x8a8   :  { %3853 = vmatprep.subr.mxu0 %v4578_v1 }
 0x8a9   :  { %3854 = vmatpush3.msra.mxu0 %v4776_v7 }
 0x8aa   :  { %3855 = vmatprep.subr.mxu0 %v4578_v1 }
 0x8ab   :  { %3856 = vmatpush3.msra.mxu0 %v4782_v8 }
 0x8ac   :  { %3871 = vmatprep.subr.mxu0 %v4578_v1 }
 0x964   :  { %v674_v16 = vpop.f32.mrf.mxu0 }
 0x965   :  { %v679_v17 = vrot.slane %v674_v16, 2 }
 0x966   :  { %v3837_v18 = vpop.f32.mrf.mxu0 }
 0x967   :  { %v681_v19 = vadd.f32 %v679_v17, %v4806_v13 }
 0x969   :  { %4189 = vtanh.f32 %v681_v19  ;;  %v3558_v21 = vmul.f32 -1.442695, %v681_v19 }
 0x96b   :  { %4191 = vpow2.f32 %v3558_v21 }
 0x976   :  { %v4190_v20 = vpop.eup %4189 }
 0x977   :  { %694 = vrot.lane.b32.xlu0 %v4190_v20, %s4580_s4 }
 0x978   :  { %v4192_v22 = vpop.eup %4191 }
 0x979   :  { %v685_v23 = vadd.f32 1.0, %v4192_v22 }
 0x97b   :  { %4193 = vrcp.f32 %v685_v23 }
 0x988   :  { %v4194_v24 = vpop.eup %4193 }
 0x989   :  { %v692_v28 = vmul.f32 %v4194_v24, %v690_v27 }
 0x9e9   :  { %v695_v25 = vpop.permute.xlu0 %694 }
 0x9ea   :  { %v697_v26 = vmul.f32 %v4194_v24, %v695_v25 }
 0x9ec   :  { %699 = vrot.lane.b32.xlu1 %v697_v26, %s4581_s3 }
 0xa5e   :  { %v700_v29 = vpop.permute.xlu1 %699 }
 0xa5f   :  { %v702_v31 = vadd.f32 %v700_v29, %v692_v28 }
 0xa61   :  { %4195 = vtanh.f32 %v702_v31  ;;  %v794_v46 = vrot.slane %v702_v31, 6 }
 0xa6e   :  { %v4196_v13 = vpop.eup %4195 }
 0xa6f   :  { %705 = vrot.lane.b32.xlu0 %v4196_v13, %s4580_s4 }
 0xae1   :  { %v706_v32 = vpop.permute.xlu0 %705 }
 0xae2   :  { %v4869_v33 = vmul.f32 %v4194_v24, %v706_v32  ;;  %v1133_v32 = vld [vmem:[#allocation8] sm:$0xf] }
 0xae4   :  { %v710_v34 = vrot.slane %v4869_v33, 6 }
 0xae6   :  { %711 = vrot.lane.b32.xlu1 %v710_v34, %s4581_s3  ;;  %v4922_v34 = vld [vmem:[#allocation10 + $0x18] sm:$0xff] }
 0xb58   :  { %v712_v35 = vpop.permute.xlu1 %711 }
 0xb59   :  { %3847 = vmatmul.mubr.msk.f32.vlgmr.msra.gmra.mxu1 %vm290_vm3, %v712_v35  ;;  %v4930_v35 = vld [vmem:[#allocation10 + $0x10] sm:$0xff] }
 0xb5a   :  { %3861 = vmatpush3.msra.mxu1 %v4763_v5  ;;  %3868 = vmatprep.mubr.msk.f32.mxu1 %vm4579_vm0, %v4578_v1 }
 0xb5b   :  { %3862 = vmatprep.subr.mxu1 %v4578_v1 }
 0xb5c   :  { %3863 = vmatpush3.msra.mxu1 %v4770_v6 }
 0xb5d   :  { %3864 = vmatprep.subr.mxu1 %v4578_v1 }
 0xb5e   :  { %3865 = vmatpush3.msra.mxu1 %v4776_v7 }
 0xb5f   :  { %3866 = vmatprep.subr.mxu1 %v4578_v1 }
 0xb60   :  { %3867 = vmatpush3.msra.mxu1 %v4782_v8 }
 0xb61   :  { %3882 = vmatprep.subr.msk.mxu1 %vm207_vm1, %v1133_v32 }
 0xc19   :  { %v781_v36 = vpop.f32.mrf.mxu1 }
 0xc1a   :  { %v785_v37 = vadd.f32 %v781_v36, %v4804_v11 }
 0xc1b   :  { %v3848_v38 = vpop.f32.mrf.mxu1 }
 0xc1c   :  { %4197 = vtanh.f32 %v785_v37  ;;  %v3560_v40 = vmul.f32 -1.442695, %v785_v37  ;;  %v4936_v38 = vld [vmem:[#allocation10 + $0x8] sm:$0xff] }
 0xc1e   :  { %4199 = vpow2.f32 %v3560_v40 }
 0xc29   :  { %v4198_v39 = vpop.eup %4197 }
 0xc2a   :  { %798 = vrot.lane.b32.xlu0 %v4198_v39, %s4580_s4  ;;  %v4941_v39 = vld [vmem:[#allocation10] sm:$0xff] }
 0xc2b   :  { %v4200_v41 = vpop.eup %4199 }
 0xc2c   :  { %v789_v42 = vadd.f32 1.0, %v4200_v41 }
 0xc2e   :  { %4201 = vrcp.f32 %v789_v42 }
 0xc3b   :  { %v4202_v43 = vpop.eup %4201 }
 0xc3c   :  { %v796_v47 = vmul.f32 %v4202_v43, %v794_v46 }
 0xc9c   :  { %v799_v44 = vpop.permute.xlu0 %798 }
 0xc9d   :  { %v801_v45 = vmul.f32 %v4202_v43, %v799_v44 }
 0xc9f   :  { %803 = vrot.lane.b32.xlu1 %v801_v45, %s4581_s3 }
 0xd11   :  { %v804_v49 = vpop.permute.xlu1 %803 }
 0xd12   :  { %v806_v50 = vadd.f32 %v804_v49, %v796_v47 }
 0xd14   :  { %4203 = vtanh.f32 %v806_v50 }
 0xd21   :  { %v4204_v51 = vpop.eup %4203 }
 0xd22   :  { %809 = vrot.lane.b32.xlu0 %v4204_v51, %s4580_s4 }
 0xd94   :  { %v810_v52 = vpop.permute.xlu0 %809 }
 0xd95   :  { %v812_v53 = vmul.f32 %v4202_v43, %v810_v52  ;;  %v4971_v43 = vld [vmem:[#allocation11] ss:$0 sm:$0xff] }
 0xd97   :  { %814 = vrot.lane.b32.xlu1 %v812_v53, %s4581_s3 }
 0xe09   :  { %v4888_v54 = vpop.permute.xlu1 %814 }
 0xe0a   :  { %3858 = vmatmul.mubr.msk.f32.vlgmr.msra.gmra.mxu0 %vm290_vm3, %v4888_v54 }
 0xe0b   :  { %3872 = vmatpush3.msra.mxu0 %v4763_v5  ;;  %3879 = vmatprep.mubr.msk.f32.mxu0 %vm4579_vm0, %v4578_v1 }
 0xe0c   :  { %3873 = vmatprep.subr.mxu0 %v4578_v1 }
 0xe0d   :  { %3874 = vmatpush3.msra.mxu0 %v4770_v6 }
 0xe0e   :  { %3875 = vmatprep.subr.mxu0 %v4578_v1 }
 0xe0f   :  { %3876 = vmatpush3.msra.mxu0 %v4776_v7 }
 0xe10   :  { %3877 = vmatprep.subr.mxu0 %v4578_v1 }
 0xe11   :  { %3878 = vmatpush3.msra.mxu0 %v4782_v8  ;;  %v900_v8 = vrot.slane %v806_v50, 6 }
 0xe12   :  { %3887 = vmatprep.subr.mxu0 %v4578_v1 }
 0xeca   :  { %v884_v55 = vpop.f32.mrf.mxu0 }
 0xecb   :  { %v889_v56 = vrot.slane %v884_v55, 6 }
 0xecc   :  { %v3859_v5 = vpop.f32.mrf.mxu0 }
 0xecd   :  { %v891_v57 = vadd.f32 %v889_v56, %v4804_v11 }
 0xecf   :  { %4205 = vtanh.f32 %v891_v57  ;;  %v3562_v6 = vmul.f32 -1.442695, %v891_v57 }
 0xed1   :  { %4207 = vpow2.f32 %v3562_v6 }
 0xedc   :  { %v4206_v58 = vpop.eup %4205 }
 0xedd   :  { %904 = vrot.lane.b32.xlu0 %v4206_v58, %s4580_s4 }
 0xede   :  { %v4208_v59 = vpop.eup %4207 }
 0xedf   :  { %v895_v60 = vadd.f32 1.0, %v4208_v59 }
 0xee1   :  { %4209 = vrcp.f32 %v895_v60 }
 0xeee   :  { %v4210_v7 = vpop.eup %4209 }
 0xeef   :  { %v902_v63 = vmul.f32 %v4210_v7, %v900_v8 }
 0xf4f   :  { %v905_v61 = vpop.permute.xlu0 %904 }
 0xf50   :  { %v907_v62 = vmul.f32 %v4210_v7, %v905_v61 }
 0xf52   :  { %909 = vrot.lane.b32.xlu1 %v907_v62, %s4581_s3 }
 0xfc4   :  { %v910_v0 = vpop.permute.xlu1 %909 }
 0xfc5   :  { %v912_v2 = vadd.f32 %v910_v0, %v902_v63 }
 0xfc7   :  { %4211 = vtanh.f32 %v912_v2 }
 0xfd4   :  { %v4212_v9 = vpop.eup %4211 }
 0xfd5   :  { %915 = vrot.lane.b32.xlu0 %v4212_v9, %s4580_s4 }
0x1047   :  { %v916_v10 = vpop.permute.xlu0 %915 }
0x1048   :  { %v4906_v14 = vmul.f32 %v4210_v7, %v916_v10 }
0x104a   :  { %v920_v15 = vrot.slane %v4906_v14, 2 }
0x104c   :  { %921 = vrot.lane.b32.xlu1 %v920_v15, %s4581_s3 }
0x10be   :  { %v922_v16 = vpop.permute.xlu1 %921 }
0x10bf   :  { %3869 = vmatmul.mubr.msk.f32.vlgmr.msra.gmra.mxu1 %vm290_vm3, %v922_v16 }
0x10c0   :  { %3884 = vmatprep.mubr.msk.f32.mxu1 %vm200_vm2, %v4753_v3  ;;  %v1007_v3 = vrot.slane %v912_v2, 6  ;;  %3883 = vmatpush3.msk.msra.mxu1 %vm207_vm1, %v1133_v32 }
0x10c1   :  { %3898 = vmatprep.subr.mxu1 %v4578_v1 }
0x10c3   :  { %3885 = vmatmul.mubr.msk.f32.vlgmr.msra.gmra.mxu1 %vm200_vm2, %v4758_v4 }
0x10c4   :  { %3899 = vmatpush3.msra.mxu1 %v4922_v34  ;;  %3906 = vmatprep.mubr.msk.f32.mxu1 %vm4579_vm0, %v4578_v1 }
0x10c5   :  { %3900 = vmatprep.subr.mxu1 %v4578_v1 }
0x10c6   :  { %3901 = vmatpush3.msra.mxu1 %v4930_v35 }
0x10c7   :  { %3902 = vmatprep.subr.mxu1 %v4578_v1 }
0x10c8   :  { %3903 = vmatpush3.msra.mxu1 %v4936_v38 }
0x10c9   :  { %3904 = vmatprep.subr.mxu1 %v4578_v1 }
0x10ca   :  { %3905 = vmatpush3.msra.mxu1 %v4941_v39 }
0x10cb   :  { %3920 = vmatprep.subr.mxu1 %v4578_v1 }
0x117f   :  { %v991_v17 = vpop.f32.mrf.mxu1 }
0x1180   :  { %v996_v18 = vrot.slane %v991_v17, 4 }
0x1181   :  { %v3870_v19 = vpop.f32.mrf.mxu1 }
0x1182   :  { %v998_v20 = vadd.f32 %v996_v18, %v4804_v11 }
0x1183   :  { %v3886_v44 = vpop.f32.mrf.mxu1 }
0x1184   :  { %4213 = vtanh.f32 %v998_v20  ;;  %v3564_v22 = vmul.f32 -1.442695, %v998_v20  ;;  %v4974_v45 = vadd.f32 %v3886_v44, %v4971_v43 }
0x1185   :  { %v4995_v63 = vpop.f32.mrf.mxu1 }
0x1186   :  { %4215 = vpow2.f32 %v3564_v22 }
0x1191   :  { %v4214_v21 = vpop.eup %4213 }
0x1192   :  { %1011 = vrot.lane.b32.xlu0 %v4214_v21, %s4580_s4 }
0x1193   :  { %v4216_v23 = vpop.eup %4215 }
0x1194   :  { %v1002_v24 = vadd.f32 1.0, %v4216_v23 }
0x1196   :  { %4217 = vrcp.f32 %v1002_v24 }
0x11a3   :  { %v4218_v25 = vpop.eup %4217 }
0x11a4   :  { %v1009_v28 = vmul.f32 %v4218_v25, %v1007_v3 }
0x1204   :  { %v1012_v26 = vpop.permute.xlu0 %1011 }
0x1205   :  { %v1014_v27 = vmul.f32 %v4218_v25, %v1012_v26 }
0x1207   :  { %1016 = vrot.lane.b32.xlu1 %v1014_v27, %s4581_s3 }
0x1279   :  { %v1017_v29 = vpop.permute.xlu1 %1016 }
0x127a   :  { %v4916_v31 = vadd.f32 %v1017_v29, %v1009_v28 }
0x127c   :  { %4219 = vtanh.f32 %v4916_v31 }
0x1289   :  { %v4220_v13 = vpop.eup %4219 }
0x128a   :  { %1022 = vrot.lane.b32.xlu0 %v4220_v13, %s4580_s4 }
0x12fc   :  { %v1023_v36 = vpop.permute.xlu0 %1022 }
0x12fd   :  { %v4934_v37 = vmul.f32 %v4218_v25, %v1023_v36 }
0x12ff   :  { %v1027_v4 = vrot.slane %v4934_v37, 4 }
0x1301   :  { %1028 = vrot.lane.b32.xlu1 %v1027_v4, %s4581_s3 }
0x1373   :  { %v1029_v40 = vpop.permute.xlu1 %1028 }
0x1374   :  { %3880 = vmatmul.mubr.msk.f32.vlgmr.msra.gmra.mxu0 %vm290_vm3, %v1029_v40 }
0x1375   :  { %3888 = vmatpush3.msra.mxu0 %v4922_v34  ;;  %3895 = vmatprep.mubr.msk.f32.mxu0 %vm4579_vm0, %v4578_v1 }
0x1376   :  { %3889 = vmatprep.subr.mxu0 %v4578_v1 }
0x1377   :  { %3890 = vmatpush3.msra.mxu0 %v4930_v35 }
0x1378   :  { %3891 = vmatprep.subr.mxu0 %v4578_v1 }
0x1379   :  { %3892 = vmatpush3.msra.mxu0 %v4936_v38 }
0x137a   :  { %3893 = vmatprep.subr.mxu0 %v4578_v1 }
0x137b   :  { %3894 = vmatpush3.msra.mxu0 %v4941_v39 }
0x137c   :  { %3896 = vmatmul.mubr.f32.vlgmr.msra.gmra.mxu0 %v4578_v1  ;;  %3909 = vmatprep.subr.mxu0 %v4578_v1 }
0x137d   :  { %3910 = vmatpush3.msra.mxu0 %v4922_v34  ;;  %3917 = vmatprep.mubr.msk.f32.mxu0 %vm4579_vm0, %v4578_v1 }
0x137e   :  { %3911 = vmatprep.subr.mxu0 %v4578_v1 }
0x137f   :  { %3912 = vmatpush3.msra.mxu0 %v4930_v35 }
0x1380   :  { %3913 = vmatprep.subr.mxu0 %v4578_v1 }
0x1381   :  { %3914 = vmatpush3.msra.mxu0 %v4936_v38 }
0x1382   :  { %3915 = vmatprep.subr.mxu0 %v4578_v1 }
0x1383   :  { %3916 = vmatpush3.msra.mxu0 %v4941_v39 }
0x1384   :  { %3931 = vmatprep.subr.mxu0 %v4578_v1 }
0x1434   :  { %v4969_v41 = vpop.f32.mrf.mxu0 }
0x1436   :  { %v3881_v42 = vpop.f32.mrf.mxu0 }
0x143c   :  { %v1289_v46 = vpop.f32.mrf.mxu0 }
0x143d   :  { %v1294_v47 = vrot.slane %v1289_v46, 2 }
0x143e   :  { %v3897_v49 = vpop.f32.mrf.mxu0 }
0x143f   :  { %v1296_v50 = vadd.f32 %v1294_v47, %v4974_v45 }
0x1441   :  { %4221 = vtanh.f32 %v1296_v50  ;;  %v3571_v52 = vmul.f32 -1.442695, %v1296_v50 }
0x1443   :  { %4223 = vpow2.f32 %v3571_v52 }
0x144e   :  { %v4222_v51 = vpop.eup %4221 }
0x144f   :  { %1306 = vrot.lane.b32.xlu0 %v4222_v51, %s4580_s4 }
0x1450   :  { %v4224_v53 = vpop.eup %4223 }
0x1451   :  { %v1300_v55 = vadd.f32 1.0, %v4224_v53 }
0x1453   :  { %4225 = vrcp.f32 %v1300_v55 }
0x1460   :  { %v4226_v56 = vpop.eup %4225 }
0x1461   :  { %v1304_v58 = vmul.f32 0.0, %v4226_v56 }
0x14c1   :  { %v1307_v5 = vpop.permute.xlu0 %1306 }
0x14c2   :  { %v1309_v57 = vmul.f32 %v4226_v56, %v1307_v5 }
0x14c4   :  { %1311 = vrot.lane.b32.xlu1 %v1309_v57, %s4581_s3 }
0x1536   :  { %v1312_v6 = vpop.permute.xlu1 %1311 }
0x1537   :  { %v1314_v59 = vadd.f32 %v1312_v6, %v1304_v58 }
0x1539   :  { %4227 = vtanh.f32 %v1314_v59  ;;  %v1409_v22 = vrot.slane %v1314_v59, 2 }
0x1546   :  { %v4228_v60 = vpop.eup %4227 }
0x1547   :  { %1317 = vrot.lane.b32.xlu0 %v4228_v60, %s4580_s4 }
0x15b9   :  { %v1318_v7 = vpop.permute.xlu0 %1317 }
0x15ba   :  { %v4980_v61 = vmul.f32 %v4226_v56, %v1318_v7 }
0x15bc   :  { %v1322_v62 = vrot.slane %v4980_v61, 6 }
0x15be   :  { %1323 = vrot.lane.b32.xlu1 %v1322_v62, %s4581_s3 }
0x1630   :  { %v1324_v8 = vpop.permute.xlu1 %1323 }
0x1631   :  { %3907 = vmatmul.mubr.msk.f32.vlgmr.msra.gmra.mxu1 %vm290_vm3, %v1324_v8 }
0x1632   :  { %3921 = vmatpush3.msra.mxu1 %v4922_v34  ;;  %3928 = vmatprep.mubr.msk.f32.mxu1 %vm4579_vm0, %v4578_v1 }
0x1633   :  { %3922 = vmatprep.subr.mxu1 %v4578_v1 }
0x1634   :  { %3923 = vmatpush3.msra.mxu1 %v4930_v35 }
0x1635   :  { %3924 = vmatprep.subr.mxu1 %v4578_v1 }
0x1636   :  { %3925 = vmatpush3.msra.mxu1 %v4936_v38 }
0x1637   :  { %3926 = vmatprep.subr.mxu1 %v4578_v1 }
0x1638   :  { %3927 = vmatpush3.msra.mxu1 %v4941_v39 }
0x1639   :  { %3942 = vmatprep.subr.mxu1 %v4578_v1 }
0x16f1   :  { %v1393_v0 = vpop.f32.mrf.mxu1 }
0x16f2   :  { %v1398_v2 = vrot.slane %v1393_v0, 4 }
0x16f3   :  { %v3908_v9 = vpop.f32.mrf.mxu1 }
0x16f4   :  { %v1400_v10 = vadd.f32 %v1398_v2, %v4974_v45 }
0x16f6   :  { %4229 = vtanh.f32 %v1400_v10  ;;  %v3573_v16 = vmul.f32 -1.442695, %v1400_v10 }
0x16f8   :  { %4231 = vpow2.f32 %v3573_v16 }
0x1703   :  { %v4230_v15 = vpop.eup %4229 }
0x1704   :  { %1413 = vrot.lane.b32.xlu0 %v4230_v15, %s4580_s4 }
0x1705   :  { %v4232_v17 = vpop.eup %4231 }
0x1706   :  { %v1404_v18 = vadd.f32 1.0, %v4232_v17 }
0x1708   :  { %4233 = vrcp.f32 %v1404_v18 }
0x1715   :  { %v4234_v19 = vpop.eup %4233 }
0x1716   :  { %v1411_v23 = vmul.f32 %v4234_v19, %v1409_v22 }
0x1776   :  { %v1414_v20 = vpop.permute.xlu0 %1413 }
0x1777   :  { %v1416_v21 = vmul.f32 %v4234_v19, %v1414_v20 }
0x1779   :  { %1418 = vrot.lane.b32.xlu1 %v1416_v21, %s4581_s3 }
0x17eb   :  { %v1419_v24 = vpop.permute.xlu1 %1418 }
0x17ec   :  { %v1421_v25 = vadd.f32 %v1419_v24, %v1411_v23  ;;  %v5055_v24 = vadd.f32 %v4971_v43, %v4995_v63 }
0x17ee   :  { %4235 = vtanh.f32 %v1421_v25  ;;  %v1516_v51 = vrot.slane %v1421_v25, 2 }
0x17fb   :  { %v4236_v26 = vpop.eup %4235 }
0x17fc   :  { %1424 = vrot.lane.b32.xlu0 %v4236_v26, %s4580_s4 }
0x186e   :  { %v1425_v27 = vpop.permute.xlu0 %1424 }
0x186f   :  { %v5001_v3 = vmul.f32 %v4234_v19, %v1425_v27 }
0x1871   :  { %v1429_v28 = vrot.slane %v5001_v3, 4 }
0x1873   :  { %1430 = vrot.lane.b32.xlu1 %v1429_v28, %s4581_s3 }
0x18e5   :  { %v1431_v29 = vpop.permute.xlu1 %1430 }
0x18e6   :  { %3918 = vmatmul.mubr.msk.f32.vlgmr.msra.gmra.mxu0 %vm290_vm3, %v1431_v29 }
0x18e7   :  { %3932 = vmatpush3.msra.mxu0 %v4922_v34  ;;  %3939 = vmatprep.mubr.msk.f32.mxu0 %vm4579_vm0, %v4578_v1 }
0x18e8   :  { %3933 = vmatprep.subr.mxu0 %v4578_v1 }
0x18e9   :  { %3934 = vmatpush3.msra.mxu0 %v4930_v35 }
0x18ea   :  { %3935 = vmatprep.subr.mxu0 %v4578_v1 }
0x18eb   :  { %3936 = vmatpush3.msra.mxu0 %v4936_v38 }
0x18ec   :  { %3937 = vmatprep.subr.mxu0 %v4578_v1 }
0x18ed   :  { %3938 = vmatpush3.msra.mxu0 %v4941_v39 }
0x18ee   :  { %3953 = vmatprep.subr.mxu0 %v4578_v1 }
0x19a6   :  { %v1500_v13 = vpop.f32.mrf.mxu0 }
0x19a7   :  { %v1505_v32 = vrot.slane %v1500_v13, 6 }
0x19a8   :  { %v3919_v36 = vpop.f32.mrf.mxu0 }
0x19a9   :  { %v1507_v4 = vadd.f32 %v1505_v32, %v4974_v45 }
0x19ab   :  { %4237 = vtanh.f32 %v1507_v4  ;;  %v3575_v42 = vmul.f32 -1.442695, %v1507_v4 }
0x19ad   :  { %4239 = vpow2.f32 %v3575_v42 }
0x19b8   :  { %v4238_v40 = vpop.eup %4237 }
0x19b9   :  { %1520 = vrot.lane.b32.xlu0 %v4238_v40, %s4580_s4 }
0x19ba   :  { %v4240_v44 = vpop.eup %4239 }
0x19bb   :  { %v1511_v46 = vadd.f32 1.0, %v4240_v44 }
0x19bd   :  { %4241 = vrcp.f32 %v1511_v46 }
0x19ca   :  { %v4242_v47 = vpop.eup %4241 }
0x19cb   :  { %v1518_v52 = vmul.f32 %v4242_v47, %v1516_v51 }
0x1a2b   :  { %v1521_v49 = vpop.permute.xlu0 %1520 }
0x1a2c   :  { %v1523_v50 = vmul.f32 %v4242_v47, %v1521_v49 }
0x1a2e   :  { %1525 = vrot.lane.b32.xlu1 %v1523_v50, %s4581_s3 }
0x1aa0   :  { %v1526_v53 = vpop.permute.xlu1 %1525 }
0x1aa1   :  { %v1528_v55 = vadd.f32 %v1526_v53, %v1518_v52 }
0x1aa3   :  { %4243 = vtanh.f32 %v1528_v55  ;;  %v1620_v16 = vrot.slane %v1528_v55, 2 }
0x1ab0   :  { %v4244_v56 = vpop.eup %4243 }
0x1ab1   :  { %1531 = vrot.lane.b32.xlu0 %v4244_v56, %s4580_s4 }
0x1b23   :  { %v1532_v5 = vpop.permute.xlu0 %1531 }
0x1b24   :  { %v5020_v57 = vmul.f32 %v4242_v47, %v1532_v5 }
0x1b26   :  { %v1536_v58 = vrot.slane %v5020_v57, 2 }
0x1b28   :  { %1537 = vrot.lane.b32.xlu1 %v1536_v58, %s4581_s3 }
0x1b9a   :  { %v1538_v6 = vpop.permute.xlu1 %1537 }
0x1b9b   :  { %3929 = vmatmul.mubr.msk.f32.vlgmr.msra.gmra.mxu1 %vm290_vm3, %v1538_v6 }
0x1b9c   :  { %3943 = vmatpush3.msra.mxu1 %v4922_v34  ;;  %3950 = vmatprep.mubr.msk.f32.mxu1 %vm4579_vm0, %v4578_v1 }
0x1b9d   :  { %3944 = vmatprep.subr.mxu1 %v4578_v1 }
0x1b9e   :  { %3945 = vmatpush3.msra.mxu1 %v4930_v35 }
0x1b9f   :  { %3946 = vmatprep.subr.mxu1 %v4578_v1 }
0x1ba0   :  { %3947 = vmatpush3.msra.mxu1 %v4936_v38 }
0x1ba1   :  { %3948 = vmatprep.subr.mxu1 %v4578_v1 }
0x1ba2   :  { %3949 = vmatpush3.msra.mxu1 %v4941_v39 }
0x1ba3   :  { %3964 = vmatprep.subr.mxu1 %v4578_v1 }
0x1c5b   :  { %v1607_v59 = vpop.f32.mrf.mxu1 }
0x1c5c   :  { %v1611_v60 = vadd.f32 %v1607_v59, %v4974_v45 }
0x1c5d   :  { %v3930_v7 = vpop.f32.mrf.mxu1 }
0x1c5e   :  { %4245 = vtanh.f32 %v1611_v60  ;;  %v3577_v8 = vmul.f32 -1.442695, %v1611_v60 }
0x1c60   :  { %4247 = vpow2.f32 %v3577_v8 }
0x1c6b   :  { %v4246_v62 = vpop.eup %4245 }
0x1c6c   :  { %1624 = vrot.lane.b32.xlu0 %v4246_v62, %s4580_s4 }
0x1c6d   :  { %v4248_v0 = vpop.eup %4247 }
0x1c6e   :  { %v1615_v2 = vadd.f32 1.0, %v4248_v0 }
0x1c70   :  { %4249 = vrcp.f32 %v1615_v2 }
0x1c7d   :  { %v4250_v9 = vpop.eup %4249 }
0x1c7e   :  { %v1622_v17 = vmul.f32 %v4250_v9, %v1620_v16 }
0x1cde   :  { %v1625_v10 = vpop.permute.xlu0 %1624 }
0x1cdf   :  { %v1627_v15 = vmul.f32 %v4250_v9, %v1625_v10 }
0x1ce1   :  { %1629 = vrot.lane.b32.xlu1 %v1627_v15, %s4581_s3 }
0x1d53   :  { %v1630_v18 = vpop.permute.xlu1 %1629 }
0x1d54   :  { %v1632_v19 = vadd.f32 %v1630_v18, %v1622_v17 }
0x1d56   :  { %4251 = vtanh.f32 %v1632_v19  ;;  %v1726_v43 = vrot.slane %v1632_v19, 2 }
0x1d63   :  { %v4252_v45 = vpop.eup %4251 }
0x1d64   :  { %1635 = vrot.lane.b32.xlu0 %v4252_v45, %s4580_s4 }
0x1dd6   :  { %v1636_v20 = vpop.permute.xlu0 %1635 }
0x1dd7   :  { %v5039_v21 = vmul.f32 %v4250_v9, %v1636_v20 }
0x1dd9   :  { %1640 = vrot.lane.b32.xlu1 %v5039_v21, %s4581_s3 }
0x1e4b   :  { %v1641_v22 = vpop.permute.xlu1 %1640 }
0x1e4c   :  { %3940 = vmatmul.mubr.msk.f32.vlgmr.msra.gmra.mxu0 %vm290_vm3, %v1641_v22 }
0x1e4d   :  { %3954 = vmatpush3.msra.mxu0 %v4922_v34  ;;  %3961 = vmatprep.mubr.msk.f32.mxu0 %vm4579_vm0, %v4578_v1 }
0x1e4e   :  { %3955 = vmatprep.subr.mxu0 %v4578_v1 }
0x1e4f   :  { %3956 = vmatpush3.msra.mxu0 %v4930_v35 }
0x1e50   :  { %3957 = vmatprep.subr.mxu0 %v4578_v1 }
0x1e51   :  { %3958 = vmatpush3.msra.mxu0 %v4936_v38 }
0x1e52   :  { %3959 = vmatprep.subr.mxu0 %v4578_v1 }
0x1e53   :  { %3960 = vmatpush3.msra.mxu0 %v4941_v39 }
0x1f0c   :  { %v1710_v23 = vpop.f32.mrf.mxu0 }
0x1f0d   :  { %v1715_v25 = vrot.slane %v1710_v23, 2 }
0x1f0e   :  { %v3941_v26 = vpop.f32.mrf.mxu0 }
0x1f0f   :  { %v1717_v27 = vadd.f32 %v1715_v25, %v5055_v24 }
0x1f11   :  { %4253 = vtanh.f32 %v1717_v27  ;;  %v3579_v29 = vmul.f32 -1.442695, %v1717_v27 }
0x1f13   :  { %4255 = vpow2.f32 %v3579_v29 }
0x1f1e   :  { %v4254_v28 = vpop.eup %4253 }
0x1f1f   :  { %1730 = vrot.lane.b32.xlu0 %v4254_v28, %s4580_s4 }
0x1f20   :  { %v4256_v13 = vpop.eup %4255 }
0x1f21   :  { %v1721_v32 = vadd.f32 1.0, %v4256_v13 }
0x1f23   :  { %4257 = vrcp.f32 %v1721_v32 }
0x1f30   :  { %v4258_v36 = vpop.eup %4257 }
0x1f31   :  { %v1728_v63 = vmul.f32 %v4258_v36, %v1726_v43 }
0x1f91   :  { %v1731_v4 = vpop.permute.xlu0 %1730 }
0x1f92   :  { %v1733_v40 = vmul.f32 %v4258_v36, %v1731_v4 }
0x1f94   :  { %1735 = vrot.lane.b32.xlu1 %v1733_v40, %s4581_s3 }
0x2006   :  { %v1736_v42 = vpop.permute.xlu1 %1735 }
0x2007   :  { %v1738_v44 = vadd.f32 %v1736_v42, %v1728_v63 }
0x2009   :  { %4259 = vtanh.f32 %v1738_v44 }
0x2016   :  { %v4260_v46 = vpop.eup %4259 }
0x2017   :  { %1741 = vrot.lane.b32.xlu0 %v4260_v46, %s4580_s4 }
0x2089   :  { %v1742_v47 = vpop.permute.xlu0 %1741 }
0x208a   :  { %v5061_v49 = vmul.f32 %v4258_v36, %v1742_v47  ;;  %v1103_v36 = vrot.slane %v4969_v41, 2 }
0x208c   :  { %v1746_v50 = vrot.slane %v5061_v49, 6  ;;  %v1105_v4 = vadd.f32 %v1103_v36, %v4804_v11 }
0x208e   :  { %1747 = vrot.lane.b32.xlu1 %v1746_v50, %s4581_s3 }
0x2100   :  { %v1748_v51 = vpop.permute.xlu1 %1747 }
0x2101   :  { %3951 = vmatmul.mubr.msk.f32.vlgmr.msra.gmra.mxu1 %vm290_vm3, %v1748_v51 }
0x2102   :  { %3965 = vmatpush3.msra.mxu1 %v4922_v34  ;;  %3972 = vmatprep.mubr.msk.f32.mxu1 %vm4579_vm0, %v4578_v1 }
0x2103   :  { %3966 = vmatprep.subr.mxu1 %v4578_v1 }
0x2104   :  { %3967 = vmatpush3.msra.mxu1 %v4930_v35 }
0x2105   :  { %3968 = vmatprep.subr.mxu1 %v4578_v1 }
0x2106   :  { %3969 = vmatpush3.msra.mxu1 %v4936_v38 }
0x2107   :  { %3970 = vmatprep.subr.mxu1 %v4578_v1 }
0x2108   :  { %3971 = vmatpush3.msra.mxu1 %v4941_v39  ;;  %v1833_v39 = vrot.slane %v1738_v44, 2  ;;  %v3566_v44 = vmul.f32 -1.442695, %v1105_v4 }
0x2109   :  { %3994 = vmatprep.subr.mxu1 %v4578_v1 }
0x21c1   :  { %v1817_v52 = vpop.f32.mrf.mxu1 }
0x21c2   :  { %v1822_v53 = vrot.slane %v1817_v52, 4  ;;  %v1114_v52 = vrot.slane %v4916_v31, 6 }
0x21c3   :  { %v3952_v34 = vpop.f32.mrf.mxu1 }
0x21c4   :  { %v1824_v55 = vadd.f32 %v1822_v53, %v5055_v24 }
0x21c6   :  { %4261 = vtanh.f32 %v1824_v55  ;;  %v3581_v35 = vmul.f32 -1.442695, %v1824_v55 }
0x21c8   :  { %4263 = vpow2.f32 %v3581_v35 }
0x21d3   :  { %v4262_v56 = vpop.eup %4261 }
0x21d4   :  { %1837 = vrot.lane.b32.xlu0 %v4262_v56, %s4580_s4 }
0x21d5   :  { %v4264_v5 = vpop.eup %4263 }
0x21d6   :  { %v1828_v58 = vadd.f32 1.0, %v4264_v5 }
0x21d8   :  { %4265 = vrcp.f32 %v1828_v58 }
0x21e5   :  { %v4266_v38 = vpop.eup %4265 }
0x21e6   :  { %v1835_v60 = vmul.f32 %v4266_v38, %v1833_v39  ;;  %v2132_v39 = vld [vmem:[%s5474_s24 + $0x38] sm:$0xff] }
0x21e7   :  { %3975 = vmatprep.subr.mxu0 %v2132_v39 }
0x2246   :  { %v1838_v6 = vpop.permute.xlu0 %1837 }
0x2247   :  { %v1840_v59 = vmul.f32 %v4266_v38, %v1838_v6 }
0x2249   :  { %1842 = vrot.lane.b32.xlu1 %v1840_v59, %s4581_s3 }
0x22bb   :  { %v1843_v7 = vpop.permute.xlu1 %1842 }
0x22bc   :  { %v1845_v62 = vadd.f32 %v1843_v7, %v1835_v60  ;;  %v2131_v60 = vld [vmem:[%s5474_s24 + $0x30] sm:$0xff]  ;;  %v2130_v7 = vld [vmem:[%s5474_s24 + $0x28] sm:$0xff] }
0x22be   :  { %4267 = vtanh.f32 %v1845_v62  ;;  %v1940_v27 = vrot.slane %v1845_v62, 2  ;;  %v2129_v62 = vld [vmem:[%s5474_s24 + $0x20] sm:$0xff] }
0x22cb   :  { %v4268_v8 = vpop.eup %4267 }
0x22cc   :  { %1848 = vrot.lane.b32.xlu0 %v4268_v8, %s4580_s4  ;;  %v2128_v8 = vld [vmem:[%s5474_s24 + $0x18] sm:$0xff] }
0x233e   :  { %v1849_v0 = vpop.permute.xlu0 %1848 }
0x233f   :  { %v5080_v2 = vmul.f32 %v4266_v38, %v1849_v0  ;;  %v5148_v0 = vld [vmem:[#allocation13 + $0x18] sm:$0xff] }
0x2341   :  { %v1853_v9 = vrot.slane %v5080_v2, 4 }
0x2343   :  { %1854 = vrot.lane.b32.xlu1 %v1853_v9, %s4581_s3  ;;  %v5162_v9 = vld [vmem:[#allocation13 + $0x8] sm:$0xff] }
0x23b5   :  { %v1855_v10 = vpop.permute.xlu1 %1854 }
0x23b6   :  { %3962 = vmatmul.mubr.msk.f32.vlgmr.msra.gmra.mxu0 %vm290_vm3, %v1855_v10  ;;  %v5166_v10 = vld [vmem:[#allocation13] sm:$0xff] }
0x23b7   :  { %3976 = vmatpush3.msra.mxu0 %v2132_v39 }
0x23b8   :  { %3977 = vmatprep.subr.mxu0 %v2131_v60 }
0x23b9   :  { %3978 = vmatpush3.msra.mxu0 %v2131_v60 }
0x23ba   :  { %3979 = vmatprep.subr.mxu0 %v2130_v7 }
0x23bb   :  { %3980 = vmatpush3.msra.mxu0 %v2130_v7 }
0x23bc   :  { %3981 = vmatprep.subr.mxu0 %v2129_v62 }
0x23bd   :  { %3982 = vmatpush3.msra.mxu0 %v2129_v62 }
0x23be   :  { %3983 = vmatprep.subr.mxu0 %v2128_v8 }
0x23bf   :  { %3984 = vmatpush3.msra.mxu0 %v2128_v8 }
0x2476   :  { %v1924_v15 = vpop.f32.mrf.mxu0 }
0x2477   :  { %v1929_v16 = vrot.slane %v1924_v15, 6 }
0x2478   :  { %v3963_v17 = vpop.f32.mrf.mxu0 }
0x2479   :  { %v1931_v18 = vadd.f32 %v1929_v16, %v5055_v24 }
0x247b   :  { %4269 = vtanh.f32 %v1931_v18  ;;  %v3583_v45 = vmul.f32 -1.442695, %v1931_v18 }
0x247d   :  { %4271 = vpow2.f32 %v3583_v45 }
0x2488   :  { %v4270_v19 = vpop.eup %4269 }
0x2489   :  { %1944 = vrot.lane.b32.xlu0 %v4270_v19, %s4580_s4 }
0x248a   :  { %v4272_v20 = vpop.eup %4271 }
0x248b   :  { %v1935_v22 = vadd.f32 1.0, %v4272_v20 }
0x248d   :  { %4273 = vrcp.f32 %v1935_v22 }
0x249a   :  { %v4274_v23 = vpop.eup %4273 }
0x249b   :  { %v1942_v28 = vmul.f32 %v4274_v23, %v1940_v27 }
0x24fb   :  { %v1945_v25 = vpop.permute.xlu0 %1944 }
0x24fc   :  { %v1947_v26 = vmul.f32 %v4274_v23, %v1945_v25 }
0x24fe   :  { %1949 = vrot.lane.b32.xlu1 %v1947_v26, %s4581_s3 }
0x2570   :  { %v1950_v29 = vpop.permute.xlu1 %1949 }
0x2571   :  { %v1952_v13 = vadd.f32 %v1950_v29, %v1942_v28 }
0x2573   :  { %4275 = vtanh.f32 %v1952_v13 }
0x2574   :  { %4277 = vtanh.f32 %v1105_v4 }
0x2575   :  { %4279 = vpow2.f32 %v3566_v44 }
0x2580   :  { %v4276_v32 = vpop.eup %4275 }
0x2581   :  { %1955 = vrot.lane.b32.xlu0 %v4276_v32, %s4580_s4  ;;  %v4278_v42 = vpop.eup %4277 }
0x2582   :  { %v4280_v46 = vpop.eup %4279 }
0x2583   :  { %v1109_v47 = vadd.f32 1.0, %v4280_v46 }
0x2585   :  { %4281 = vrcp.f32 %v1109_v47 }
0x2592   :  { %v5096_v11 = vpop.eup %4281 }
0x2593   :  { %v1116_v53 = vmul.f32 %v5096_v11, %v1114_v52 }
0x25f3   :  { %v1956_v40 = vpop.permute.xlu0 %1955 }
0x25f4   :  { %v1958_v43 = vmul.f32 %v4274_v23, %v1956_v40 }
0x25f6   :  { %v1960_v63 = vrot.slane %v1958_v43, 2 }
0x25f8   :  { %1961 = vrot.lane.b32.xlu1 %v1960_v63, %s4581_s3 }
0x25fc   :  { %1118 = vrot.lane.b32.xlu1 %v4278_v42, %s4580_s4 }
0x266a   :  { %v1962_v50 = vpop.permute.xlu1 %1961 }
0x266b   :  { %3973 = vmatmul.mubr.msk.f32.vlgmr.msra.gmra.mxu1 %vm290_vm3, %v1962_v50 }
0x266c   :  { %4002 = vmatprep.mubr.msk.f32.mxu1 %vm4579_vm0, %v4578_v1  ;;  %3995 = vmatpush3.msra.mxu1 %v5148_v0 }
0x266d   :  { %3996 = vmatprep.subr.mxu1 %v4578_v1 }
0x266e   :  { %v1119_v41 = vpop.permute.xlu1 %1118 }
0x266f   :  { %v1121_v51 = vmul.f32 %v5096_v11, %v1119_v41 }
0x2671   :  { %1123 = vrot.lane.b32.xlu1 %v1121_v51, %s4581_s3 }
0x26e3   :  { %v1124_v34 = vpop.permute.xlu1 %1123 }
0x26e4   :  { %v1126_v55 = vadd.f32 %v1124_v34, %v1116_v53 }
0x26e6   :  { %4283 = vtanh.f32 %v1126_v55  ;;  %v3586_v55 = vld [vmem:[%s5442_s9] ss:$0 sm:$0xff] }
0x26f3   :  { %v4284_v56 = vpop.eup %4283 }
0x26f4   :  { %1129 = vrot.lane.b32.xlu1 %v4284_v56, %s4580_s4 }
0x26f8   :  { %2069 = vrot.lane.b32.xlu1 %v4831_v48, %s4581_s3 }
0x26fc   :  { %2076 = vrot.lane.b32.xlu1 %v4850_v12, %s4581_s3 }
0x2700   :  { %2091 = vrot.lane.b32.xlu1 %v5039_v21, %s4580_s4 }
0x2704   :  { %2098 = vrot.lane.b32.xlu1 %v5020_v57, %s4580_s4 }
0x2708   :  { %2086 = vrot.lane.b32.xlu1 %v5061_v49, %s4580_s4 }
0x270c   :  { %2105 = vrot.lane.b32.xlu1 %v5001_v3, %s4580_s4  ;;  %v2044_v3 = vrot.slane %v1952_v13, 2 }
0x2710   :  { %2113 = vrot.lane.b32.xlu1 %v4980_v61, %s4580_s4 }
0x272b   :  { %v2031_v31 = vpop.f32.mrf.mxu1 }
0x272c   :  { %v2035_v48 = vadd.f32 %v2031_v31, %v5055_v24 }
0x272d   :  { %v3974_v35 = vpop.f32.mrf.mxu1 }
0x272e   :  { %4285 = vtanh.f32 %v2035_v48  ;;  %v3585_v21 = vmul.f32 -1.442695, %v2035_v48 }
0x2730   :  { %4287 = vpow2.f32 %v3585_v21 }
0x273b   :  { %v4286_v12 = vpop.eup %4285 }
0x273c   :  { %2048 = vrot.lane.b32.xlu0 %v4286_v12, %s4580_s4 }
0x273d   :  { %v4288_v57 = vpop.eup %4287 }
0x273e   :  { %v2039_v5 = vadd.f32 1.0, %v4288_v57 }
0x2740   :  { %4289 = vrcp.f32 %v2039_v5 }
0x274d   :  { %v4290_v49 = vpop.eup %4289 }
0x274e   :  { %v2046_v61 = vmul.f32 %v4290_v49, %v2044_v3 }
0x2766   :  { %v1130_v17 = vpop.permute.xlu1 %1129 }
0x2767   :  { %v1132_v18 = vmul.f32 %v5096_v11, %v1130_v17 }
0x276a   :  { %v2070_v19 = vpop.permute.xlu1 %2069 }
0x276e   :  { %v2077_v20 = vpop.permute.xlu1 %2076 }
0x2772   :  { %v2092_v23 = vpop.permute.xlu1 %2091 }
0x2773   :  { %v2094_v44 = vsel %vm290_vm3, %v4888_v54, %v2092_v23 }
0x2776   :  { %v2099_v26 = vpop.permute.xlu1 %2098 }
0x277a   :  { %v2087_v28 = vpop.permute.xlu1 %2086 }
0x277e   :  { %v2106_v13 = vpop.permute.xlu1 %2105 }
0x2782   :  { %v2114_v50 = vpop.permute.xlu1 %2113 }
0x27ae   :  { %v2049_v58 = vpop.permute.xlu0 %2048 }
0x27af   :  { %v2051_v38 = vmul.f32 %v4290_v49, %v2049_v58 }
0x27b1   :  { %2053 = vrot.lane.b32.xlu0 %v2051_v38, %s4581_s3 }
0x2823   :  { %v2054_v6 = vpop.permute.xlu0 %2053 }
0x2824   :  { %v2056_v59 = vadd.f32 %v2054_v6, %v2046_v61 }
0x2826   :  { %4291 = vtanh.f32 %v2056_v59 }
0x2833   :  { %v4292_v24 = vpop.eup %4291 }
0x2834   :  { %2059 = vrot.lane.b32.xlu0 %v4292_v24, %s4580_s4 }
0x2838   :  { %2072 = vrot.lane.b32.xlu0 %v1958_v43, %s4580_s4 }
0x283c   :  { %2079 = vrot.lane.b32.xlu0 %v5080_v2, %s4580_s4  ;;  %v5154_v2 = vld [vmem:[#allocation13 + $0x10] sm:$0xff] }
0x283d   :  { %3997 = vmatpush3.msra.mxu1 %v5154_v2 }
0x283e   :  { %3998 = vmatprep.subr.mxu1 %v4578_v1 }
0x283f   :  { %3999 = vmatpush3.msra.mxu1 %v5162_v9 }
0x2840   :  { %2095 = vrot.lane.b32.xlu0 %v4906_v14, %s4581_s3  ;;  %v2127_v14 = vld [vmem:[%s5474_s24 + $0x10] sm:$0xff]  ;;  %4000 = vmatprep.subr.mxu1 %v4578_v1 }
0x2841   :  { %3985 = vmatprep.subr.mxu0 %v2127_v14  ;;  %4001 = vmatpush3.msra.mxu1 %v5166_v10 }
0x2842   :  { %3986 = vmatpush3.msra.mxu0 %v2127_v14  ;;  %4003 = vmatmul.mubr.f32.vlgmr.msra.gmra.mxu1 %v4578_v1 }
0x2843   :  { %4005 = vmatprep.subr.mxu1 %v4578_v1  ;;  %4013 = vmatprep.mubr.msk.f32.mxu1 %vm4579_vm0, %v4578_v1 }
0x2844   :  { %2083 = vrot.lane.b32.xlu0 %v4869_v33, %s4581_s3  ;;  %v2126_v33 = vld [vmem:[%s5474_s24 + $0x8] sm:$0xff]  ;;  %4006 = vmatpush3.msra.mxu1 %v5148_v0 }
0x2845   :  { %3987 = vmatprep.subr.mxu0 %v2126_v33  ;;  %4007 = vmatprep.subr.mxu1 %v4578_v1 }
0x2846   :  { %3988 = vmatpush3.msra.mxu0 %v2126_v33  ;;  %4008 = vmatpush3.msra.mxu1 %v5154_v2 }
0x2847   :  { %4009 = vmatprep.subr.mxu1 %v4578_v1 }
0x2848   :  { %2102 = vrot.lane.b32.xlu0 %v4934_v37, %s4581_s3  ;;  %v2125_v37 = vld [vmem:[%s5474_s24] sm:$0xff]  ;;  %4010 = vmatpush3.msra.mxu1 %v5162_v9 }
0x2849   :  { %3989 = vmatprep.subr.mxu0 %v2125_v37  ;;  %4011 = vmatprep.subr.mxu1 %v4578_v1 }
0x284a   :  { %3990 = vmatpush3.msra.mxu0 %v2125_v37  ;;  %4012 = vmatpush3.msra.mxu1 %v5166_v10 }
0x284b   :  { %4016 = vmatprep.subr.mxu0 %v4578_v1  ;;  %4027 = vmatprep.subr.mxu1 %v4578_v1 }
0x28a6   :  { %v2060_v15 = vpop.permute.xlu0 %2059 }
0x28a7   :  { %v2062_v16 = vmul.f32 %v4290_v49, %v2060_v15 }
0x28a9   :  { %2065 = vrot.lane.b32.xlu0 %v2062_v16, %s4580_s4 }
0x28aa   :  { %v2073_v45 = vpop.permute.xlu0 %2072 }
0x28ab   :  { %v2075_v36 = vsel %vm290_vm3, %v2070_v19, %v2073_v45 }
0x28ad   :  { %2110 = vrot.lane.b32.xlu0 %v1132_v18, %s4581_s3 }
0x28ae   :  { %v2080_v22 = vpop.permute.xlu0 %2079 }
0x28af   :  { %v2082_v43 = vsel %vm290_vm3, %v2077_v20, %v2080_v22 }
0x28b2   :  { %v2096_v25 = vpop.permute.xlu0 %2095 }
0x28b3   :  { %v2101_v4 = vsel %vm290_vm3, %v2096_v25, %v2099_v26 }
0x28b4   :  { %v2122_v11 = vsel %vm2117_vm4, %v2094_v44, %v2101_v4 }
0x28b6   :  { %v2084_v27 = vpop.permute.xlu0 %2083 }
0x28b7   :  { %v2089_v46 = vsel %vm290_vm3, %v2084_v27, %v2087_v28 }
0x28ba   :  { %v2103_v29 = vpop.permute.xlu0 %2102 }
0x28bb   :  { %v2108_v63 = vsel %vm290_vm3, %v2103_v29, %v2106_v13 }
0x2902   :  { %v2292_v54 = vpop.f32.mrf.mxu1 }
0x2904   :  { %v4004_v34 = vpop.f32.mrf.mxu1 }
0x291b   :  { %v2066_v32 = vpop.permute.xlu0 %2065 }
0x291c   :  { %v2068_v40 = vsel %vm290_vm3, %v4813_v30, %v2066_v32  ;;  %v2123_v30 = vsel %vm207_vm1, %v2122_v11, %v2108_v63 }
0x291d   :  { %v2118_v42 = vsel %vm2117_vm4, %v2068_v40, %v2075_v36 }
0x291e   :  { %v2119_v47 = vsel %vm207_vm1, %v2118_v42, %v2082_v43 }
0x291f   :  { %v2111_v41 = vpop.permute.xlu0 %2110  ;;  %v5195_v51 = vsel %vm2120_vm5, %v2119_v47, %v2089_v46 }
0x2920   :  { %v2116_v52 = vsel %vm290_vm3, %v2111_v41, %v2114_v50  ;;  %3991 = vmatprep.mubr.msk.f32.mxu0 %vm2140_vm6, %v5195_v51 }
0x2921   :  { %v5201_v53 = vsel %vm2120_vm5, %v2123_v30, %v2116_v52 }
0x2922   :  { %3992 = vmatmul.mubr.msk.f32.vlgmr.msra.gmra.mxu0 %vm2140_vm6, %v5201_v53 }
0x2923   :  { %4017 = vmatpush3.msra.mxu0 %v5148_v0  ;;  %4024 = vmatprep.mubr.msk.f32.mxu0 %vm4579_vm0, %v4578_v1 }
0x2924   :  { %4018 = vmatprep.subr.mxu0 %v4578_v1 }
0x2925   :  { %4019 = vmatpush3.msra.mxu0 %v5154_v2 }
0x2926   :  { %4020 = vmatprep.subr.mxu0 %v4578_v1 }
0x2927   :  { %4021 = vmatpush3.msra.mxu0 %v5162_v9 }
0x2928   :  { %4022 = vmatprep.subr.mxu0 %v4578_v1 }
0x2929   :  { %4023 = vmatpush3.msra.mxu0 %v5166_v10 }
0x292a   :  { %4038 = vmatprep.subr.mxu0 %v4578_v1 }
0x29e2   :  { %v3993_v56 = vpop.f32.mrf.mxu0 }
0x29e3   :  { %v5218_v31 = vadd.f32 %v3993_v56, %v3586_v55 }
0x29e4   :  { %v2213_v48 = vpop.f32.mrf.mxu0 }
0x29e5   :  { %v5220_v35 = vadd.f32 %v3586_v55, %v2213_v48 }
0x29e7   :  { %v2296_v12 = vadd.f32 %v2292_v54, %v5220_v35 }
0x29e9   :  { %4293 = vtanh.f32 %v2296_v12  ;;  %v3589_v57 = vmul.f32 -1.442695, %v2296_v12 }
0x29eb   :  { %4295 = vpow2.f32 %v3589_v57 }
0x29f6   :  { %v4294_v21 = vpop.eup %4293 }
0x29f7   :  { %2306 = vrot.lane.b32.xlu0 %v4294_v21, %s4580_s4 }
0x29f8   :  { %v4296_v5 = vpop.eup %4295 }
0x29f9   :  { %v2300_v49 = vadd.f32 1.0, %v4296_v5 }
0x29fb   :  { %4297 = vrcp.f32 %v2300_v49 }
0x2a08   :  { %v4298_v58 = vpop.eup %4297 }
0x2a09   :  { %v2304_v61 = vmul.f32 0.0, %v4298_v58 }
0x2a69   :  { %v2307_v38 = vpop.permute.xlu0 %2306 }
0x2a6a   :  { %v2309_v3 = vmul.f32 %v4298_v58, %v2307_v38 }
0x2a6c   :  { %2311 = vrot.lane.b32.xlu1 %v2309_v3, %s4581_s3 }
0x2ade   :  { %v2312_v6 = vpop.permute.xlu1 %2311 }
0x2adf   :  { %v2314_v59 = vadd.f32 %v2312_v6, %v2304_v61 }
0x2ae1   :  { %4299 = vtanh.f32 %v2314_v59  ;;  %v2408_v20 = vrot.slane %v2314_v59, 6 }
0x2aee   :  { %v4300_v24 = vpop.eup %4299 }
0x2aef   :  { %2317 = vrot.lane.b32.xlu0 %v4300_v24, %s4580_s4 }
0x2b61   :  { %v2318_v39 = vpop.permute.xlu0 %2317 }
0x2b62   :  { %v2320_v60 = vmul.f32 %v4298_v58, %v2318_v39 }
0x2b64   :  { %2322 = vrot.lane.b32.xlu1 %v2320_v60, %s4581_s3 }
0x2bd6   :  { %v2323_v7 = vpop.permute.xlu1 %2322 }
0x2bd7   :  { %4014 = vmatmul.mubr.msk.f32.vlgmr.msra.gmra.mxu1 %vm290_vm3, %v2323_v7 }
0x2bd8   :  { %4028 = vmatpush3.msra.mxu1 %v5148_v0  ;;  %4035 = vmatprep.mubr.msk.f32.mxu1 %vm4579_vm0, %v4578_v1 }
0x2bd9   :  { %4029 = vmatprep.subr.mxu1 %v4578_v1 }
0x2bda   :  { %4030 = vmatpush3.msra.mxu1 %v5154_v2 }
0x2bdb   :  { %4031 = vmatprep.subr.mxu1 %v4578_v1 }
0x2bdc   :  { %4032 = vmatpush3.msra.mxu1 %v5162_v9 }
0x2bdd   :  { %4033 = vmatprep.subr.mxu1 %v4578_v1 }
0x2bde   :  { %4034 = vmatpush3.msra.mxu1 %v5166_v10 }
0x2bdf   :  { %4049 = vmatprep.subr.mxu1 %v4578_v1 }
0x2c97   :  { %v2392_v62 = vpop.f32.mrf.mxu1 }
0x2c98   :  { %v2397_v8 = vrot.slane %v2392_v62, 6 }
0x2c99   :  { %v4015_v14 = vpop.f32.mrf.mxu1 }
0x2c9a   :  { %v2399_v33 = vadd.f32 %v2397_v8, %v5220_v35 }
0x2c9c   :  { %4301 = vtanh.f32 %v2399_v33  ;;  %v3591_v15 = vmul.f32 -1.442695, %v2399_v33 }
0x2c9e   :  { %4303 = vpow2.f32 %v3591_v15 }
0x2ca9   :  { %v4302_v37 = vpop.eup %4301 }
0x2caa   :  { %2412 = vrot.lane.b32.xlu0 %v4302_v37, %s4580_s4 }
0x2cab   :  { %v4304_v16 = vpop.eup %4303 }
0x2cac   :  { %v2403_v17 = vadd.f32 1.0, %v4304_v16 }
0x2cae   :  { %4305 = vrcp.f32 %v2403_v17 }
0x2cbb   :  { %v4306_v18 = vpop.eup %4305 }
0x2cbc   :  { %v2410_v22 = vmul.f32 %v4306_v18, %v2408_v20 }
0x2d1c   :  { %v2413_v19 = vpop.permute.xlu0 %2412 }
0x2d1d   :  { %v2415_v45 = vmul.f32 %v4306_v18, %v2413_v19 }
0x2d1f   :  { %2417 = vrot.lane.b32.xlu1 %v2415_v45, %s4581_s3 }
0x2d91   :  { %v2418_v23 = vpop.permute.xlu1 %2417 }
0x2d92   :  { %v2420_v25 = vadd.f32 %v2418_v23, %v2410_v22 }
0x2d94   :  { %4307 = vtanh.f32 %v2420_v25  ;;  %v2515_v11 = vrot.slane %v2420_v25, 6 }
0x2da1   :  { %v4308_v26 = vpop.eup %4307 }
0x2da2   :  { %2423 = vrot.lane.b32.xlu0 %v4308_v26, %s4580_s4 }
0x2e14   :  { %v2424_v27 = vpop.permute.xlu0 %2423 }
0x2e15   :  { %v2426_v28 = vmul.f32 %v4306_v18, %v2424_v27 }
0x2e17   :  { %v2428_v29 = vrot.slane %v2426_v28, 2 }
0x2e19   :  { %2429 = vrot.lane.b32.xlu1 %v2428_v29, %s4581_s3 }
0x2e8b   :  { %v2430_v13 = vpop.permute.xlu1 %2429 }
0x2e8c   :  { %4025 = vmatmul.mubr.msk.f32.vlgmr.msra.gmra.mxu0 %vm290_vm3, %v2430_v13 }
0x2e8d   :  { %4039 = vmatpush3.msra.mxu0 %v5148_v0  ;;  %4046 = vmatprep.mubr.msk.f32.mxu0 %vm4579_vm0, %v4578_v1 }
0x2e8e   :  { %4040 = vmatprep.subr.mxu0 %v4578_v1 }
0x2e8f   :  { %4041 = vmatpush3.msra.mxu0 %v5154_v2 }
0x2e90   :  { %4042 = vmatprep.subr.mxu0 %v4578_v1 }
0x2e91   :  { %4043 = vmatpush3.msra.mxu0 %v5162_v9 }
0x2e92   :  { %4044 = vmatprep.subr.mxu0 %v4578_v1 }
0x2e93   :  { %4045 = vmatpush3.msra.mxu0 %v5166_v10 }
0x2e94   :  { %4060 = vmatprep.subr.mxu0 %v4578_v1 }
0x2f4c   :  { %v2499_v32 = vpop.f32.mrf.mxu0 }
0x2f4d   :  { %v2504_v36 = vrot.slane %v2499_v32, 4 }
0x2f4e   :  { %v4026_v4 = vpop.f32.mrf.mxu0 }
0x2f4f   :  { %v2506_v40 = vadd.f32 %v2504_v36, %v5220_v35 }
0x2f51   :  { %4309 = vtanh.f32 %v2506_v40  ;;  %v3593_v63 = vmul.f32 -1.442695, %v2506_v40 }
0x2f53   :  { %4311 = vpow2.f32 %v3593_v63 }
0x2f5e   :  { %v4310_v43 = vpop.eup %4309 }
0x2f5f   :  { %2519 = vrot.lane.b32.xlu0 %v4310_v43, %s4580_s4 }
0x2f60   :  { %v4312_v42 = vpop.eup %4311 }
0x2f61   :  { %v2510_v44 = vadd.f32 1.0, %v4312_v42 }
0x2f63   :  { %4313 = vrcp.f32 %v2510_v44 }
0x2f70   :  { %v4314_v46 = vpop.eup %4313 }
0x2f71   :  { %v2517_v41 = vmul.f32 %v4314_v46, %v2515_v11 }
0x2fd1   :  { %v2520_v47 = vpop.permute.xlu0 %2519 }
0x2fd2   :  { %v2522_v50 = vmul.f32 %v4314_v46, %v2520_v47 }
0x2fd4   :  { %2524 = vrot.lane.b32.xlu1 %v2522_v50, %s4581_s3 }
0x3046   :  { %v2525_v30 = vpop.permute.xlu1 %2524 }
0x3047   :  { %v2527_v52 = vadd.f32 %v2525_v30, %v2517_v41  ;;  %v3072_v30 = vld [vmem:[%s5443_s10 + $0x38] sm:$0xff] }
0x3049   :  { %4315 = vtanh.f32 %v2527_v52  ;;  %v2622_v24 = vrot.slane %v2527_v52, 6 }
0x3056   :  { %v4316_v54 = vpop.eup %4315 }
0x3057   :  { %2530 = vrot.lane.b32.xlu0 %v4316_v54, %s4580_s4 }
0x30c9   :  { %v2531_v34 = vpop.permute.xlu0 %2530 }
0x30ca   :  { %v2533_v55 = vmul.f32 %v4314_v46, %v2531_v34 }
0x30cc   :  { %v2535_v56 = vrot.slane %v2533_v55, 4 }
0x30ce   :  { %2536 = vrot.lane.b32.xlu1 %v2535_v56, %s4581_s3 }
0x3140   :  { %v2537_v48 = vpop.permute.xlu1 %2536 }
0x3141   :  { %4036 = vmatmul.mubr.msk.f32.vlgmr.msra.gmra.mxu1 %vm290_vm3, %v2537_v48  ;;  %v3071_v48 = vld [vmem:[%s5443_s10 + $0x30] sm:$0xff] }
0x3142   :  { %4050 = vmatpush3.msra.mxu1 %v5148_v0  ;;  %4057 = vmatprep.mubr.msk.f32.mxu1 %vm4579_vm0, %v4578_v1 }
0x3143   :  { %4051 = vmatprep.subr.mxu1 %v4578_v1 }
0x3144   :  { %4052 = vmatpush3.msra.mxu1 %v5154_v2 }
0x3145   :  { %4053 = vmatprep.subr.mxu1 %v4578_v1 }
0x3146   :  { %4054 = vmatpush3.msra.mxu1 %v5162_v9 }
0x3147   :  { %4055 = vmatprep.subr.mxu1 %v4578_v1 }
0x3148   :  { %4056 = vmatpush3.msra.mxu1 %v5166_v10 }
0x3149   :  { %4071 = vmatprep.subr.mxu1 %v4578_v1 }
0x3201   :  { %v2606_v12 = vpop.f32.mrf.mxu1 }
0x3202   :  { %v2611_v21 = vrot.slane %v2606_v12, 2  ;;  %v3070_v12 = vld [vmem:[%s5443_s10 + $0x28] sm:$0xff] }
0x3203   :  { %v4037_v57 = vpop.f32.mrf.mxu1 }
0x3204   :  { %v2613_v5 = vadd.f32 %v2611_v21, %v5220_v35  ;;  %v3069_v21 = vld [vmem:[%s5443_s10 + $0x20] sm:$0xff]  ;;  %v3068_v57 = vld [vmem:[%s5443_s10 + $0x18] sm:$0xff] }
0x3206   :  { %4317 = vtanh.f32 %v2613_v5  ;;  %v3595_v58 = vmul.f32 -1.442695, %v2613_v5  ;;  %v3066_v5 = vld [vmem:[%s5443_s10 + $0x8] sm:$0xff] }
0x3208   :  { %4319 = vpow2.f32 %v3595_v58 }
0x3213   :  { %v4318_v49 = vpop.eup %4317 }
0x3214   :  { %2626 = vrot.lane.b32.xlu0 %v4318_v49, %s4580_s4  ;;  %v3065_v49 = vld [vmem:[%s5443_s10] sm:$0xff] }
0x3215   :  { %v4320_v38 = vpop.eup %4319 }
0x3216   :  { %v2617_v3 = vadd.f32 1.0, %v4320_v38 }
0x3218   :  { %4321 = vrcp.f32 %v2617_v3 }
0x3225   :  { %v4322_v61 = vpop.eup %4321 }
0x3226   :  { %v2624_v39 = vmul.f32 %v4322_v61, %v2622_v24 }
0x3286   :  { %v2627_v6 = vpop.permute.xlu0 %2626 }
0x3287   :  { %v2629_v59 = vmul.f32 %v4322_v61, %v2627_v6 }
0x3289   :  { %2631 = vrot.lane.b32.xlu1 %v2629_v59, %s4581_s3 }
0x32fb   :  { %v2632_v60 = vpop.permute.xlu1 %2631 }
0x32fc   :  { %v2634_v7 = vadd.f32 %v2632_v60, %v2624_v39 }
0x32fe   :  { %4323 = vtanh.f32 %v2634_v7  ;;  %v2726_v25 = vrot.slane %v2634_v7, 6 }
0x330b   :  { %v4324_v35 = vpop.eup %4323 }
0x330c   :  { %2637 = vrot.lane.b32.xlu0 %v4324_v35, %s4580_s4 }
0x337e   :  { %v2638_v62 = vpop.permute.xlu0 %2637 }
0x337f   :  { %v2640_v8 = vmul.f32 %v4322_v61, %v2638_v62 }
0x3381   :  { %v2642_v14 = vrot.slane %v2640_v8, 6 }
0x3383   :  { %2643 = vrot.lane.b32.xlu1 %v2642_v14, %s4581_s3 }
0x33f5   :  { %v2644_v33 = vpop.permute.xlu1 %2643 }
0x33f6   :  { %4047 = vmatmul.mubr.msk.f32.vlgmr.msra.gmra.mxu0 %vm290_vm3, %v2644_v33 }
0x33f7   :  { %4061 = vmatpush3.msra.mxu0 %v5148_v0  ;;  %4068 = vmatprep.mubr.msk.f32.mxu0 %vm4579_vm0, %v4578_v1 }
0x33f8   :  { %4062 = vmatprep.subr.mxu0 %v4578_v1 }
0x33f9   :  { %4063 = vmatpush3.msra.mxu0 %v5154_v2 }
0x33fa   :  { %4064 = vmatprep.subr.mxu0 %v4578_v1 }
0x33fb   :  { %4065 = vmatpush3.msra.mxu0 %v5162_v9 }
0x33fc   :  { %4066 = vmatprep.subr.mxu0 %v4578_v1 }
0x33fd   :  { %4067 = vmatpush3.msra.mxu0 %v5166_v10 }
0x33fe   :  { %4082 = vmatprep.subr.mxu0 %v3072_v30 }
0x34b6   :  { %v2713_v37 = vpop.f32.mrf.mxu0 }
0x34b7   :  { %v2717_v15 = vadd.f32 %v2713_v37, %v5218_v31 }
0x34b8   :  { %v4048_v16 = vpop.f32.mrf.mxu0 }
0x34b9   :  { %4325 = vtanh.f32 %v2717_v15  ;;  %v3597_v18 = vmul.f32 -1.442695, %v2717_v15 }
0x34bb   :  { %4327 = vpow2.f32 %v3597_v18 }
0x34c6   :  { %v4326_v17 = vpop.eup %4325 }
0x34c7   :  { %2730 = vrot.lane.b32.xlu0 %v4326_v17, %s4580_s4 }
0x34c8   :  { %v4328_v19 = vpop.eup %4327 }
0x34c9   :  { %v2721_v45 = vadd.f32 1.0, %v4328_v19  ;;  %v3157_v19 = vld [vmem:[#allocation14 + $0x18] sm:$0xff] }
0x34cb   :  { %4329 = vrcp.f32 %v2721_v45 }
0x34d8   :  { %v4330_v20 = vpop.eup %4329 }
0x34d9   :  { %v2728_v26 = vmul.f32 %v4330_v20, %v2726_v25 }
0x3539   :  { %v2731_v22 = vpop.permute.xlu0 %2730 }
0x353a   :  { %v2733_v23 = vmul.f32 %v4330_v20, %v2731_v22  ;;  %v3155_v22 = vld [vmem:[#allocation14 + $0x8] sm:$0xff] }
0x353c   :  { %2735 = vrot.lane.b32.xlu1 %v2733_v23, %s4581_s3  ;;  %v3154_v23 = vld [vmem:[#allocation14] sm:$0xff] }
0x35ae   :  { %v2736_v27 = vpop.permute.xlu1 %2735 }
0x35af   :  { %v2738_v28 = vadd.f32 %v2736_v27, %v2728_v26 }
0x35b1   :  { %4331 = vtanh.f32 %v2738_v28 }
0x35be   :  { %v4332_v29 = vpop.eup %4331 }
0x35bf   :  { %2741 = vrot.lane.b32.xlu0 %v4332_v29, %s4580_s4  ;;  %v3604_v29 = vld [vmem:[%s5445_s12] ss:$0 sm:$0xff] }
0x3631   :  { %v2742_v13 = vpop.permute.xlu0 %2741 }
0x3632   :  { %v2744_v32 = vmul.f32 %v4330_v20, %v2742_v13  ;;  %v3156_v20 = vld [vmem:[#allocation14 + $0x10] sm:$0xff] }
0x3634   :  { %2746 = vrot.lane.b32.xlu1 %v2744_v32, %s4581_s3 }
0x36a6   :  { %v2747_v36 = vpop.permute.xlu1 %2746 }
0x36a7   :  { %4058 = vmatmul.mubr.msk.f32.vlgmr.msra.gmra.mxu1 %vm290_vm3, %v2747_v36 }
0x36a8   :  { %4072 = vmatpush3.msra.mxu1 %v5148_v0  ;;  %4079 = vmatprep.mubr.msk.f32.mxu1 %vm4579_vm0, %v4578_v1 }
0x36a9   :  { %4073 = vmatprep.subr.mxu1 %v4578_v1 }
0x36aa   :  { %4074 = vmatpush3.msra.mxu1 %v5154_v2 }
0x36ab   :  { %4075 = vmatprep.subr.mxu1 %v4578_v1 }
0x36ac   :  { %4076 = vmatpush3.msra.mxu1 %v5162_v9 }
0x36ad   :  { %4077 = vmatprep.subr.mxu1 %v4578_v1 }
0x36ae   :  { %4078 = vmatpush3.msra.mxu1 %v5166_v10  ;;  %v2832_v10 = vrot.slane %v2738_v28, 6 }
0x36af   :  { %4101 = vmatprep.subr.mxu1 %v4578_v1 }
0x3767   :  { %v2816_v4 = vpop.f32.mrf.mxu1 }
0x3768   :  { %v2821_v40 = vrot.slane %v2816_v4, 6 }
0x3769   :  { %v4059_v0 = vpop.f32.mrf.mxu1 }
0x376a   :  { %v2823_v43 = vadd.f32 %v2821_v40, %v5218_v31 }
0x376c   :  { %4333 = vtanh.f32 %v2823_v43  ;;  %v3599_v2 = vmul.f32 -1.442695, %v2823_v43 }
0x376e   :  { %4335 = vpow2.f32 %v3599_v2 }
0x3779   :  { %v4334_v63 = vpop.eup %4333 }
0x377a   :  { %2836 = vrot.lane.b32.xlu0 %v4334_v63, %s4580_s4 }
0x377b   :  { %v4336_v42 = vpop.eup %4335 }
0x377c   :  { %v2827_v44 = vadd.f32 1.0, %v4336_v42 }
0x377e   :  { %4337 = vrcp.f32 %v2827_v44 }
0x378b   :  { %v4338_v9 = vpop.eup %4337 }
0x378c   :  { %v2834_v50 = vmul.f32 %v4338_v9, %v2832_v10 }
0x37ec   :  { %v2837_v46 = vpop.permute.xlu0 %2836 }
0x37ed   :  { %v2839_v47 = vmul.f32 %v4338_v9, %v2837_v46 }
0x37ef   :  { %2841 = vrot.lane.b32.xlu1 %v2839_v47, %s4581_s3 }
0x3861   :  { %v2842_v11 = vpop.permute.xlu1 %2841 }
0x3862   :  { %v2844_v41 = vadd.f32 %v2842_v11, %v2834_v50 }
0x3864   :  { %4339 = vtanh.f32 %v2844_v41  ;;  %v2939_v8 = vrot.slane %v2844_v41, 6 }
0x3871   :  { %v4340_v52 = vpop.eup %4339 }
0x3872   :  { %2847 = vrot.lane.b32.xlu0 %v4340_v52, %s4580_s4 }
0x38e4   :  { %v2848_v54 = vpop.permute.xlu0 %2847 }
0x38e5   :  { %v2850_v34 = vmul.f32 %v4338_v9, %v2848_v54 }
0x38e7   :  { %v2852_v55 = vrot.slane %v2850_v34, 2 }
0x38e9   :  { %2853 = vrot.lane.b32.xlu1 %v2852_v55, %s4581_s3 }
0x395b   :  { %v2854_v56 = vpop.permute.xlu1 %2853 }
0x395c   :  { %4069 = vmatmul.mubr.msk.f32.vlgmr.msra.gmra.mxu0 %vm290_vm3, %v2854_v56 }
0x395d   :  { %4083 = vmatpush3.msra.mxu0 %v3072_v30  ;;  %4098 = vmatprep.mubr.msk.f32.mxu0 %vm2140_vm6, %v5195_v51  ;;  %v3067_v51 = vld [vmem:[%s5443_s10 + $0x10] sm:$0xff] }
0x395e   :  { %4084 = vmatprep.subr.mxu0 %v3071_v48 }
0x395f   :  { %4085 = vmatpush3.msra.mxu0 %v3071_v48 }
0x3960   :  { %4086 = vmatprep.subr.mxu0 %v3070_v12 }
0x3961   :  { %4087 = vmatpush3.msra.mxu0 %v3070_v12  ;;  %v3272_v12 = vld [vmem:[#allocation16 + $0x38] sm:$0xff] }
0x3962   :  { %4088 = vmatprep.subr.mxu0 %v3069_v21 }
0x3963   :  { %4089 = vmatpush3.msra.mxu0 %v3069_v21  ;;  %v3271_v21 = vld [vmem:[#allocation16 + $0x30] sm:$0xff] }
0x3964   :  { %4090 = vmatprep.subr.mxu0 %v3068_v57 }
0x3965   :  { %4091 = vmatpush3.msra.mxu0 %v3068_v57 }
0x3966   :  { %4092 = vmatprep.subr.mxu0 %v3067_v51 }
0x3967   :  { %4093 = vmatpush3.msra.mxu0 %v3067_v51  ;;  %v3270_v51 = vld [vmem:[#allocation16 + $0x28] sm:$0xff] }
0x3968   :  { %4094 = vmatprep.subr.mxu0 %v3066_v5 }
0x3969   :  { %4095 = vmatpush3.msra.mxu0 %v3066_v5 }
0x396a   :  { %4096 = vmatprep.subr.mxu0 %v3065_v49 }
0x396b   :  { %4097 = vmatpush3.msra.mxu0 %v3065_v49  ;;  %v3269_v49 = vld [vmem:[#allocation16 + $0x20] sm:$0xff] }
0x396c   :  { %4099 = vmatmul.mubr.msk.f32.vlgmr.msra.gmra.mxu0 %vm2140_vm6, %v5201_v53  ;;  %4131 = vmatprep.subr.mxu0 %v4578_v1 }
0x396d   :  { %4147 = vmatprep.mubr.msk.f32.mxu0 %vm4579_vm0, %v4578_v1 }
0x3a1c   :  { %v2923_v58 = vpop.f32.mrf.mxu0 }
0x3a1d   :  { %v2928_v38 = vrot.slane %v2923_v58, 4  ;;  %v3268_v58 = vld [vmem:[#allocation16 + $0x18] sm:$0xff] }
0x3a1e   :  { %v4070_v3 = vpop.f32.mrf.mxu0 }
0x3a1f   :  { %v2930_v61 = vadd.f32 %v2928_v38, %v5218_v31  ;;  %v3267_v38 = vld [vmem:[#allocation16 + $0x10] sm:$0xff]  ;;  %v3266_v3 = vld [vmem:[#allocation16 + $0x8] sm:$0xff] }
0x3a21   :  { %4341 = vtanh.f32 %v2930_v61  ;;  %v3601_v39 = vmul.f32 -1.442695, %v2930_v61  ;;  %v3265_v61 = vld [vmem:[#allocation16] sm:$0xff] }
0x3a23   :  { %4343 = vpow2.f32 %v3601_v39 }
0x3a2c   :  { %v4100_v6 = vpop.f32.mrf.mxu0 }
0x3a2d   :  { %v3151_v32 = vadd.f32 %v4100_v6, %v3604_v29 }
0x3a2e   :  { %v4342_v59 = vpop.eup %4341  ;;  %v3146_v24 = vpop.f32.mrf.mxu0 }
0x3a2f   :  { %2943 = vrot.lane.b32.xlu0 %v4342_v59, %s4580_s4 }
0x3a30   :  { %v4344_v60 = vpop.eup %4343 }
0x3a31   :  { %v2934_v53 = vadd.f32 1.0, %v4344_v60 }
0x3a33   :  { %4345 = vrcp.f32 %v2934_v53 }
0x3a40   :  { %v4346_v7 = vpop.eup %4345 }
0x3a41   :  { %v2941_v14 = vmul.f32 %v4346_v7, %v2939_v8 }
0x3aa1   :  { %v2944_v35 = vpop.permute.xlu0 %2943 }
0x3aa2   :  { %v2946_v62 = vmul.f32 %v4346_v7, %v2944_v35 }
0x3aa4   :  { %2948 = vrot.lane.b32.xlu1 %v2946_v62, %s4581_s3  ;;  %v3608_v62 = vld [vmem:[%s5447_s14] ss:$0 sm:$0xff] }
0x3b16   :  { %v2949_v33 = vpop.permute.xlu1 %2948 }
0x3b17   :  { %v2951_v37 = vadd.f32 %v2949_v33, %v2941_v14 }
0x3b19   :  { %4347 = vtanh.f32 %v2951_v37  ;;  %v3046_v30 = vrot.slane %v2951_v37, 6 }
0x3b26   :  { %v4348_v15 = vpop.eup %4347 }
0x3b27   :  { %2954 = vrot.lane.b32.xlu0 %v4348_v15, %s4580_s4 }
0x3b99   :  { %v2955_v16 = vpop.permute.xlu0 %2954 }
0x3b9a   :  { %v2957_v17 = vmul.f32 %v4346_v7, %v2955_v16 }
0x3b9c   :  { %v2959_v18 = vrot.slane %v2957_v17, 4 }
0x3b9e   :  { %2960 = vrot.lane.b32.xlu1 %v2959_v18, %s4581_s3 }
0x3c10   :  { %v2961_v45 = vpop.permute.xlu1 %2960 }
0x3c11   :  { %4080 = vmatmul.mubr.msk.f32.vlgmr.msra.gmra.mxu1 %vm290_vm3, %v2961_v45  ;;  %v3399_v45 = vld [vmem:[%s5450_s17 + $0x38] sm:$0xff] }
0x3c12   :  { %4102 = vmatpush3.msra.mxu1 %v3157_v19  ;;  %4109 = vmatprep.mubr.msk.f32.mxu1 %vm4579_vm0, %v4578_v1 }
0x3c13   :  { %4103 = vmatprep.subr.mxu1 %v4578_v1  ;;  %4132 = vmatpush3.msra.mxu0 %v3399_v45 }
0x3c14   :  { %4104 = vmatpush3.msra.mxu1 %v3156_v20  ;;  %v3398_v20 = vld [vmem:[%s5450_s17 + $0x30] sm:$0xff]  ;;  %4133 = vmatprep.subr.mxu0 %v4578_v1 }
0x3c15   :  { %4105 = vmatprep.subr.mxu1 %v4578_v1  ;;  %4134 = vmatpush3.msra.mxu0 %v3398_v20 }
0x3c16   :  { %4106 = vmatpush3.msra.mxu1 %v3155_v22  ;;  %v3397_v22 = vld [vmem:[%s5450_s17 + $0x28] sm:$0xff]  ;;  %4135 = vmatprep.subr.mxu0 %v4578_v1 }
0x3c17   :  { %4107 = vmatprep.subr.mxu1 %v4578_v1  ;;  %4136 = vmatpush3.msra.mxu0 %v3397_v22 }
0x3c18   :  { %4108 = vmatpush3.msra.mxu1 %v3154_v23  ;;  %v3396_v23 = vld [vmem:[%s5450_s17 + $0x20] sm:$0xff]  ;;  %4137 = vmatprep.subr.mxu0 %v4578_v1 }
0x3c19   :  { %4110 = vmatmul.mubr.f32.vlgmr.msra.gmra.mxu1 %v4578_v1  ;;  %4112 = vmatprep.subr.mxu1 %v4578_v1 }
0x3c1a   :  { %4128 = vmatprep.mubr.msk.f32.mxu1 %vm4579_vm0, %v4578_v1  ;;  %4113 = vmatpush3.msra.mxu1 %v3272_v12  ;;  %v3615_v12 = vld [vmem:[%s5452_s19] ss:$0 sm:$0xff] }
0x3c1b   :  { %4114 = vmatprep.subr.mxu1 %v4578_v1  ;;  %4138 = vmatpush3.msra.mxu0 %v3396_v23 }
0x3c1c   :  { %4115 = vmatpush3.msra.mxu1 %v3271_v21  ;;  %4139 = vmatprep.subr.mxu0 %v4578_v1 }
0x3c1d   :  { %4116 = vmatprep.subr.mxu1 %v4578_v1 }
0x3c1e   :  { %4117 = vmatpush3.msra.mxu1 %v3270_v51 }
0x3c1f   :  { %4118 = vmatprep.subr.mxu1 %v4578_v1 }
0x3c20   :  { %4119 = vmatpush3.msra.mxu1 %v3269_v49 }
0x3c21   :  { %4120 = vmatprep.subr.mxu1 %v4578_v1 }
0x3c22   :  { %4121 = vmatpush3.msra.mxu1 %v3268_v58 }
0x3c23   :  { %4122 = vmatprep.subr.mxu1 %v4578_v1 }
0x3c24   :  { %4123 = vmatpush3.msra.mxu1 %v3267_v38 }
0x3c25   :  { %4124 = vmatprep.subr.mxu1 %v4578_v1 }
0x3c26   :  { %4125 = vmatpush3.msra.mxu1 %v3266_v3 }
0x3c27   :  { %4126 = vmatprep.subr.mxu1 %v4578_v1 }
0x3c28   :  { %4127 = vmatpush3.msra.mxu1 %v3265_v61  ;;  %v3618_v61 = vld [vmem:[%s5454_s21] ss:$0 sm:$0xff] }
0x3cd1   :  { %v3030_v25 = vpop.f32.mrf.mxu1 }
0x3cd2   :  { %v3035_v26 = vrot.slane %v3030_v25, 2  ;;  %v3395_v25 = vld [vmem:[%s5450_s17 + $0x18] sm:$0xff] }
0x3cd3   :  { %v4081_v27 = vpop.f32.mrf.mxu1  ;;  %4140 = vmatpush3.msra.mxu0 %v3395_v25 }
0x3cd4   :  { %v3037_v28 = vadd.f32 %v3035_v26, %v5218_v31  ;;  %v3394_v26 = vld [vmem:[%s5450_s17 + $0x10] sm:$0xff]  ;;  %4141 = vmatprep.subr.mxu0 %v4578_v1  ;;  %v3393_v27 = vld [vmem:[%s5450_s17 + $0x8] sm:$0xff] }
0x3cd5   :  { %4142 = vmatpush3.msra.mxu0 %v3394_v26 }
0x3cd6   :  { %4349 = vtanh.f32 %v3037_v28  ;;  %v3603_v63 = vmul.f32 -1.442695, %v3037_v28  ;;  %4143 = vmatprep.subr.mxu0 %v4578_v1  ;;  %v3392_v28 = vld [vmem:[%s5450_s17] sm:$0xff] }
0x3cd7   :  { %4144 = vmatpush3.msra.mxu0 %v3393_v27 }
0x3cd8   :  { %4145 = vmatprep.subr.mxu0 %v4578_v1 }
0x3cd9   :  { %v3224_v13 = vpop.f32.mrf.mxu1  ;;  %4146 = vmatpush3.msra.mxu0 %v3392_v28 }
0x3cda   :  { %v3229_v36 = vrot.slane %v3224_v13, 2 }
0x3cdb   :  { %v4111_v4 = vpop.f32.mrf.mxu1 }
0x3cdc   :  { %v3231_v40 = vadd.f32 %v3229_v36, %v3151_v32  ;;  %v3610_v4 = vld [vmem:[%s5448_s15] ss:$0 sm:$0xff] }
0x3cde   :  { %4351 = vtanh.f32 %v3231_v40  ;;  %v3607_v31 = vmul.f32 -1.442695, %v3231_v40 }
0x3cdf   :  { %4353 = vpow2.f32 %v3603_v63 }
0x3ce0   :  { %4355 = vpow2.f32 %v3607_v31 }
0x3ce3   :  { %v4350_v0 = vpop.eup %4349 }
0x3ce4   :  { %3050 = vrot.lane.b32.xlu0 %v4350_v0, %s4580_s4  ;;  %v3611_v0 = vld [vmem:[%s5449_s16] ss:$0 sm:$0xff] }
0x3ceb   :  { %v4352_v43 = vpop.eup %4351 }
0x3cec   :  { %3241 = vrot.lane.b32.xlu1 %v4352_v43, %s4580_s4  ;;  %v4354_v2 = vpop.eup %4353 }
0x3ced   :  { %v3041_v42 = vadd.f32 1.0, %v4354_v2  ;;  %v4356_v44 = vpop.eup %4355 }
0x3cee   :  { %v3235_v9 = vadd.f32 1.0, %v4356_v44 }
0x3cef   :  { %4357 = vrcp.f32 %v3041_v42 }
0x3cf0   :  { %4359 = vrcp.f32 %v3235_v9  ;;  %v3613_v9 = vld [vmem:[%s5451_s18] ss:$0 sm:$0xff] }
0x3cfc   :  { %v4358_v46 = vpop.eup %4357 }
0x3cfd   :  { %v4360_v50 = vpop.eup %4359  ;;  %v3048_v52 = vmul.f32 %v4358_v46, %v3046_v30 }
0x3cfe   :  { %v3239_v55 = vmul.f32 0.0, %v4360_v50 }
0x3d56   :  { %v3051_v47 = vpop.permute.xlu0 %3050 }
0x3d57   :  { %v3053_v10 = vmul.f32 %v4358_v46, %v3051_v47 }
0x3d59   :  { %3055 = vrot.lane.b32.xlu0 %v3053_v10, %s4581_s3 }
0x3d5e   :  { %v3242_v11 = vpop.permute.xlu1 %3241 }
0x3d5f   :  { %v3244_v41 = vmul.f32 %v4360_v50, %v3242_v11 }
0x3d61   :  { %3246 = vrot.lane.b32.xlu1 %v3244_v41, %s4581_s3 }
0x3dcb   :  { %v3056_v54 = vpop.permute.xlu0 %3055 }
0x3dcc   :  { %v3058_v34 = vadd.f32 %v3056_v54, %v3048_v52 }
0x3dce   :  { %4361 = vtanh.f32 %v3058_v34 }
0x3dd3   :  { %v3247_v56 = vpop.permute.xlu1 %3246 }
0x3dd4   :  { %v3249_v48 = vadd.f32 %v3247_v56, %v3239_v55 }
0x3dd6   :  { %4363 = vtanh.f32 %v3249_v48 }
0x3ddb   :  { %v4362_v57 = vpop.eup %4361 }
0x3ddc   :  { %3061 = vrot.lane.b32.xlu0 %v4362_v57, %s4580_s4  ;;  %v3616_v57 = vld [vmem:[%s5453_s20] ss:$0 sm:$0xff] }
0x3de3   :  { %v4364_v5 = vpop.eup %4363 }
0x3de4   :  { %3252 = vrot.lane.b32.xlu1 %v4364_v5, %s4580_s4 }
0x3e4e   :  { %v3062_v6 = vpop.permute.xlu0 %3061 }
0x3e4f   :  { %v3064_v59 = vmul.f32 %v4358_v46, %v3062_v6 }
0x3e51   :  { %3257 = vrot.lane.b32.xlu0 %v3064_v59, %s4581_s3 }
0x3e56   :  { %v3253_v24 = vpop.permute.xlu1 %3252 }
0x3e57   :  { %v3255_v39 = vmul.f32 %v4360_v50, %v3253_v24 }
0x3e59   :  { %3261 = vrot.lane.b32.xlu1 %v3255_v39, %s4580_s4  ;;  %v3619_v39 = vld [vmem:[#allocation2] ss:$0 sm:$0xff] }
0x3ec3   :  { %v3258_v60 = vpop.permute.xlu0 %3257 }
0x3ecb   :  { %v3262_v53 = vpop.permute.xlu1 %3261 }
0x3ecc   :  { %v3264_v7 = vsel %vm290_vm3, %v3258_v60, %v3262_v53 }
0x3ecd   :  { %v3281_v35 = vrot.slane %v3264_v7, 6 }
0x3ecf   :  { %4129 = vmatmul.mubr.msk.f32.vlgmr.msra.gmra.mxu1 %vm2140_vm6, %v3281_v35 }
0x3f8f   :  { %v3350_v8 = vpop.f32.mrf.mxu1 }
0x3f90   :  { %v3351_v14 = vadd.f32 %v3608_v62, %v3350_v8 }
0x3f91   :  { %v4130_v33 = vpop.f32.mrf.mxu1 }
0x3f92   :  { %v3357_v37 = vsel %vm3356_vm7, %v3351_v14, 0.0 }
0x3f93   :  { %3358 = vadd.xlane.f32.xlu0 %v3357_v37 }
0x401c   :  { %v3359_v15 = vpop.xlane.xlu0 %3358 }
0x401d   :  { %v3361_v16 = vmul.f32 0.015625, %v3359_v15 }
0x401f   :  { %v3362_v17 = vsub.f32 %v3351_v14, %v3361_v16 }
0x4021   :  { %v3363_v18 = vmul.f32 %v3362_v17, %v3362_v17 }
0x4023   :  { %v3364_v19 = vsel %vm3356_vm7, %v3363_v18, 0.0 }
0x4024   :  { %3365 = vadd.xlane.f32.xlu1 %v3364_v19 }
0x40ad   :  { %v3366_v29 = vpop.xlane.xlu1 %3365 }
0x40ae   :  { %v3367_v13 = vmul.f32 0.015625, %v3366_v29 }
0x40b0   :  { %v3368_v32 = vadd.f32 1e-05, %v3367_v13 }
0x40b2   :  { %4365 = vrsqrt.f32 %v3368_v32 }
0x40bf   :  { %v4366_v36 = vpop.eup %4365 }
0x40c0   :  { %v3370_v40 = vmul.f32 %v4366_v36, %v3362_v17 }
0x40c2   :  { %v3377_v43 = vmul.f32 %v3610_v4, %v3370_v40 }
0x40c4   :  { %v3384_v63 = vadd.f32 %v3611_v0, %v3377_v43 }
0x40c6   :  { %v3612_v31 = vmul.f32 -1.442695, %v3384_v63 }
0x40c8   :  { %4367 = vpow2.f32 %v3612_v31 }
0x40d5   :  { %v4368_v1 = vpop.eup %4367 }
0x40d6   :  { %v3388_v2 = vadd.f32 1.0, %v4368_v1 }
0x40d8   :  { %4369 = vrcp.f32 %v3388_v2 }
0x40e5   :  { %v4370_v42 = vpop.eup %4369 }
0x40e6   :  { %v3391_v44 = vmul.f32 %v4370_v42, %v3384_v63 }
0x40e8   :  { %4148 = vmatmul.mubr.msk.f32.vlgmr.msra.gmra.mxu0 %vm2140_vm6, %v3391_v44 }
0x41a8   :  { %v3476_v46 = vpop.f32.mrf.mxu0 }
0x41a9   :  { %v3477_v47 = vadd.f32 %v3613_v9, %v3476_v46 }
0x41aa   :  { %v4149_v10 = vpop.f32.mrf.mxu0 }
0x41ab   :  { %v3483_v50 = vsel %vm3482_vm8, %v3477_v47, 0.0 }
0x41ac   :  { %3484 = vadd.xlane.f32.xlu0 %v3483_v50 }
0x4235   :  { %v3485_v11 = vpop.xlane.xlu0 %3484 }
0x4236   :  { %v3487_v41 = vmul.f32 0.03125, %v3485_v11 }
0x4238   :  { %v3488_v30 = vsub.f32 %v3477_v47, %v3487_v41 }
0x423a   :  { %v3489_v52 = vmul.f32 %v3488_v30, %v3488_v30 }
0x423c   :  { %v3490_v54 = vsel %vm3482_vm8, %v3489_v52, 0.0 }
0x423d   :  { %3491 = vadd.xlane.f32.xlu0 %v3490_v54 }
0x42c6   :  { %v3492_v34 = vpop.xlane.xlu0 %3491 }
0x42c7   :  { %v3493_v55 = vmul.f32 0.03125, %v3492_v34 }
0x42c9   :  { %v3494_v56 = vadd.f32 1e-05, %v3493_v55 }
0x42cb   :  { %4371 = vrsqrt.f32 %v3494_v56 }
0x42d8   :  { %v4372_v48 = vpop.eup %4371 }
0x42d9   :  { %v3496_v21 = vmul.f32 %v4372_v48, %v3488_v30 }
0x42db   :  { %v3503_v51 = vmul.f32 %v3615_v12, %v3496_v21 }
0x42dd   :  { %v3510_v5 = vadd.f32 %v3616_v57, %v3503_v51 }
0x42df   :  { %v3617_v49 = vmul.f32 -1.442695, %v3510_v5 }
0x42e1   :  { %4373 = vpow2.f32 %v3617_v49 }
0x42ee   :  { %v4374_v58 = vpop.eup %4373 }
0x42ef   :  { %v3514_v38 = vadd.f32 1.0, %v4374_v58 }
0x42f1   :  { %4375 = vrcp.f32 %v3514_v38 }
0x42fe   :  { %v4376_v3 = vpop.eup %4375 }
0x42ff   :  { %v3517_v6 = vmul.f32 %v4376_v3, %v3510_v5 }
0x4301   :  { %v3525_v59 = vmul.f32 %v3618_v61, %v3517_v6 }
0x4303   :  { %v3526_v24 = vsel %vm3482_vm8, %v3525_v59, 0.0 }
0x4304   :  { %3527 = vadd.xlane.f32.xlu1 %v3526_v24 }
0x438d   :  { %v3528_v60 = vpop.xlane.xlu1 %3527 }
0x438e   :  { %v3536_v53 = vadd.f32 %v3619_v39, %v3528_v60 }
0x4390   :  { %3538 = vst.msk [vmem:[%s5456_s23] sm:$0x3] %vm3537_vm9, %v3536_v53 }
0x4391   :  { %3543 = vsyncpa [#allocation4], 1 }
0x4392   :  { %3544 = vsyncpa [#allocation6], 1 }
0x4393   :  { %3545 = vsyncpa [#allocation9], 1 }
0x4394   :  { %3546 = vsyncpa [#allocation12], 1 }
0x4395   :  { %3547 = vsyncpa [#allocation15], 1 }

</bundles_post_ra>
